<compile_context>
chip_gen: v7x
topology: tpu7x:2x2x1
jax: 0.10.0
libtpu: 0.0.40
codegen_flags: <defaults>
</compile_context>

<pallas_src>
import jax
import jax.numpy as jnp
from jax import lax
from jax.experimental import pallas as pl
from jax.experimental.pallas import tpu as pltpu


# ---------------------------------------------------------------------------
# Fused decoder kernel
# ---------------------------------------------------------------------------
def _decoder_kernel(z_ref, lw_ref, lb_ref, wih_ref, whh_ref, bih_ref, bhh_ref,
                    emb_ref, out_ref, cls_ref, x_scr):
    # z_ref   : (B, z_dim)
    # lw_ref  : (T, z_dim, H)   linear weight, pre-split per time step (implements Reshape1DTo2D)
    # lb_ref  : (T, 1, H)
    # wih_ref : (L*3, H, H)     per-gate transposed input-to-hidden weights (gate order r|z|n)
    # whh_ref : (L*3, H, H)     per-gate transposed hidden-to-hidden weights
    # bih_ref : (L*3, 1, H)
    # bhh_ref : (L*3, 1, H)
    # emb_ref : (E, 1, T*H)     embedding values pre-broadcast along lanes
    # out_ref : (B, T*H)        flat GRU output (lane-dense)
    # cls_ref : (B, T*H)        flat classification indices as float32 (lane-dense)
    # x_scr   : (T*B, H)        layer activations, time-major, reused across layers
    TB, H = x_scr.shape
    T = lw_ref.shape[0]
    B = TB // T
    L = wih_ref.shape[0] // 3
    E = emb_ref.shape[0]

    # ---- Linear + Dropout(eval)=identity + Reshape1DTo2D + time-major, in one pass ----
    z = z_ref[...]
    for t in range(T):  # static; 8 tiny dots off the recurrence critical path
        x_scr[t * B:(t + 1) * B, :] = (
            jnp.dot(z, lw_ref[t], preferred_element_type=jnp.float32) + lb_ref[t]
        )
    # TODO(synk): training-mode stochastic dropout not reproduced (eval-mode identity only).

    # ---- 4-layer GRU (torch gate order r|z|n), h0 = 0, fully unrolled ----
    for l in range(L):  # static small layer count
        x_all = x_scr[...]                                                    # (T*B, H)
        # Hoisted input-to-hidden matmuls (independent of h), one dot per gate per layer.
        gi_r = jnp.dot(x_all, wih_ref[3 * l + 0],
                       preferred_element_type=jnp.float32) + bih_ref[3 * l + 0]
        gi_z = jnp.dot(x_all, wih_ref[3 * l + 1],
                       preferred_element_type=jnp.float32) + bih_ref[3 * l + 1]
        gi_n = jnp.dot(x_all, wih_ref[3 * l + 2],
                       preferred_element_type=jnp.float32) + bih_ref[3 * l + 2]
        wh_r = whh_ref[3 * l + 0]
        wh_z = whh_ref[3 * l + 1]
        wh_n = whh_ref[3 * l + 2]
        bh_r = bhh_ref[3 * l + 0]
        bh_z = bhh_ref[3 * l + 1]
        bh_n = bhh_ref[3 * l + 2]

        h = None
        for t in range(T):  # static unrolled recurrence (T = 8)
            lo = t * B
            if t == 0:
                # h0 == 0  ->  W_hh @ h0 == 0, only the bias remains.
                gh_r, gh_z, gh_n = bh_r, bh_z, bh_n
            else:
                gh_r = jnp.dot(h, wh_r, preferred_element_type=jnp.float32) + bh_r
                gh_z = jnp.dot(h, wh_z, preferred_element_type=jnp.float32) + bh_z
                gh_n = jnp.dot(h, wh_n, preferred_element_type=jnp.float32) + bh_n
            r = jax.nn.sigmoid(gi_r[lo:lo + B, :] + gh_r)
            zg = jax.nn.sigmoid(gi_z[lo:lo + B, :] + gh_z)
            n = jnp.tanh(gi_n[lo:lo + B, :] + r * gh_n)
            if t == 0:
                h = (1.0 - zg) * n
            else:
                h = (1.0 - zg) * n + zg * h
            x_scr[lo:lo + B, :] = h        # in-place -> input of next layer

    # ---- lane-dense flat output: out[b, t*H + h] = gru_out[t, b, h] ----
    out_flat = jnp.concatenate(
        [x_scr[t * B:(t + 1) * B, :] for t in range(T)], axis=1)             # (B, T*H)
    out_ref[...] = out_flat                                                  # single unmasked store

    # ---- nearest-embedding classification (vectorized, first-min argmin) ----
    emb = emb_ref[...]                                   # (E, 1, T*H)
    d = jnp.abs(out_flat[None, :, :] - emb)              # (E, B, T*H)
    dmin = jnp.min(d, axis=0)                            # (B, T*H), elementwise min over E
    idx = lax.broadcasted_iota(jnp.int32, d.shape, 0).astype(jnp.float32)
    cand = jnp.where(d <= dmin[None, :, :], idx, jnp.float32(E))
    cls_ref[...] = jnp.min(cand, axis=0)                 # float32 indices (as in previous kernel)


# ---------------------------------------------------------------------------
# Wrapper: full DecoderCategorical.forward (clamp_output=False path)
# ---------------------------------------------------------------------------
def decoder_categorical_forward(z, params):
    B = z.shape[0]
    seq_len, seq_width = params["output_shape"]
    H, T = seq_len, seq_width
    TH = T * H

    out_flat, cls_flat = pl.pallas_call(
        _decoder_kernel,
        out_shape=(jax.ShapeDtypeStruct((B, TH), jnp.float32),
                   jax.ShapeDtypeStruct((B, TH), jnp.float32)),
        in_specs=[pl.BlockSpec(memory_space=pltpu.MemorySpace.VMEM)] * 8,
        out_specs=(pl.BlockSpec(memory_space=pltpu.MemorySpace.VMEM),
                   pl.BlockSpec(memory_space=pltpu.MemorySpace.VMEM)),
        scratch_shapes=[pltpu.VMEM((T * B, H), jnp.float32)],
    )(z, params["lw_tzh"], params["lb_t1h"], params["wih_g"], params["whh_g"],
      params["bih_g"], params["bhh_g"], params["emb_b"])

    # torch: output.reshape((-1, seq_len, seq_width)) -- free metadata reshape of contiguous data.
    output = out_flat.reshape(B, seq_len, seq_width)
    classification = cls_flat.reshape(B, seq_len, seq_width)
    # TODO(synk): the `output.shape[0] == MAX_MIDI_ENCODING_ROWS` branch depends on an undefined
    # global in the reference; only the B != MAX_MIDI_ENCODING_ROWS path is implemented.
    return classification, output


# ---------------------------------------------------------------------------
# Deterministic parameter construction (shapes from the torch module __init__),
# with host-side repacking into kernel-friendly layouts (one-time, free).
# ---------------------------------------------------------------------------
def init_params(key, z_dim, output_shape, num_embeddings):
    seq_len, seq_width = output_shape
    H, T = seq_len, seq_width
    TH = T * H
    L = 4
    ks = jax.random.split(key, 7)
    lin_w = jax.random.normal(ks[0], (TH, z_dim), jnp.float32) * 0.1       # nn.Linear weight
    lin_b = jax.random.normal(ks[1], (TH,), jnp.float32) * 0.1
    wih = jax.random.normal(ks[2], (L, 3 * H, H), jnp.float32) * 0.1        # GRU weight_ih_l*
    whh = jax.random.normal(ks[3], (L, 3 * H, H), jnp.float32) * 0.1        # GRU weight_hh_l*
    bih = jax.random.normal(ks[4], (L, 3 * H), jnp.float32) * 0.1
    bhh = jax.random.normal(ks[5], (L, 3 * H), jnp.float32) * 0.1
    emb_w = jax.random.normal(ks[6], (num_embeddings, 1), jnp.float32)      # nn.Embedding(E, 1)

    # Linear weight split per time step: lw_tzh[t, k, h] = lin_w[t*H + h, k]
    lw_tzh = jnp.transpose(lin_w.reshape(T, H, z_dim), (0, 2, 1))           # (T, z_dim, H)
    lb_t1h = lin_b.reshape(T, 1, H)                                         # (T, 1, H)

    # Per-gate transposed GRU weights (gate order r|z|n): wih_g[3l+g] = W_ih_l[g*H:(g+1)*H].T
    wih_g = jnp.transpose(wih.reshape(L, 3, H, H), (0, 1, 3, 2)).reshape(L * 3, H, H)
    whh_g = jnp.transpose(whh.reshape(L, 3, H, H), (0, 1, 3, 2)).reshape(L * 3, H, H)
    bih_g = bih.reshape(L * 3, 1, H)
    bhh_g = bhh.reshape(L * 3, 1, H)

    # Embedding values pre-broadcast along the lane-dense output width.
    emb_vals = emb_w[:, 0]                                                  # (E,), embedding_dim == 1
    emb_b = emb_vals.reshape(num_embeddings, 1, 1) * jnp.ones((1, 1, TH), jnp.float32)

    return dict(
        output_shape=output_shape,
        lw_tzh=lw_tzh, lb_t1h=lb_t1h,
        wih_g=wih_g, whh_g=whh_g, bih_g=bih_g, bhh_g=bhh_g,
        emb_b=emb_b,
    )


if __name__ == "__main__":
    z_dim = 32
    output_shape = (16, 8)     # (seq_len, seq_width)
    batch = 2
    num_embeddings = 16

    key = jax.random.PRNGKey(0)
    kz, kp = jax.random.split(key)
    z = jax.random.normal(kz, (batch, z_dim), jnp.float32)
    params = init_params(kp, z_dim, output_shape, num_embeddings)

    classification, output = decoder_categorical_forward(z, params)
    jax.block_until_ready((classification, output))

    assert classification.shape == (batch, output_shape[0], output_shape[1])
    assert output.shape == (batch, output_shape[0], output_shape[1])
    assert classification.dtype == jnp.float32 and output.dtype == jnp.float32
    assert bool(jnp.all(jnp.isfinite(output)))
    assert bool(jnp.all((classification >= 0) & (classification < num_embeddings)))
    print("KERNEL_OK")
</pallas_src>

<mosaic_0001>
module attributes {stable_mosaic.version = 11 : i64} {
  func.func @_decoder_kernel(%arg0: memref<2x32xf32, #tpu.memory_space<vmem>>, %arg1: memref<8x32x16xf32, #tpu.memory_space<vmem>>, %arg2: memref<8x1x16xf32, #tpu.memory_space<vmem>>, %arg3: memref<12x16x16xf32, #tpu.memory_space<vmem>>, %arg4: memref<12x16x16xf32, #tpu.memory_space<vmem>>, %arg5: memref<12x1x16xf32, #tpu.memory_space<vmem>>, %arg6: memref<12x1x16xf32, #tpu.memory_space<vmem>>, %arg7: memref<16x1x128xf32, #tpu.memory_space<vmem>>, %arg8: memref<2x128xf32, #tpu.memory_space<vmem>>, %arg9: memref<2x128xf32, #tpu.memory_space<vmem>>, %arg10: memref<16x16xf32, #tpu.memory_space<vmem>>) attributes {dimension_semantics = [], scalar_prefetch = 0 : i64, scratch_operands = 1 : i64, tpu.core_type = #tpu.core_type<tc>} {
    %c0 = arith.constant 0 : index
    %c0_0 = arith.constant 0 : index
    %0 = vector.load %arg0[%c0, %c0_0] : memref<2x32xf32, #tpu.memory_space<vmem>>, vector<2x32xf32>
    %c0_1 = arith.constant 0 : index
    %c0_2 = arith.constant 0 : index
    %c0_3 = arith.constant 0 : index
    %1 = vector.load %arg1[%c0_1, %c0_2, %c0_3] : memref<8x32x16xf32, #tpu.memory_space<vmem>>, vector<1x32x16xf32>
    %2 = vector.shape_cast %1 : vector<1x32x16xf32> to vector<32x16xf32>
    %cst = arith.constant dense<0.000000e+00> : vector<2x16xf32>
    %3 = tpu.matmul %0, %2, %cst {dimension_numbers = #tpu.dot_dimension_numbers<[1], [0], [0], [1], [0, 0, 1, 1], [], []>} : vector<2x32xf32>, vector<32x16xf32>, vector<2x16xf32> -> vector<2x16xf32>
    %c0_4 = arith.constant 0 : index
    %c0_5 = arith.constant 0 : index
    %c0_6 = arith.constant 0 : index
    %4 = vector.load %arg2[%c0_4, %c0_5, %c0_6] : memref<8x1x16xf32, #tpu.memory_space<vmem>>, vector<1x1x16xf32>
    %5 = vector.shape_cast %4 : vector<1x1x16xf32> to vector<1x16xf32>
    %6 = vector.broadcast %5 : vector<1x16xf32> to vector<2x16xf32>
    %7 = arith.addf %3, %6 : vector<2x16xf32>
    %c0_7 = arith.constant 0 : index
    %c0_8 = arith.constant 0 : index
    %8 = vector.load %arg10[%c0_7, %c0_8] : memref<16x16xf32, #tpu.memory_space<vmem>>, vector<2x16xf32>
    tpu.vector_store %arg10[%c0_7, %c0_8], %7 {strides = array<i32>} : memref<16x16xf32, #tpu.memory_space<vmem>>, vector<2x16xf32>,
    %c1 = arith.constant 1 : index
    %c0_9 = arith.constant 0 : index
    %c0_10 = arith.constant 0 : index
    %9 = vector.load %arg1[%c1, %c0_9, %c0_10] : memref<8x32x16xf32, #tpu.memory_space<vmem>>, vector<1x32x16xf32>
    %10 = vector.shape_cast %9 : vector<1x32x16xf32> to vector<32x16xf32>
    %cst_11 = arith.constant dense<0.000000e+00> : vector<2x16xf32>
    %11 = tpu.matmul %0, %10, %cst_11 {dimension_numbers = #tpu.dot_dimension_numbers<[1], [0], [0], [1], [0, 0, 1, 1], [], []>} : vector<2x32xf32>, vector<32x16xf32>, vector<2x16xf32> -> vector<2x16xf32>
    %c1_12 = arith.constant 1 : index
    %c0_13 = arith.constant 0 : index
    %c0_14 = arith.constant 0 : index
    %12 = vector.load %arg2[%c1_12, %c0_13, %c0_14] : memref<8x1x16xf32, #tpu.memory_space<vmem>>, vector<1x1x16xf32>
    %13 = vector.shape_cast %12 : vector<1x1x16xf32> to vector<1x16xf32>
    %14 = vector.broadcast %13 : vector<1x16xf32> to vector<2x16xf32>
    %15 = arith.addf %11, %14 : vector<2x16xf32>
    %c2 = arith.constant 2 : index
    %c0_15 = arith.constant 0 : index
    %16 = vector.load %arg10[%c2, %c0_15] : memref<16x16xf32, #tpu.memory_space<vmem>>, vector<2x16xf32>
    tpu.vector_store %arg10[%c2, %c0_15], %15 {strides = array<i32>} : memref<16x16xf32, #tpu.memory_space<vmem>>, vector<2x16xf32>,
    %c2_16 = arith.constant 2 : index
    %c0_17 = arith.constant 0 : index
    %c0_18 = arith.constant 0 : index
    %17 = vector.load %arg1[%c2_16, %c0_17, %c0_18] : memref<8x32x16xf32, #tpu.memory_space<vmem>>, vector<1x32x16xf32>
    %18 = vector.shape_cast %17 : vector<1x32x16xf32> to vector<32x16xf32>
    %cst_19 = arith.constant dense<0.000000e+00> : vector<2x16xf32>
    %19 = tpu.matmul %0, %18, %cst_19 {dimension_numbers = #tpu.dot_dimension_numbers<[1], [0], [0], [1], [0, 0, 1, 1], [], []>} : vector<2x32xf32>, vector<32x16xf32>, vector<2x16xf32> -> vector<2x16xf32>
    %c2_20 = arith.constant 2 : index
    %c0_21 = arith.constant 0 : index
    %c0_22 = arith.constant 0 : index
    %20 = vector.load %arg2[%c2_20, %c0_21, %c0_22] : memref<8x1x16xf32, #tpu.memory_space<vmem>>, vector<1x1x16xf32>
    %21 = vector.shape_cast %20 : vector<1x1x16xf32> to vector<1x16xf32>
    %22 = vector.broadcast %21 : vector<1x16xf32> to vector<2x16xf32>
    %23 = arith.addf %19, %22 : vector<2x16xf32>
    %c4 = arith.constant 4 : index
    %c0_23 = arith.constant 0 : index
    %24 = vector.load %arg10[%c4, %c0_23] : memref<16x16xf32, #tpu.memory_space<vmem>>, vector<2x16xf32>
    tpu.vector_store %arg10[%c4, %c0_23], %23 {strides = array<i32>} : memref<16x16xf32, #tpu.memory_space<vmem>>, vector<2x16xf32>,
    %c3 = arith.constant 3 : index
    %c0_24 = arith.constant 0 : index
    %c0_25 = arith.constant 0 : index
    %25 = vector.load %arg1[%c3, %c0_24, %c0_25] : memref<8x32x16xf32, #tpu.memory_space<vmem>>, vector<1x32x16xf32>
    %26 = vector.shape_cast %25 : vector<1x32x16xf32> to vector<32x16xf32>
    %cst_26 = arith.constant dense<0.000000e+00> : vector<2x16xf32>
    %27 = tpu.matmul %0, %26, %cst_26 {dimension_numbers = #tpu.dot_dimension_numbers<[1], [0], [0], [1], [0, 0, 1, 1], [], []>} : vector<2x32xf32>, vector<32x16xf32>, vector<2x16xf32> -> vector<2x16xf32>
    %c3_27 = arith.constant 3 : index
    %c0_28 = arith.constant 0 : index
    %c0_29 = arith.constant 0 : index
    %28 = vector.load %arg2[%c3_27, %c0_28, %c0_29] : memref<8x1x16xf32, #tpu.memory_space<vmem>>, vector<1x1x16xf32>
    %29 = vector.shape_cast %28 : vector<1x1x16xf32> to vector<1x16xf32>
    %30 = vector.broadcast %29 : vector<1x16xf32> to vector<2x16xf32>
    %31 = arith.addf %27, %30 : vector<2x16xf32>
    %c6 = arith.constant 6 : index
    %c0_30 = arith.constant 0 : index
    %32 = vector.load %arg10[%c6, %c0_30] : memref<16x16xf32, #tpu.memory_space<vmem>>, vector<2x16xf32>
    tpu.vector_store %arg10[%c6, %c0_30], %31 {strides = array<i32>} : memref<16x16xf32, #tpu.memory_space<vmem>>, vector<2x16xf32>,
    %c4_31 = arith.constant 4 : index
    %c0_32 = arith.constant 0 : index
    %c0_33 = arith.constant 0 : index
    %33 = vector.load %arg1[%c4_31, %c0_32, %c0_33] : memref<8x32x16xf32, #tpu.memory_space<vmem>>, vector<1x32x16xf32>
    %34 = vector.shape_cast %33 : vector<1x32x16xf32> to vector<32x16xf32>
    %cst_34 = arith.constant dense<0.000000e+00> : vector<2x16xf32>
    %35 = tpu.matmul %0, %34, %cst_34 {dimension_numbers = #tpu.dot_dimension_numbers<[1], [0], [0], [1], [0, 0, 1, 1], [], []>} : vector<2x32xf32>, vector<32x16xf32>, vector<2x16xf32> -> vector<2x16xf32>
    %c4_35 = arith.constant 4 : index
    %c0_36 = arith.constant 0 : index
    %c0_37 = arith.constant 0 : index
    %36 = vector.load %arg2[%c4_35, %c0_36, %c0_37] : memref<8x1x16xf32, #tpu.memory_space<vmem>>, vector<1x1x16xf32>
    %37 = vector.shape_cast %36 : vector<1x1x16xf32> to vector<1x16xf32>
    %38 = vector.broadcast %37 : vector<1x16xf32> to vector<2x16xf32>
    %39 = arith.addf %35, %38 : vector<2x16xf32>
    %c8 = arith.constant 8 : index
    %c0_38 = arith.constant 0 : index
    %40 = vector.load %arg10[%c8, %c0_38] : memref<16x16xf32, #tpu.memory_space<vmem>>, vector<2x16xf32>
    tpu.vector_store %arg10[%c8, %c0_38], %39 {strides = array<i32>} : memref<16x16xf32, #tpu.memory_space<vmem>>, vector<2x16xf32>,
    %c5 = arith.constant 5 : index
    %c0_39 = arith.constant 0 : index
    %c0_40 = arith.constant 0 : index
    %41 = vector.load %arg1[%c5, %c0_39, %c0_40] : memref<8x32x16xf32, #tpu.memory_space<vmem>>, vector<1x32x16xf32>
    %42 = vector.shape_cast %41 : vector<1x32x16xf32> to vector<32x16xf32>
    %cst_41 = arith.constant dense<0.000000e+00> : vector<2x16xf32>
    %43 = tpu.matmul %0, %42, %cst_41 {dimension_numbers = #tpu.dot_dimension_numbers<[1], [0], [0], [1], [0, 0, 1, 1], [], []>} : vector<2x32xf32>, vector<32x16xf32>, vector<2x16xf32> -> vector<2x16xf32>
    %c5_42 = arith.constant 5 : index
    %c0_43 = arith.constant 0 : index
    %c0_44 = arith.constant 0 : index
    %44 = vector.load %arg2[%c5_42, %c0_43, %c0_44] : memref<8x1x16xf32, #tpu.memory_space<vmem>>, vector<1x1x16xf32>
    %45 = vector.shape_cast %44 : vector<1x1x16xf32> to vector<1x16xf32>
    %46 = vector.broadcast %45 : vector<1x16xf32> to vector<2x16xf32>
    %47 = arith.addf %43, %46 : vector<2x16xf32>
    %c10 = arith.constant 10 : index
    %c0_45 = arith.constant 0 : index
    %48 = vector.load %arg10[%c10, %c0_45] : memref<16x16xf32, #tpu.memory_space<vmem>>, vector<2x16xf32>
    tpu.vector_store %arg10[%c10, %c0_45], %47 {strides = array<i32>} : memref<16x16xf32, #tpu.memory_space<vmem>>, vector<2x16xf32>,
    %c6_46 = arith.constant 6 : index
    %c0_47 = arith.constant 0 : index
    %c0_48 = arith.constant 0 : index
    %49 = vector.load %arg1[%c6_46, %c0_47, %c0_48] : memref<8x32x16xf32, #tpu.memory_space<vmem>>, vector<1x32x16xf32>
    %50 = vector.shape_cast %49 : vector<1x32x16xf32> to vector<32x16xf32>
    %cst_49 = arith.constant dense<0.000000e+00> : vector<2x16xf32>
    %51 = tpu.matmul %0, %50, %cst_49 {dimension_numbers = #tpu.dot_dimension_numbers<[1], [0], [0], [1], [0, 0, 1, 1], [], []>} : vector<2x32xf32>, vector<32x16xf32>, vector<2x16xf32> -> vector<2x16xf32>
    %c6_50 = arith.constant 6 : index
    %c0_51 = arith.constant 0 : index
    %c0_52 = arith.constant 0 : index
    %52 = vector.load %arg2[%c6_50, %c0_51, %c0_52] : memref<8x1x16xf32, #tpu.memory_space<vmem>>, vector<1x1x16xf32>
    %53 = vector.shape_cast %52 : vector<1x1x16xf32> to vector<1x16xf32>
    %54 = vector.broadcast %53 : vector<1x16xf32> to vector<2x16xf32>
    %55 = arith.addf %51, %54 : vector<2x16xf32>
    %c12 = arith.constant 12 : index
    %c0_53 = arith.constant 0 : index
    %56 = vector.load %arg10[%c12, %c0_53] : memref<16x16xf32, #tpu.memory_space<vmem>>, vector<2x16xf32>
    tpu.vector_store %arg10[%c12, %c0_53], %55 {strides = array<i32>} : memref<16x16xf32, #tpu.memory_space<vmem>>, vector<2x16xf32>,
    %c7 = arith.constant 7 : index
    %c0_54 = arith.constant 0 : index
    %c0_55 = arith.constant 0 : index
    %57 = vector.load %arg1[%c7, %c0_54, %c0_55] : memref<8x32x16xf32, #tpu.memory_space<vmem>>, vector<1x32x16xf32>
    %58 = vector.shape_cast %57 : vector<1x32x16xf32> to vector<32x16xf32>
    %cst_56 = arith.constant dense<0.000000e+00> : vector<2x16xf32>
    %59 = tpu.matmul %0, %58, %cst_56 {dimension_numbers = #tpu.dot_dimension_numbers<[1], [0], [0], [1], [0, 0, 1, 1], [], []>} : vector<2x32xf32>, vector<32x16xf32>, vector<2x16xf32> -> vector<2x16xf32>
    %c7_57 = arith.constant 7 : index
    %c0_58 = arith.constant 0 : index
    %c0_59 = arith.constant 0 : index
    %60 = vector.load %arg2[%c7_57, %c0_58, %c0_59] : memref<8x1x16xf32, #tpu.memory_space<vmem>>, vector<1x1x16xf32>
    %61 = vector.shape_cast %60 : vector<1x1x16xf32> to vector<1x16xf32>
    %62 = vector.broadcast %61 : vector<1x16xf32> to vector<2x16xf32>
    %63 = arith.addf %59, %62 : vector<2x16xf32>
    %c14 = arith.constant 14 : index
    %c0_60 = arith.constant 0 : index
    %64 = vector.load %arg10[%c14, %c0_60] : memref<16x16xf32, #tpu.memory_space<vmem>>, vector<2x16xf32>
    tpu.vector_store %arg10[%c14, %c0_60], %63 {strides = array<i32>} : memref<16x16xf32, #tpu.memory_space<vmem>>, vector<2x16xf32>,
    %c0_61 = arith.constant 0 : index
    %c0_62 = arith.constant 0 : index
    %65 = vector.load %arg10[%c0_61, %c0_62] : memref<16x16xf32, #tpu.memory_space<vmem>>, vector<16x16xf32>
    %c0_63 = arith.constant 0 : index
    %c0_64 = arith.constant 0 : index
    %c0_65 = arith.constant 0 : index
    %66 = vector.load %arg3[%c0_63, %c0_64, %c0_65] : memref<12x16x16xf32, #tpu.memory_space<vmem>>, vector<1x16x16xf32>
    %67 = vector.shape_cast %66 : vector<1x16x16xf32> to vector<16x16xf32>
    %cst_66 = arith.constant dense<0.000000e+00> : vector<16x16xf32>
    %68 = tpu.matmul %65, %67, %cst_66 {dimension_numbers = #tpu.dot_dimension_numbers<[1], [0], [0], [1], [0, 0, 1, 1], [], []>} : vector<16x16xf32>, vector<16x16xf32>, vector<16x16xf32> -> vector<16x16xf32>
    %c0_67 = arith.constant 0 : index
    %c0_68 = arith.constant 0 : index
    %c0_69 = arith.constant 0 : index
    %69 = vector.load %arg5[%c0_67, %c0_68, %c0_69] : memref<12x1x16xf32, #tpu.memory_space<vmem>>, vector<1x1x16xf32>
    %70 = vector.shape_cast %69 : vector<1x1x16xf32> to vector<1x16xf32>
    %71 = vector.broadcast %70 : vector<1x16xf32> to vector<16x16xf32>
    %72 = arith.addf %68, %71 : vector<16x16xf32>
    %c1_70 = arith.constant 1 : index
    %c0_71 = arith.constant 0 : index
    %c0_72 = arith.constant 0 : index
    %73 = vector.load %arg3[%c1_70, %c0_71, %c0_72] : memref<12x16x16xf32, #tpu.memory_space<vmem>>, vector<1x16x16xf32>
    %74 = vector.shape_cast %73 : vector<1x16x16xf32> to vector<16x16xf32>
    %cst_73 = arith.constant dense<0.000000e+00> : vector<16x16xf32>
    %75 = tpu.matmul %65, %74, %cst_73 {dimension_numbers = #tpu.dot_dimension_numbers<[1], [0], [0], [1], [0, 0, 1, 1], [], []>} : vector<16x16xf32>, vector<16x16xf32>, vector<16x16xf32> -> vector<16x16xf32>
    %c1_74 = arith.constant 1 : index
    %c0_75 = arith.constant 0 : index
    %c0_76 = arith.constant 0 : index
    %76 = vector.load %arg5[%c1_74, %c0_75, %c0_76] : memref<12x1x16xf32, #tpu.memory_space<vmem>>, vector<1x1x16xf32>
    %77 = vector.shape_cast %76 : vector<1x1x16xf32> to vector<1x16xf32>
    %78 = vector.broadcast %77 : vector<1x16xf32> to vector<16x16xf32>
    %79 = arith.addf %75, %78 : vector<16x16xf32>
    %c2_77 = arith.constant 2 : index
    %c0_78 = arith.constant 0 : index
    %c0_79 = arith.constant 0 : index
    %80 = vector.load %arg3[%c2_77, %c0_78, %c0_79] : memref<12x16x16xf32, #tpu.memory_space<vmem>>, vector<1x16x16xf32>
    %81 = vector.shape_cast %80 : vector<1x16x16xf32> to vector<16x16xf32>
    %cst_80 = arith.constant dense<0.000000e+00> : vector<16x16xf32>
    %82 = tpu.matmul %65, %81, %cst_80 {dimension_numbers = #tpu.dot_dimension_numbers<[1], [0], [0], [1], [0, 0, 1, 1], [], []>} : vector<16x16xf32>, vector<16x16xf32>, vector<16x16xf32> -> vector<16x16xf32>
    %c2_81 = arith.constant 2 : index
    %c0_82 = arith.constant 0 : index
    %c0_83 = arith.constant 0 : index
    %83 = vector.load %arg5[%c2_81, %c0_82, %c0_83] : memref<12x1x16xf32, #tpu.memory_space<vmem>>, vector<1x1x16xf32>
    %84 = vector.shape_cast %83 : vector<1x1x16xf32> to vector<1x16xf32>
    %85 = vector.broadcast %84 : vector<1x16xf32> to vector<16x16xf32>
    %86 = arith.addf %82, %85 : vector<16x16xf32>
    %c0_84 = arith.constant 0 : index
    %c0_85 = arith.constant 0 : index
    %c0_86 = arith.constant 0 : index
    %87 = vector.load %arg4[%c0_84, %c0_85, %c0_86] : memref<12x16x16xf32, #tpu.memory_space<vmem>>, vector<1x16x16xf32>
    %88 = vector.shape_cast %87 : vector<1x16x16xf32> to vector<16x16xf32>
    %c1_87 = arith.constant 1 : index
    %c0_88 = arith.constant 0 : index
    %c0_89 = arith.constant 0 : index
    %89 = vector.load %arg4[%c1_87, %c0_88, %c0_89] : memref<12x16x16xf32, #tpu.memory_space<vmem>>, vector<1x16x16xf32>
    %90 = vector.shape_cast %89 : vector<1x16x16xf32> to vector<16x16xf32>
    %c2_90 = arith.constant 2 : index
    %c0_91 = arith.constant 0 : index
    %c0_92 = arith.constant 0 : index
    %91 = vector.load %arg4[%c2_90, %c0_91, %c0_92] : memref<12x16x16xf32, #tpu.memory_space<vmem>>, vector<1x16x16xf32>
    %92 = vector.shape_cast %91 : vector<1x16x16xf32> to vector<16x16xf32>
    %c0_93 = arith.constant 0 : index
    %c0_94 = arith.constant 0 : index
    %c0_95 = arith.constant 0 : index
    %93 = vector.load %arg6[%c0_93, %c0_94, %c0_95] : memref<12x1x16xf32, #tpu.memory_space<vmem>>, vector<1x1x16xf32>
    %94 = vector.shape_cast %93 : vector<1x1x16xf32> to vector<1x16xf32>
    %c1_96 = arith.constant 1 : index
    %c0_97 = arith.constant 0 : index
    %c0_98 = arith.constant 0 : index
    %95 = vector.load %arg6[%c1_96, %c0_97, %c0_98] : memref<12x1x16xf32, #tpu.memory_space<vmem>>, vector<1x1x16xf32>
    %96 = vector.shape_cast %95 : vector<1x1x16xf32> to vector<1x16xf32>
    %c2_99 = arith.constant 2 : index
    %c0_100 = arith.constant 0 : index
    %c0_101 = arith.constant 0 : index
    %97 = vector.load %arg6[%c2_99, %c0_100, %c0_101] : memref<12x1x16xf32, #tpu.memory_space<vmem>>, vector<1x1x16xf32>
    %98 = vector.shape_cast %97 : vector<1x1x16xf32> to vector<1x16xf32>
    %99 = vector.extract_strided_slice %72 {offsets = [0, 0], sizes = [2, 16], strides = [1, 1]} : vector<16x16xf32> to vector<2x16xf32>
    %100 = vector.broadcast %94 : vector<1x16xf32> to vector<2x16xf32>
    %101 = arith.addf %99, %100 : vector<2x16xf32>
    %102 = arith.negf %101 : vector<2x16xf32>
    %103 = math.exp %102 : vector<2x16xf32>
    %cst_102 = arith.constant 1.000000e+00 : f32
    %104 = vector.broadcast %cst_102 : f32 to vector<2x16xf32>
    %105 = arith.addf %104, %103 : vector<2x16xf32>
    %106 = arith.divf %104, %105 : vector<2x16xf32>
    %107 = vector.extract_strided_slice %79 {offsets = [0, 0], sizes = [2, 16], strides = [1, 1]} : vector<16x16xf32> to vector<2x16xf32>
    %108 = vector.broadcast %96 : vector<1x16xf32> to vector<2x16xf32>
    %109 = arith.addf %107, %108 : vector<2x16xf32>
    %110 = arith.negf %109 : vector<2x16xf32>
    %111 = math.exp %110 : vector<2x16xf32>
    %cst_103 = arith.constant 1.000000e+00 : f32
    %112 = vector.broadcast %cst_103 : f32 to vector<2x16xf32>
    %113 = arith.addf %112, %111 : vector<2x16xf32>
    %114 = arith.divf %112, %113 : vector<2x16xf32>
    %115 = vector.extract_strided_slice %86 {offsets = [0, 0], sizes = [2, 16], strides = [1, 1]} : vector<16x16xf32> to vector<2x16xf32>
    %116 = vector.broadcast %98 : vector<1x16xf32> to vector<2x16xf32>
    %117 = arith.mulf %106, %116 : vector<2x16xf32>
    %118 = arith.addf %115, %117 : vector<2x16xf32>
    %119 = math.tanh %118 : vector<2x16xf32>
    %cst_104 = arith.constant 1.000000e+00 : f32
    %120 = vector.broadcast %cst_104 : f32 to vector<2x16xf32>
    %121 = arith.subf %120, %114 : vector<2x16xf32>
    %122 = arith.mulf %121, %119 : vector<2x16xf32>
    %c0_105 = arith.constant 0 : index
    %c0_106 = arith.constant 0 : index
    %123 = vector.load %arg10[%c0_105, %c0_106] : memref<16x16xf32, #tpu.memory_space<vmem>>, vector<2x16xf32>
    tpu.vector_store %arg10[%c0_105, %c0_106], %122 {strides = array<i32>} : memref<16x16xf32, #tpu.memory_space<vmem>>, vector<2x16xf32>,
    %cst_107 = arith.constant dense<0.000000e+00> : vector<2x16xf32>
    %124 = tpu.matmul %122, %88, %cst_107 {dimension_numbers = #tpu.dot_dimension_numbers<[1], [0], [0], [1], [0, 0, 1, 1], [], []>} : vector<2x16xf32>, vector<16x16xf32>, vector<2x16xf32> -> vector<2x16xf32>
    %125 = vector.broadcast %94 : vector<1x16xf32> to vector<2x16xf32>
    %126 = arith.addf %124, %125 : vector<2x16xf32>
    %cst_108 = arith.constant dense<0.000000e+00> : vector<2x16xf32>
    %127 = tpu.matmul %122, %90, %cst_108 {dimension_numbers = #tpu.dot_dimension_numbers<[1], [0], [0], [1], [0, 0, 1, 1], [], []>} : vector<2x16xf32>, vector<16x16xf32>, vector<2x16xf32> -> vector<2x16xf32>
    %128 = vector.broadcast %96 : vector<1x16xf32> to vector<2x16xf32>
    %129 = arith.addf %127, %128 : vector<2x16xf32>
    %cst_109 = arith.constant dense<0.000000e+00> : vector<2x16xf32>
    %130 = tpu.matmul %122, %92, %cst_109 {dimension_numbers = #tpu.dot_dimension_numbers<[1], [0], [0], [1], [0, 0, 1, 1], [], []>} : vector<2x16xf32>, vector<16x16xf32>, vector<2x16xf32> -> vector<2x16xf32>
    %131 = vector.broadcast %98 : vector<1x16xf32> to vector<2x16xf32>
    %132 = arith.addf %130, %131 : vector<2x16xf32>
    %133 = vector.extract_strided_slice %72 {offsets = [2, 0], sizes = [2, 16], strides = [1, 1]} : vector<16x16xf32> to vector<2x16xf32>
    %134 = arith.addf %133, %126 : vector<2x16xf32>
    %135 = arith.negf %134 : vector<2x16xf32>
    %136 = math.exp %135 : vector<2x16xf32>
    %cst_110 = arith.constant 1.000000e+00 : f32
    %137 = vector.broadcast %cst_110 : f32 to vector<2x16xf32>
    %138 = arith.addf %137, %136 : vector<2x16xf32>
    %139 = arith.divf %137, %138 : vector<2x16xf32>
    %140 = vector.extract_strided_slice %79 {offsets = [2, 0], sizes = [2, 16], strides = [1, 1]} : vector<16x16xf32> to vector<2x16xf32>
    %141 = arith.addf %140, %129 : vector<2x16xf32>
    %142 = arith.negf %141 : vector<2x16xf32>
    %143 = math.exp %142 : vector<2x16xf32>
    %cst_111 = arith.constant 1.000000e+00 : f32
    %144 = vector.broadcast %cst_111 : f32 to vector<2x16xf32>
    %145 = arith.addf %144, %143 : vector<2x16xf32>
    %146 = arith.divf %144, %145 : vector<2x16xf32>
    %147 = vector.extract_strided_slice %86 {offsets = [2, 0], sizes = [2, 16], strides = [1, 1]} : vector<16x16xf32> to vector<2x16xf32>
    %148 = arith.mulf %139, %132 : vector<2x16xf32>
    %149 = arith.addf %147, %148 : vector<2x16xf32>
    %150 = math.tanh %149 : vector<2x16xf32>
    %cst_112 = arith.constant 1.000000e+00 : f32
    %151 = vector.broadcast %cst_112 : f32 to vector<2x16xf32>
    %152 = arith.subf %151, %146 : vector<2x16xf32>
    %153 = arith.mulf %152, %150 : vector<2x16xf32>
    %154 = arith.mulf %146, %122 : vector<2x16xf32>
    %155 = arith.addf %153, %154 : vector<2x16xf32>
    %c2_113 = arith.constant 2 : index
    %c0_114 = arith.constant 0 : index
    %156 = vector.load %arg10[%c2_113, %c0_114] : memref<16x16xf32, #tpu.memory_space<vmem>>, vector<2x16xf32>
    tpu.vector_store %arg10[%c2_113, %c0_114], %155 {strides = array<i32>} : memref<16x16xf32, #tpu.memory_space<vmem>>, vector<2x16xf32>,
    %cst_115 = arith.constant dense<0.000000e+00> : vector<2x16xf32>
    %157 = tpu.matmul %155, %88, %cst_115 {dimension_numbers = #tpu.dot_dimension_numbers<[1], [0], [0], [1], [0, 0, 1, 1], [], []>} : vector<2x16xf32>, vector<16x16xf32>, vector<2x16xf32> -> vector<2x16xf32>
    %158 = vector.broadcast %94 : vector<1x16xf32> to vector<2x16xf32>
    %159 = arith.addf %157, %158 : vector<2x16xf32>
    %cst_116 = arith.constant dense<0.000000e+00> : vector<2x16xf32>
    %160 = tpu.matmul %155, %90, %cst_116 {dimension_numbers = #tpu.dot_dimension_numbers<[1], [0], [0], [1], [0, 0, 1, 1], [], []>} : vector<2x16xf32>, vector<16x16xf32>, vector<2x16xf32> -> vector<2x16xf32>
    %161 = vector.broadcast %96 : vector<1x16xf32> to vector<2x16xf32>
    %162 = arith.addf %160, %161 : vector<2x16xf32>
    %cst_117 = arith.constant dense<0.000000e+00> : vector<2x16xf32>
    %163 = tpu.matmul %155, %92, %cst_117 {dimension_numbers = #tpu.dot_dimension_numbers<[1], [0], [0], [1], [0, 0, 1, 1], [], []>} : vector<2x16xf32>, vector<16x16xf32>, vector<2x16xf32> -> vector<2x16xf32>
    %164 = vector.broadcast %98 : vector<1x16xf32> to vector<2x16xf32>
    %165 = arith.addf %163, %164 : vector<2x16xf32>
    %166 = vector.extract_strided_slice %72 {offsets = [4, 0], sizes = [2, 16], strides = [1, 1]} : vector<16x16xf32> to vector<2x16xf32>
    %167 = arith.addf %166, %159 : vector<2x16xf32>
    %168 = arith.negf %167 : vector<2x16xf32>
    %169 = math.exp %168 : vector<2x16xf32>
    %cst_118 = arith.constant 1.000000e+00 : f32
    %170 = vector.broadcast %cst_118 : f32 to vector<2x16xf32>
    %171 = arith.addf %170, %169 : vector<2x16xf32>
    %172 = arith.divf %170, %171 : vector<2x16xf32>
    %173 = vector.extract_strided_slice %79 {offsets = [4, 0], sizes = [2, 16], strides = [1, 1]} : vector<16x16xf32> to vector<2x16xf32>
    %174 = arith.addf %173, %162 : vector<2x16xf32>
    %175 = arith.negf %174 : vector<2x16xf32>
    %176 = math.exp %175 : vector<2x16xf32>
    %cst_119 = arith.constant 1.000000e+00 : f32
    %177 = vector.broadcast %cst_119 : f32 to vector<2x16xf32>
    %178 = arith.addf %177, %176 : vector<2x16xf32>
    %179 = arith.divf %177, %178 : vector<2x16xf32>
    %180 = vector.extract_strided_slice %86 {offsets = [4, 0], sizes = [2, 16], strides = [1, 1]} : vector<16x16xf32> to vector<2x16xf32>
    %181 = arith.mulf %172, %165 : vector<2x16xf32>
    %182 = arith.addf %180, %181 : vector<2x16xf32>
    %183 = math.tanh %182 : vector<2x16xf32>
    %cst_120 = arith.constant 1.000000e+00 : f32
    %184 = vector.broadcast %cst_120 : f32 to vector<2x16xf32>
    %185 = arith.subf %184, %179 : vector<2x16xf32>
    %186 = arith.mulf %185, %183 : vector<2x16xf32>
    %187 = arith.mulf %179, %155 : vector<2x16xf32>
    %188 = arith.addf %186, %187 : vector<2x16xf32>
    %c4_121 = arith.constant 4 : index
    %c0_122 = arith.constant 0 : index
    %189 = vector.load %arg10[%c4_121, %c0_122] : memref<16x16xf32, #tpu.memory_space<vmem>>, vector<2x16xf32>
    tpu.vector_store %arg10[%c4_121, %c0_122], %188 {strides = array<i32>} : memref<16x16xf32, #tpu.memory_space<vmem>>, vector<2x16xf32>,
    %cst_123 = arith.constant dense<0.000000e+00> : vector<2x16xf32>
    %190 = tpu.matmul %188, %88, %cst_123 {dimension_numbers = #tpu.dot_dimension_numbers<[1], [0], [0], [1], [0, 0, 1, 1], [], []>} : vector<2x16xf32>, vector<16x16xf32>, vector<2x16xf32> -> vector<2x16xf32>
    %191 = vector.broadcast %94 : vector<1x16xf32> to vector<2x16xf32>
    %192 = arith.addf %190, %191 : vector<2x16xf32>
    %cst_124 = arith.constant dense<0.000000e+00> : vector<2x16xf32>
    %193 = tpu.matmul %188, %90, %cst_124 {dimension_numbers = #tpu.dot_dimension_numbers<[1], [0], [0], [1], [0, 0, 1, 1], [], []>} : vector<2x16xf32>, vector<16x16xf32>, vector<2x16xf32> -> vector<2x16xf32>
    %194 = vector.broadcast %96 : vector<1x16xf32> to vector<2x16xf32>
    %195 = arith.addf %193, %194 : vector<2x16xf32>
    %cst_125 = arith.constant dense<0.000000e+00> : vector<2x16xf32>
    %196 = tpu.matmul %188, %92, %cst_125 {dimension_numbers = #tpu.dot_dimension_numbers<[1], [0], [0], [1], [0, 0, 1, 1], [], []>} : vector<2x16xf32>, vector<16x16xf32>, vector<2x16xf32> -> vector<2x16xf32>
    %197 = vector.broadcast %98 : vector<1x16xf32> to vector<2x16xf32>
    %198 = arith.addf %196, %197 : vector<2x16xf32>
    %199 = vector.extract_strided_slice %72 {offsets = [6, 0], sizes = [2, 16], strides = [1, 1]} : vector<16x16xf32> to vector<2x16xf32>
    %200 = arith.addf %199, %192 : vector<2x16xf32>
    %201 = arith.negf %200 : vector<2x16xf32>
    %202 = math.exp %201 : vector<2x16xf32>
    %cst_126 = arith.constant 1.000000e+00 : f32
    %203 = vector.broadcast %cst_126 : f32 to vector<2x16xf32>
    %204 = arith.addf %203, %202 : vector<2x16xf32>
    %205 = arith.divf %203, %204 : vector<2x16xf32>
    %206 = vector.extract_strided_slice %79 {offsets = [6, 0], sizes = [2, 16], strides = [1, 1]} : vector<16x16xf32> to vector<2x16xf32>
    %207 = arith.addf %206, %195 : vector<2x16xf32>
    %208 = arith.negf %207 : vector<2x16xf32>
    %209 = math.exp %208 : vector<2x16xf32>
    %cst_127 = arith.constant 1.000000e+00 : f32
    %210 = vector.broadcast %cst_127 : f32 to vector<2x16xf32>
    %211 = arith.addf %210, %209 : vector<2x16xf32>
    %212 = arith.divf %210, %211 : vector<2x16xf32>
    %213 = vector.extract_strided_slice %86 {offsets = [6, 0], sizes = [2, 16], strides = [1, 1]} : vector<16x16xf32> to vector<2x16xf32>
    %214 = arith.mulf %205, %198 : vector<2x16xf32>
    %215 = arith.addf %213, %214 : vector<2x16xf32>
    %216 = math.tanh %215 : vector<2x16xf32>
    %cst_128 = arith.constant 1.000000e+00 : f32
    %217 = vector.broadcast %cst_128 : f32 to vector<2x16xf32>
    %218 = arith.subf %217, %212 : vector<2x16xf32>
    %219 = arith.mulf %218, %216 : vector<2x16xf32>
    %220 = arith.mulf %212, %188 : vector<2x16xf32>
    %221 = arith.addf %219, %220 : vector<2x16xf32>
    %c6_129 = arith.constant 6 : index
    %c0_130 = arith.constant 0 : index
    %222 = vector.load %arg10[%c6_129, %c0_130] : memref<16x16xf32, #tpu.memory_space<vmem>>, vector<2x16xf32>
    tpu.vector_store %arg10[%c6_129, %c0_130], %221 {strides = array<i32>} : memref<16x16xf32, #tpu.memory_space<vmem>>, vector<2x16xf32>,
    %cst_131 = arith.constant dense<0.000000e+00> : vector<2x16xf32>
    %223 = tpu.matmul %221, %88, %cst_131 {dimension_numbers = #tpu.dot_dimension_numbers<[1], [0], [0], [1], [0, 0, 1, 1], [], []>} : vector<2x16xf32>, vector<16x16xf32>, vector<2x16xf32> -> vector<2x16xf32>
    %224 = vector.broadcast %94 : vector<1x16xf32> to vector<2x16xf32>
    %225 = arith.addf %223, %224 : vector<2x16xf32>
    %cst_132 = arith.constant dense<0.000000e+00> : vector<2x16xf32>
    %226 = tpu.matmul %221, %90, %cst_132 {dimension_numbers = #tpu.dot_dimension_numbers<[1], [0], [0], [1], [0, 0, 1, 1], [], []>} : vector<2x16xf32>, vector<16x16xf32>, vector<2x16xf32> -> vector<2x16xf32>
    %227 = vector.broadcast %96 : vector<1x16xf32> to vector<2x16xf32>
    %228 = arith.addf %226, %227 : vector<2x16xf32>
    %cst_133 = arith.constant dense<0.000000e+00> : vector<2x16xf32>
    %229 = tpu.matmul %221, %92, %cst_133 {dimension_numbers = #tpu.dot_dimension_numbers<[1], [0], [0], [1], [0, 0, 1, 1], [], []>} : vector<2x16xf32>, vector<16x16xf32>, vector<2x16xf32> -> vector<2x16xf32>
    %230 = vector.broadcast %98 : vector<1x16xf32> to vector<2x16xf32>
    %231 = arith.addf %229, %230 : vector<2x16xf32>
    %232 = vector.extract_strided_slice %72 {offsets = [8, 0], sizes = [2, 16], strides = [1, 1]} : vector<16x16xf32> to vector<2x16xf32>
    %233 = arith.addf %232, %225 : vector<2x16xf32>
    %234 = arith.negf %233 : vector<2x16xf32>
    %235 = math.exp %234 : vector<2x16xf32>
    %cst_134 = arith.constant 1.000000e+00 : f32
    %236 = vector.broadcast %cst_134 : f32 to vector<2x16xf32>
    %237 = arith.addf %236, %235 : vector<2x16xf32>
    %238 = arith.divf %236, %237 : vector<2x16xf32>
    %239 = vector.extract_strided_slice %79 {offsets = [8, 0], sizes = [2, 16], strides = [1, 1]} : vector<16x16xf32> to vector<2x16xf32>
    %240 = arith.addf %239, %228 : vector<2x16xf32>
    %241 = arith.negf %240 : vector<2x16xf32>
    %242 = math.exp %241 : vector<2x16xf32>
    %cst_135 = arith.constant 1.000000e+00 : f32
    %243 = vector.broadcast %cst_135 : f32 to vector<2x16xf32>
    %244 = arith.addf %243, %242 : vector<2x16xf32>
    %245 = arith.divf %243, %244 : vector<2x16xf32>
    %246 = vector.extract_strided_slice %86 {offsets = [8, 0], sizes = [2, 16], strides = [1, 1]} : vector<16x16xf32> to vector<2x16xf32>
    %247 = arith.mulf %238, %231 : vector<2x16xf32>
    %248 = arith.addf %246, %247 : vector<2x16xf32>
    %249 = math.tanh %248 : vector<2x16xf32>
    %cst_136 = arith.constant 1.000000e+00 : f32
    %250 = vector.broadcast %cst_136 : f32 to vector<2x16xf32>
    %251 = arith.subf %250, %245 : vector<2x16xf32>
    %252 = arith.mulf %251, %249 : vector<2x16xf32>
    %253 = arith.mulf %245, %221 : vector<2x16xf32>
    %254 = arith.addf %252, %253 : vector<2x16xf32>
    %c8_137 = arith.constant 8 : index
    %c0_138 = arith.constant 0 : index
    %255 = vector.load %arg10[%c8_137, %c0_138] : memref<16x16xf32, #tpu.memory_space<vmem>>, vector<2x16xf32>
    tpu.vector_store %arg10[%c8_137, %c0_138], %254 {strides = array<i32>} : memref<16x16xf32, #tpu.memory_space<vmem>>, vector<2x16xf32>,
    %cst_139 = arith.constant dense<0.000000e+00> : vector<2x16xf32>
    %256 = tpu.matmul %254, %88, %cst_139 {dimension_numbers = #tpu.dot_dimension_numbers<[1], [0], [0], [1], [0, 0, 1, 1], [], []>} : vector<2x16xf32>, vector<16x16xf32>, vector<2x16xf32> -> vector<2x16xf32>
    %257 = vector.broadcast %94 : vector<1x16xf32> to vector<2x16xf32>
    %258 = arith.addf %256, %257 : vector<2x16xf32>
    %cst_140 = arith.constant dense<0.000000e+00> : vector<2x16xf32>
    %259 = tpu.matmul %254, %90, %cst_140 {dimension_numbers = #tpu.dot_dimension_numbers<[1], [0], [0], [1], [0, 0, 1, 1], [], []>} : vector<2x16xf32>, vector<16x16xf32>, vector<2x16xf32> -> vector<2x16xf32>
    %260 = vector.broadcast %96 : vector<1x16xf32> to vector<2x16xf32>
    %261 = arith.addf %259, %260 : vector<2x16xf32>
    %cst_141 = arith.constant dense<0.000000e+00> : vector<2x16xf32>
    %262 = tpu.matmul %254, %92, %cst_141 {dimension_numbers = #tpu.dot_dimension_numbers<[1], [0], [0], [1], [0, 0, 1, 1], [], []>} : vector<2x16xf32>, vector<16x16xf32>, vector<2x16xf32> -> vector<2x16xf32>
    %263 = vector.broadcast %98 : vector<1x16xf32> to vector<2x16xf32>
    %264 = arith.addf %262, %263 : vector<2x16xf32>
    %265 = vector.extract_strided_slice %72 {offsets = [10, 0], sizes = [2, 16], strides = [1, 1]} : vector<16x16xf32> to vector<2x16xf32>
    %266 = arith.addf %265, %258 : vector<2x16xf32>
    %267 = arith.negf %266 : vector<2x16xf32>
    %268 = math.exp %267 : vector<2x16xf32>
    %cst_142 = arith.constant 1.000000e+00 : f32
    %269 = vector.broadcast %cst_142 : f32 to vector<2x16xf32>
    %270 = arith.addf %269, %268 : vector<2x16xf32>
    %271 = arith.divf %269, %270 : vector<2x16xf32>
    %272 = vector.extract_strided_slice %79 {offsets = [10, 0], sizes = [2, 16], strides = [1, 1]} : vector<16x16xf32> to vector<2x16xf32>
    %273 = arith.addf %272, %261 : vector<2x16xf32>
    %274 = arith.negf %273 : vector<2x16xf32>
    %275 = math.exp %274 : vector<2x16xf32>
    %cst_143 = arith.constant 1.000000e+00 : f32
    %276 = vector.broadcast %cst_143 : f32 to vector<2x16xf32>
    %277 = arith.addf %276, %275 : vector<2x16xf32>
    %278 = arith.divf %276, %277 : vector<2x16xf32>
    %279 = vector.extract_strided_slice %86 {offsets = [10, 0], sizes = [2, 16], strides = [1, 1]} : vector<16x16xf32> to vector<2x16xf32>
    %280 = arith.mulf %271, %264 : vector<2x16xf32>
    %281 = arith.addf %279, %280 : vector<2x16xf32>
    %282 = math.tanh %281 : vector<2x16xf32>
    %cst_144 = arith.constant 1.000000e+00 : f32
    %283 = vector.broadcast %cst_144 : f32 to vector<2x16xf32>
    %284 = arith.subf %283, %278 : vector<2x16xf32>
    %285 = arith.mulf %284, %282 : vector<2x16xf32>
    %286 = arith.mulf %278, %254 : vector<2x16xf32>
    %287 = arith.addf %285, %286 : vector<2x16xf32>
    %c10_145 = arith.constant 10 : index
    %c0_146 = arith.constant 0 : index
    %288 = vector.load %arg10[%c10_145, %c0_146] : memref<16x16xf32, #tpu.memory_space<vmem>>, vector<2x16xf32>
    tpu.vector_store %arg10[%c10_145, %c0_146], %287 {strides = array<i32>} : memref<16x16xf32, #tpu.memory_space<vmem>>, vector<2x16xf32>,
    %cst_147 = arith.constant dense<0.000000e+00> : vector<2x16xf32>
    %289 = tpu.matmul %287, %88, %cst_147 {dimension_numbers = #tpu.dot_dimension_numbers<[1], [0], [0], [1], [0, 0, 1, 1], [], []>} : vector<2x16xf32>, vector<16x16xf32>, vector<2x16xf32> -> vector<2x16xf32>
    %290 = vector.broadcast %94 : vector<1x16xf32> to vector<2x16xf32>
    %291 = arith.addf %289, %290 : vector<2x16xf32>
    %cst_148 = arith.constant dense<0.000000e+00> : vector<2x16xf32>
    %292 = tpu.matmul %287, %90, %cst_148 {dimension_numbers = #tpu.dot_dimension_numbers<[1], [0], [0], [1], [0, 0, 1, 1], [], []>} : vector<2x16xf32>, vector<16x16xf32>, vector<2x16xf32> -> vector<2x16xf32>
    %293 = vector.broadcast %96 : vector<1x16xf32> to vector<2x16xf32>
    %294 = arith.addf %292, %293 : vector<2x16xf32>
    %cst_149 = arith.constant dense<0.000000e+00> : vector<2x16xf32>
    %295 = tpu.matmul %287, %92, %cst_149 {dimension_numbers = #tpu.dot_dimension_numbers<[1], [0], [0], [1], [0, 0, 1, 1], [], []>} : vector<2x16xf32>, vector<16x16xf32>, vector<2x16xf32> -> vector<2x16xf32>
    %296 = vector.broadcast %98 : vector<1x16xf32> to vector<2x16xf32>
    %297 = arith.addf %295, %296 : vector<2x16xf32>
    %298 = vector.extract_strided_slice %72 {offsets = [12, 0], sizes = [2, 16], strides = [1, 1]} : vector<16x16xf32> to vector<2x16xf32>
    %299 = arith.addf %298, %291 : vector<2x16xf32>
    %300 = arith.negf %299 : vector<2x16xf32>
    %301 = math.exp %300 : vector<2x16xf32>
    %cst_150 = arith.constant 1.000000e+00 : f32
    %302 = vector.broadcast %cst_150 : f32 to vector<2x16xf32>
    %303 = arith.addf %302, %301 : vector<2x16xf32>
    %304 = arith.divf %302, %303 : vector<2x16xf32>
    %305 = vector.extract_strided_slice %79 {offsets = [12, 0], sizes = [2, 16], strides = [1, 1]} : vector<16x16xf32> to vector<2x16xf32>
    %306 = arith.addf %305, %294 : vector<2x16xf32>
    %307 = arith.negf %306 : vector<2x16xf32>
    %308 = math.exp %307 : vector<2x16xf32>
    %cst_151 = arith.constant 1.000000e+00 : f32
    %309 = vector.broadcast %cst_151 : f32 to vector<2x16xf32>
    %310 = arith.addf %309, %308 : vector<2x16xf32>
    %311 = arith.divf %309, %310 : vector<2x16xf32>
    %312 = vector.extract_strided_slice %86 {offsets = [12, 0], sizes = [2, 16], strides = [1, 1]} : vector<16x16xf32> to vector<2x16xf32>
    %313 = arith.mulf %304, %297 : vector<2x16xf32>
    %314 = arith.addf %312, %313 : vector<2x16xf32>
    %315 = math.tanh %314 : vector<2x16xf32>
    %cst_152 = arith.constant 1.000000e+00 : f32
    %316 = vector.broadcast %cst_152 : f32 to vector<2x16xf32>
    %317 = arith.subf %316, %311 : vector<2x16xf32>
    %318 = arith.mulf %317, %315 : vector<2x16xf32>
    %319 = arith.mulf %311, %287 : vector<2x16xf32>
    %320 = arith.addf %318, %319 : vector<2x16xf32>
    %c12_153 = arith.constant 12 : index
    %c0_154 = arith.constant 0 : index
    %321 = vector.load %arg10[%c12_153, %c0_154] : memref<16x16xf32, #tpu.memory_space<vmem>>, vector<2x16xf32>
    tpu.vector_store %arg10[%c12_153, %c0_154], %320 {strides = array<i32>} : memref<16x16xf32, #tpu.memory_space<vmem>>, vector<2x16xf32>,
    %cst_155 = arith.constant dense<0.000000e+00> : vector<2x16xf32>
    %322 = tpu.matmul %320, %88, %cst_155 {dimension_numbers = #tpu.dot_dimension_numbers<[1], [0], [0], [1], [0, 0, 1, 1], [], []>} : vector<2x16xf32>, vector<16x16xf32>, vector<2x16xf32> -> vector<2x16xf32>
    %323 = vector.broadcast %94 : vector<1x16xf32> to vector<2x16xf32>
    %324 = arith.addf %322, %323 : vector<2x16xf32>
    %cst_156 = arith.constant dense<0.000000e+00> : vector<2x16xf32>
    %325 = tpu.matmul %320, %90, %cst_156 {dimension_numbers = #tpu.dot_dimension_numbers<[1], [0], [0], [1], [0, 0, 1, 1], [], []>} : vector<2x16xf32>, vector<16x16xf32>, vector<2x16xf32> -> vector<2x16xf32>
    %326 = vector.broadcast %96 : vector<1x16xf32> to vector<2x16xf32>
    %327 = arith.addf %325, %326 : vector<2x16xf32>
    %cst_157 = arith.constant dense<0.000000e+00> : vector<2x16xf32>
    %328 = tpu.matmul %320, %92, %cst_157 {dimension_numbers = #tpu.dot_dimension_numbers<[1], [0], [0], [1], [0, 0, 1, 1], [], []>} : vector<2x16xf32>, vector<16x16xf32>, vector<2x16xf32> -> vector<2x16xf32>
    %329 = vector.broadcast %98 : vector<1x16xf32> to vector<2x16xf32>
    %330 = arith.addf %328, %329 : vector<2x16xf32>
    %331 = vector.extract_strided_slice %72 {offsets = [14, 0], sizes = [2, 16], strides = [1, 1]} : vector<16x16xf32> to vector<2x16xf32>
    %332 = arith.addf %331, %324 : vector<2x16xf32>
    %333 = arith.negf %332 : vector<2x16xf32>
    %334 = math.exp %333 : vector<2x16xf32>
    %cst_158 = arith.constant 1.000000e+00 : f32
    %335 = vector.broadcast %cst_158 : f32 to vector<2x16xf32>
    %336 = arith.addf %335, %334 : vector<2x16xf32>
    %337 = arith.divf %335, %336 : vector<2x16xf32>
    %338 = vector.extract_strided_slice %79 {offsets = [14, 0], sizes = [2, 16], strides = [1, 1]} : vector<16x16xf32> to vector<2x16xf32>
    %339 = arith.addf %338, %327 : vector<2x16xf32>
    %340 = arith.negf %339 : vector<2x16xf32>
    %341 = math.exp %340 : vector<2x16xf32>
    %cst_159 = arith.constant 1.000000e+00 : f32
    %342 = vector.broadcast %cst_159 : f32 to vector<2x16xf32>
    %343 = arith.addf %342, %341 : vector<2x16xf32>
    %344 = arith.divf %342, %343 : vector<2x16xf32>
    %345 = vector.extract_strided_slice %86 {offsets = [14, 0], sizes = [2, 16], strides = [1, 1]} : vector<16x16xf32> to vector<2x16xf32>
    %346 = arith.mulf %337, %330 : vector<2x16xf32>
    %347 = arith.addf %345, %346 : vector<2x16xf32>
    %348 = math.tanh %347 : vector<2x16xf32>
    %cst_160 = arith.constant 1.000000e+00 : f32
    %349 = vector.broadcast %cst_160 : f32 to vector<2x16xf32>
    %350 = arith.subf %349, %344 : vector<2x16xf32>
    %351 = arith.mulf %350, %348 : vector<2x16xf32>
    %352 = arith.mulf %344, %320 : vector<2x16xf32>
    %353 = arith.addf %351, %352 : vector<2x16xf32>
    %c14_161 = arith.constant 14 : index
    %c0_162 = arith.constant 0 : index
    %354 = vector.load %arg10[%c14_161, %c0_162] : memref<16x16xf32, #tpu.memory_space<vmem>>, vector<2x16xf32>
    tpu.vector_store %arg10[%c14_161, %c0_162], %353 {strides = array<i32>} : memref<16x16xf32, #tpu.memory_space<vmem>>, vector<2x16xf32>,
    %c0_163 = arith.constant 0 : index
    %c0_164 = arith.constant 0 : index
    %355 = vector.load %arg10[%c0_163, %c0_164] : memref<16x16xf32, #tpu.memory_space<vmem>>, vector<16x16xf32>
    %c3_165 = arith.constant 3 : index
    %c0_166 = arith.constant 0 : index
    %c0_167 = arith.constant 0 : index
    %356 = vector.load %arg3[%c3_165, %c0_166, %c0_167] : memref<12x16x16xf32, #tpu.memory_space<vmem>>, vector<1x16x16xf32>
    %357 = vector.shape_cast %356 : vector<1x16x16xf32> to vector<16x16xf32>
    %cst_168 = arith.constant dense<0.000000e+00> : vector<16x16xf32>
    %358 = tpu.matmul %355, %357, %cst_168 {dimension_numbers = #tpu.dot_dimension_numbers<[1], [0], [0], [1], [0, 0, 1, 1], [], []>} : vector<16x16xf32>, vector<16x16xf32>, vector<16x16xf32> -> vector<16x16xf32>
    %c3_169 = arith.constant 3 : index
    %c0_170 = arith.constant 0 : index
    %c0_171 = arith.constant 0 : index
    %359 = vector.load %arg5[%c3_169, %c0_170, %c0_171] : memref<12x1x16xf32, #tpu.memory_space<vmem>>, vector<1x1x16xf32>
    %360 = vector.shape_cast %359 : vector<1x1x16xf32> to vector<1x16xf32>
    %361 = vector.broadcast %360 : vector<1x16xf32> to vector<16x16xf32>
    %362 = arith.addf %358, %361 : vector<16x16xf32>
    %c4_172 = arith.constant 4 : index
    %c0_173 = arith.constant 0 : index
    %c0_174 = arith.constant 0 : index
    %363 = vector.load %arg3[%c4_172, %c0_173, %c0_174] : memref<12x16x16xf32, #tpu.memory_space<vmem>>, vector<1x16x16xf32>
    %364 = vector.shape_cast %363 : vector<1x16x16xf32> to vector<16x16xf32>
    %cst_175 = arith.constant dense<0.000000e+00> : vector<16x16xf32>
    %365 = tpu.matmul %355, %364, %cst_175 {dimension_numbers = #tpu.dot_dimension_numbers<[1], [0], [0], [1], [0, 0, 1, 1], [], []>} : vector<16x16xf32>, vector<16x16xf32>, vector<16x16xf32> -> vector<16x16xf32>
    %c4_176 = arith.constant 4 : index
    %c0_177 = arith.constant 0 : index
    %c0_178 = arith.constant 0 : index
    %366 = vector.load %arg5[%c4_176, %c0_177, %c0_178] : memref<12x1x16xf32, #tpu.memory_space<vmem>>, vector<1x1x16xf32>
    %367 = vector.shape_cast %366 : vector<1x1x16xf32> to vector<1x16xf32>
    %368 = vector.broadcast %367 : vector<1x16xf32> to vector<16x16xf32>
    %369 = arith.addf %365, %368 : vector<16x16xf32>
    %c5_179 = arith.constant 5 : index
    %c0_180 = arith.constant 0 : index
    %c0_181 = arith.constant 0 : index
    %370 = vector.load %arg3[%c5_179, %c0_180, %c0_181] : memref<12x16x16xf32, #tpu.memory_space<vmem>>, vector<1x16x16xf32>
    %371 = vector.shape_cast %370 : vector<1x16x16xf32> to vector<16x16xf32>
    %cst_182 = arith.constant dense<0.000000e+00> : vector<16x16xf32>
    %372 = tpu.matmul %355, %371, %cst_182 {dimension_numbers = #tpu.dot_dimension_numbers<[1], [0], [0], [1], [0, 0, 1, 1], [], []>} : vector<16x16xf32>, vector<16x16xf32>, vector<16x16xf32> -> vector<16x16xf32>
    %c5_183 = arith.constant 5 : index
    %c0_184 = arith.constant 0 : index
    %c0_185 = arith.constant 0 : index
    %373 = vector.load %arg5[%c5_183, %c0_184, %c0_185] : memref<12x1x16xf32, #tpu.memory_space<vmem>>, vector<1x1x16xf32>
    %374 = vector.shape_cast %373 : vector<1x1x16xf32> to vector<1x16xf32>
    %375 = vector.broadcast %374 : vector<1x16xf32> to vector<16x16xf32>
    %376 = arith.addf %372, %375 : vector<16x16xf32>
    %c3_186 = arith.constant 3 : index
    %c0_187 = arith.constant 0 : index
    %c0_188 = arith.constant 0 : index
    %377 = vector.load %arg4[%c3_186, %c0_187, %c0_188] : memref<12x16x16xf32, #tpu.memory_space<vmem>>, vector<1x16x16xf32>
    %378 = vector.shape_cast %377 : vector<1x16x16xf32> to vector<16x16xf32>
    %c4_189 = arith.constant 4 : index
    %c0_190 = arith.constant 0 : index
    %c0_191 = arith.constant 0 : index
    %379 = vector.load %arg4[%c4_189, %c0_190, %c0_191] : memref<12x16x16xf32, #tpu.memory_space<vmem>>, vector<1x16x16xf32>
    %380 = vector.shape_cast %379 : vector<1x16x16xf32> to vector<16x16xf32>
    %c5_192 = arith.constant 5 : index
    %c0_193 = arith.constant 0 : index
    %c0_194 = arith.constant 0 : index
    %381 = vector.load %arg4[%c5_192, %c0_193, %c0_194] : memref<12x16x16xf32, #tpu.memory_space<vmem>>, vector<1x16x16xf32>
    %382 = vector.shape_cast %381 : vector<1x16x16xf32> to vector<16x16xf32>
    %c3_195 = arith.constant 3 : index
    %c0_196 = arith.constant 0 : index
    %c0_197 = arith.constant 0 : index
    %383 = vector.load %arg6[%c3_195, %c0_196, %c0_197] : memref<12x1x16xf32, #tpu.memory_space<vmem>>, vector<1x1x16xf32>
    %384 = vector.shape_cast %383 : vector<1x1x16xf32> to vector<1x16xf32>
    %c4_198 = arith.constant 4 : index
    %c0_199 = arith.constant 0 : index
    %c0_200 = arith.constant 0 : index
    %385 = vector.load %arg6[%c4_198, %c0_199, %c0_200] : memref<12x1x16xf32, #tpu.memory_space<vmem>>, vector<1x1x16xf32>
    %386 = vector.shape_cast %385 : vector<1x1x16xf32> to vector<1x16xf32>
    %c5_201 = arith.constant 5 : index
    %c0_202 = arith.constant 0 : index
    %c0_203 = arith.constant 0 : index
    %387 = vector.load %arg6[%c5_201, %c0_202, %c0_203] : memref<12x1x16xf32, #tpu.memory_space<vmem>>, vector<1x1x16xf32>
    %388 = vector.shape_cast %387 : vector<1x1x16xf32> to vector<1x16xf32>
    %389 = vector.extract_strided_slice %362 {offsets = [0, 0], sizes = [2, 16], strides = [1, 1]} : vector<16x16xf32> to vector<2x16xf32>
    %390 = vector.broadcast %384 : vector<1x16xf32> to vector<2x16xf32>
    %391 = arith.addf %389, %390 : vector<2x16xf32>
    %392 = arith.negf %391 : vector<2x16xf32>
    %393 = math.exp %392 : vector<2x16xf32>
    %cst_204 = arith.constant 1.000000e+00 : f32
    %394 = vector.broadcast %cst_204 : f32 to vector<2x16xf32>
    %395 = arith.addf %394, %393 : vector<2x16xf32>
    %396 = arith.divf %394, %395 : vector<2x16xf32>
    %397 = vector.extract_strided_slice %369 {offsets = [0, 0], sizes = [2, 16], strides = [1, 1]} : vector<16x16xf32> to vector<2x16xf32>
    %398 = vector.broadcast %386 : vector<1x16xf32> to vector<2x16xf32>
    %399 = arith.addf %397, %398 : vector<2x16xf32>
    %400 = arith.negf %399 : vector<2x16xf32>
    %401 = math.exp %400 : vector<2x16xf32>
    %cst_205 = arith.constant 1.000000e+00 : f32
    %402 = vector.broadcast %cst_205 : f32 to vector<2x16xf32>
    %403 = arith.addf %402, %401 : vector<2x16xf32>
    %404 = arith.divf %402, %403 : vector<2x16xf32>
    %405 = vector.extract_strided_slice %376 {offsets = [0, 0], sizes = [2, 16], strides = [1, 1]} : vector<16x16xf32> to vector<2x16xf32>
    %406 = vector.broadcast %388 : vector<1x16xf32> to vector<2x16xf32>
    %407 = arith.mulf %396, %406 : vector<2x16xf32>
    %408 = arith.addf %405, %407 : vector<2x16xf32>
    %409 = math.tanh %408 : vector<2x16xf32>
    %cst_206 = arith.constant 1.000000e+00 : f32
    %410 = vector.broadcast %cst_206 : f32 to vector<2x16xf32>
    %411 = arith.subf %410, %404 : vector<2x16xf32>
    %412 = arith.mulf %411, %409 : vector<2x16xf32>
    %c0_207 = arith.constant 0 : index
    %c0_208 = arith.constant 0 : index
    %413 = vector.load %arg10[%c0_207, %c0_208] : memref<16x16xf32, #tpu.memory_space<vmem>>, vector<2x16xf32>
    tpu.vector_store %arg10[%c0_207, %c0_208], %412 {strides = array<i32>} : memref<16x16xf32, #tpu.memory_space<vmem>>, vector<2x16xf32>,
    %cst_209 = arith.constant dense<0.000000e+00> : vector<2x16xf32>
    %414 = tpu.matmul %412, %378, %cst_209 {dimension_numbers = #tpu.dot_dimension_numbers<[1], [0], [0], [1], [0, 0, 1, 1], [], []>} : vector<2x16xf32>, vector<16x16xf32>, vector<2x16xf32> -> vector<2x16xf32>
    %415 = vector.broadcast %384 : vector<1x16xf32> to vector<2x16xf32>
    %416 = arith.addf %414, %415 : vector<2x16xf32>
    %cst_210 = arith.constant dense<0.000000e+00> : vector<2x16xf32>
    %417 = tpu.matmul %412, %380, %cst_210 {dimension_numbers = #tpu.dot_dimension_numbers<[1], [0], [0], [1], [0, 0, 1, 1], [], []>} : vector<2x16xf32>, vector<16x16xf32>, vector<2x16xf32> -> vector<2x16xf32>
    %418 = vector.broadcast %386 : vector<1x16xf32> to vector<2x16xf32>
    %419 = arith.addf %417, %418 : vector<2x16xf32>
    %cst_211 = arith.constant dense<0.000000e+00> : vector<2x16xf32>
    %420 = tpu.matmul %412, %382, %cst_211 {dimension_numbers = #tpu.dot_dimension_numbers<[1], [0], [0], [1], [0, 0, 1, 1], [], []>} : vector<2x16xf32>, vector<16x16xf32>, vector<2x16xf32> -> vector<2x16xf32>
    %421 = vector.broadcast %388 : vector<1x16xf32> to vector<2x16xf32>
    %422 = arith.addf %420, %421 : vector<2x16xf32>
    %423 = vector.extract_strided_slice %362 {offsets = [2, 0], sizes = [2, 16], strides = [1, 1]} : vector<16x16xf32> to vector<2x16xf32>
    %424 = arith.addf %423, %416 : vector<2x16xf32>
    %425 = arith.negf %424 : vector<2x16xf32>
    %426 = math.exp %425 : vector<2x16xf32>
    %cst_212 = arith.constant 1.000000e+00 : f32
    %427 = vector.broadcast %cst_212 : f32 to vector<2x16xf32>
    %428 = arith.addf %427, %426 : vector<2x16xf32>
    %429 = arith.divf %427, %428 : vector<2x16xf32>
    %430 = vector.extract_strided_slice %369 {offsets = [2, 0], sizes = [2, 16], strides = [1, 1]} : vector<16x16xf32> to vector<2x16xf32>
    %431 = arith.addf %430, %419 : vector<2x16xf32>
    %432 = arith.negf %431 : vector<2x16xf32>
    %433 = math.exp %432 : vector<2x16xf32>
    %cst_213 = arith.constant 1.000000e+00 : f32
    %434 = vector.broadcast %cst_213 : f32 to vector<2x16xf32>
    %435 = arith.addf %434, %433 : vector<2x16xf32>
    %436 = arith.divf %434, %435 : vector<2x16xf32>
    %437 = vector.extract_strided_slice %376 {offsets = [2, 0], sizes = [2, 16], strides = [1, 1]} : vector<16x16xf32> to vector<2x16xf32>
    %438 = arith.mulf %429, %422 : vector<2x16xf32>
    %439 = arith.addf %437, %438 : vector<2x16xf32>
    %440 = math.tanh %439 : vector<2x16xf32>
    %cst_214 = arith.constant 1.000000e+00 : f32
    %441 = vector.broadcast %cst_214 : f32 to vector<2x16xf32>
    %442 = arith.subf %441, %436 : vector<2x16xf32>
    %443 = arith.mulf %442, %440 : vector<2x16xf32>
    %444 = arith.mulf %436, %412 : vector<2x16xf32>
    %445 = arith.addf %443, %444 : vector<2x16xf32>
    %c2_215 = arith.constant 2 : index
    %c0_216 = arith.constant 0 : index
    %446 = vector.load %arg10[%c2_215, %c0_216] : memref<16x16xf32, #tpu.memory_space<vmem>>, vector<2x16xf32>
    tpu.vector_store %arg10[%c2_215, %c0_216], %445 {strides = array<i32>} : memref<16x16xf32, #tpu.memory_space<vmem>>, vector<2x16xf32>,
    %cst_217 = arith.constant dense<0.000000e+00> : vector<2x16xf32>
    %447 = tpu.matmul %445, %378, %cst_217 {dimension_numbers = #tpu.dot_dimension_numbers<[1], [0], [0], [1], [0, 0, 1, 1], [], []>} : vector<2x16xf32>, vector<16x16xf32>, vector<2x16xf32> -> vector<2x16xf32>
    %448 = vector.broadcast %384 : vector<1x16xf32> to vector<2x16xf32>
    %449 = arith.addf %447, %448 : vector<2x16xf32>
    %cst_218 = arith.constant dense<0.000000e+00> : vector<2x16xf32>
    %450 = tpu.matmul %445, %380, %cst_218 {dimension_numbers = #tpu.dot_dimension_numbers<[1], [0], [0], [1], [0, 0, 1, 1], [], []>} : vector<2x16xf32>, vector<16x16xf32>, vector<2x16xf32> -> vector<2x16xf32>
    %451 = vector.broadcast %386 : vector<1x16xf32> to vector<2x16xf32>
    %452 = arith.addf %450, %451 : vector<2x16xf32>
    %cst_219 = arith.constant dense<0.000000e+00> : vector<2x16xf32>
    %453 = tpu.matmul %445, %382, %cst_219 {dimension_numbers = #tpu.dot_dimension_numbers<[1], [0], [0], [1], [0, 0, 1, 1], [], []>} : vector<2x16xf32>, vector<16x16xf32>, vector<2x16xf32> -> vector<2x16xf32>
    %454 = vector.broadcast %388 : vector<1x16xf32> to vector<2x16xf32>
    %455 = arith.addf %453, %454 : vector<2x16xf32>
    %456 = vector.extract_strided_slice %362 {offsets = [4, 0], sizes = [2, 16], strides = [1, 1]} : vector<16x16xf32> to vector<2x16xf32>
    %457 = arith.addf %456, %449 : vector<2x16xf32>
    %458 = arith.negf %457 : vector<2x16xf32>
    %459 = math.exp %458 : vector<2x16xf32>
    %cst_220 = arith.constant 1.000000e+00 : f32
    %460 = vector.broadcast %cst_220 : f32 to vector<2x16xf32>
    %461 = arith.addf %460, %459 : vector<2x16xf32>
    %462 = arith.divf %460, %461 : vector<2x16xf32>
    %463 = vector.extract_strided_slice %369 {offsets = [4, 0], sizes = [2, 16], strides = [1, 1]} : vector<16x16xf32> to vector<2x16xf32>
    %464 = arith.addf %463, %452 : vector<2x16xf32>
    %465 = arith.negf %464 : vector<2x16xf32>
    %466 = math.exp %465 : vector<2x16xf32>
    %cst_221 = arith.constant 1.000000e+00 : f32
    %467 = vector.broadcast %cst_221 : f32 to vector<2x16xf32>
    %468 = arith.addf %467, %466 : vector<2x16xf32>
    %469 = arith.divf %467, %468 : vector<2x16xf32>
    %470 = vector.extract_strided_slice %376 {offsets = [4, 0], sizes = [2, 16], strides = [1, 1]} : vector<16x16xf32> to vector<2x16xf32>
    %471 = arith.mulf %462, %455 : vector<2x16xf32>
    %472 = arith.addf %470, %471 : vector<2x16xf32>
    %473 = math.tanh %472 : vector<2x16xf32>
    %cst_222 = arith.constant 1.000000e+00 : f32
    %474 = vector.broadcast %cst_222 : f32 to vector<2x16xf32>
    %475 = arith.subf %474, %469 : vector<2x16xf32>
    %476 = arith.mulf %475, %473 : vector<2x16xf32>
    %477 = arith.mulf %469, %445 : vector<2x16xf32>
    %478 = arith.addf %476, %477 : vector<2x16xf32>
    %c4_223 = arith.constant 4 : index
    %c0_224 = arith.constant 0 : index
    %479 = vector.load %arg10[%c4_223, %c0_224] : memref<16x16xf32, #tpu.memory_space<vmem>>, vector<2x16xf32>
    tpu.vector_store %arg10[%c4_223, %c0_224], %478 {strides = array<i32>} : memref<16x16xf32, #tpu.memory_space<vmem>>, vector<2x16xf32>,
    %cst_225 = arith.constant dense<0.000000e+00> : vector<2x16xf32>
    %480 = tpu.matmul %478, %378, %cst_225 {dimension_numbers = #tpu.dot_dimension_numbers<[1], [0], [0], [1], [0, 0, 1, 1], [], []>} : vector<2x16xf32>, vector<16x16xf32>, vector<2x16xf32> -> vector<2x16xf32>
    %481 = vector.broadcast %384 : vector<1x16xf32> to vector<2x16xf32>
    %482 = arith.addf %480, %481 : vector<2x16xf32>
    %cst_226 = arith.constant dense<0.000000e+00> : vector<2x16xf32>
    %483 = tpu.matmul %478, %380, %cst_226 {dimension_numbers = #tpu.dot_dimension_numbers<[1], [0], [0], [1], [0, 0, 1, 1], [], []>} : vector<2x16xf32>, vector<16x16xf32>, vector<2x16xf32> -> vector<2x16xf32>
    %484 = vector.broadcast %386 : vector<1x16xf32> to vector<2x16xf32>
    %485 = arith.addf %483, %484 : vector<2x16xf32>
    %cst_227 = arith.constant dense<0.000000e+00> : vector<2x16xf32>
    %486 = tpu.matmul %478, %382, %cst_227 {dimension_numbers = #tpu.dot_dimension_numbers<[1], [0], [0], [1], [0, 0, 1, 1], [], []>} : vector<2x16xf32>, vector<16x16xf32>, vector<2x16xf32> -> vector<2x16xf32>
    %487 = vector.broadcast %388 : vector<1x16xf32> to vector<2x16xf32>
    %488 = arith.addf %486, %487 : vector<2x16xf32>
    %489 = vector.extract_strided_slice %362 {offsets = [6, 0], sizes = [2, 16], strides = [1, 1]} : vector<16x16xf32> to vector<2x16xf32>
    %490 = arith.addf %489, %482 : vector<2x16xf32>
    %491 = arith.negf %490 : vector<2x16xf32>
    %492 = math.exp %491 : vector<2x16xf32>
    %cst_228 = arith.constant 1.000000e+00 : f32
    %493 = vector.broadcast %cst_228 : f32 to vector<2x16xf32>
    %494 = arith.addf %493, %492 : vector<2x16xf32>
    %495 = arith.divf %493, %494 : vector<2x16xf32>
    %496 = vector.extract_strided_slice %369 {offsets = [6, 0], sizes = [2, 16], strides = [1, 1]} : vector<16x16xf32> to vector<2x16xf32>
    %497 = arith.addf %496, %485 : vector<2x16xf32>
    %498 = arith.negf %497 : vector<2x16xf32>
    %499 = math.exp %498 : vector<2x16xf32>
    %cst_229 = arith.constant 1.000000e+00 : f32
    %500 = vector.broadcast %cst_229 : f32 to vector<2x16xf32>
    %501 = arith.addf %500, %499 : vector<2x16xf32>
    %502 = arith.divf %500, %501 : vector<2x16xf32>
    %503 = vector.extract_strided_slice %376 {offsets = [6, 0], sizes = [2, 16], strides = [1, 1]} : vector<16x16xf32> to vector<2x16xf32>
    %504 = arith.mulf %495, %488 : vector<2x16xf32>
    %505 = arith.addf %503, %504 : vector<2x16xf32>
    %506 = math.tanh %505 : vector<2x16xf32>
    %cst_230 = arith.constant 1.000000e+00 : f32
    %507 = vector.broadcast %cst_230 : f32 to vector<2x16xf32>
    %508 = arith.subf %507, %502 : vector<2x16xf32>
    %509 = arith.mulf %508, %506 : vector<2x16xf32>
    %510 = arith.mulf %502, %478 : vector<2x16xf32>
    %511 = arith.addf %509, %510 : vector<2x16xf32>
    %c6_231 = arith.constant 6 : index
    %c0_232 = arith.constant 0 : index
    %512 = vector.load %arg10[%c6_231, %c0_232] : memref<16x16xf32, #tpu.memory_space<vmem>>, vector<2x16xf32>
    tpu.vector_store %arg10[%c6_231, %c0_232], %511 {strides = array<i32>} : memref<16x16xf32, #tpu.memory_space<vmem>>, vector<2x16xf32>,
    %cst_233 = arith.constant dense<0.000000e+00> : vector<2x16xf32>
    %513 = tpu.matmul %511, %378, %cst_233 {dimension_numbers = #tpu.dot_dimension_numbers<[1], [0], [0], [1], [0, 0, 1, 1], [], []>} : vector<2x16xf32>, vector<16x16xf32>, vector<2x16xf32> -> vector<2x16xf32>
    %514 = vector.broadcast %384 : vector<1x16xf32> to vector<2x16xf32>
    %515 = arith.addf %513, %514 : vector<2x16xf32>
    %cst_234 = arith.constant dense<0.000000e+00> : vector<2x16xf32>
    %516 = tpu.matmul %511, %380, %cst_234 {dimension_numbers = #tpu.dot_dimension_numbers<[1], [0], [0], [1], [0, 0, 1, 1], [], []>} : vector<2x16xf32>, vector<16x16xf32>, vector<2x16xf32> -> vector<2x16xf32>
    %517 = vector.broadcast %386 : vector<1x16xf32> to vector<2x16xf32>
    %518 = arith.addf %516, %517 : vector<2x16xf32>
    %cst_235 = arith.constant dense<0.000000e+00> : vector<2x16xf32>
    %519 = tpu.matmul %511, %382, %cst_235 {dimension_numbers = #tpu.dot_dimension_numbers<[1], [0], [0], [1], [0, 0, 1, 1], [], []>} : vector<2x16xf32>, vector<16x16xf32>, vector<2x16xf32> -> vector<2x16xf32>
    %520 = vector.broadcast %388 : vector<1x16xf32> to vector<2x16xf32>
    %521 = arith.addf %519, %520 : vector<2x16xf32>
    %522 = vector.extract_strided_slice %362 {offsets = [8, 0], sizes = [2, 16], strides = [1, 1]} : vector<16x16xf32> to vector<2x16xf32>
    %523 = arith.addf %522, %515 : vector<2x16xf32>
    %524 = arith.negf %523 : vector<2x16xf32>
    %525 = math.exp %524 : vector<2x16xf32>
    %cst_236 = arith.constant 1.000000e+00 : f32
    %526 = vector.broadcast %cst_236 : f32 to vector<2x16xf32>
    %527 = arith.addf %526, %525 : vector<2x16xf32>
    %528 = arith.divf %526, %527 : vector<2x16xf32>
    %529 = vector.extract_strided_slice %369 {offsets = [8, 0], sizes = [2, 16], strides = [1, 1]} : vector<16x16xf32> to vector<2x16xf32>
    %530 = arith.addf %529, %518 : vector<2x16xf32>
    %531 = arith.negf %530 : vector<2x16xf32>
    %532 = math.exp %531 : vector<2x16xf32>
    %cst_237 = arith.constant 1.000000e+00 : f32
    %533 = vector.broadcast %cst_237 : f32 to vector<2x16xf32>
    %534 = arith.addf %533, %532 : vector<2x16xf32>
    %535 = arith.divf %533, %534 : vector<2x16xf32>
    %536 = vector.extract_strided_slice %376 {offsets = [8, 0], sizes = [2, 16], strides = [1, 1]} : vector<16x16xf32> to vector<2x16xf32>
    %537 = arith.mulf %528, %521 : vector<2x16xf32>
    %538 = arith.addf %536, %537 : vector<2x16xf32>
    %539 = math.tanh %538 : vector<2x16xf32>
    %cst_238 = arith.constant 1.000000e+00 : f32
    %540 = vector.broadcast %cst_238 : f32 to vector<2x16xf32>
    %541 = arith.subf %540, %535 : vector<2x16xf32>
    %542 = arith.mulf %541, %539 : vector<2x16xf32>
    %543 = arith.mulf %535, %511 : vector<2x16xf32>
    %544 = arith.addf %542, %543 : vector<2x16xf32>
    %c8_239 = arith.constant 8 : index
    %c0_240 = arith.constant 0 : index
    %545 = vector.load %arg10[%c8_239, %c0_240] : memref<16x16xf32, #tpu.memory_space<vmem>>, vector<2x16xf32>
    tpu.vector_store %arg10[%c8_239, %c0_240], %544 {strides = array<i32>} : memref<16x16xf32, #tpu.memory_space<vmem>>, vector<2x16xf32>,
    %cst_241 = arith.constant dense<0.000000e+00> : vector<2x16xf32>
    %546 = tpu.matmul %544, %378, %cst_241 {dimension_numbers = #tpu.dot_dimension_numbers<[1], [0], [0], [1], [0, 0, 1, 1], [], []>} : vector<2x16xf32>, vector<16x16xf32>, vector<2x16xf32> -> vector<2x16xf32>
    %547 = vector.broadcast %384 : vector<1x16xf32> to vector<2x16xf32>
    %548 = arith.addf %546, %547 : vector<2x16xf32>
    %cst_242 = arith.constant dense<0.000000e+00> : vector<2x16xf32>
    %549 = tpu.matmul %544, %380, %cst_242 {dimension_numbers = #tpu.dot_dimension_numbers<[1], [0], [0], [1], [0, 0, 1, 1], [], []>} : vector<2x16xf32>, vector<16x16xf32>, vector<2x16xf32> -> vector<2x16xf32>
    %550 = vector.broadcast %386 : vector<1x16xf32> to vector<2x16xf32>
    %551 = arith.addf %549, %550 : vector<2x16xf32>
    %cst_243 = arith.constant dense<0.000000e+00> : vector<2x16xf32>
    %552 = tpu.matmul %544, %382, %cst_243 {dimension_numbers = #tpu.dot_dimension_numbers<[1], [0], [0], [1], [0, 0, 1, 1], [], []>} : vector<2x16xf32>, vector<16x16xf32>, vector<2x16xf32> -> vector<2x16xf32>
    %553 = vector.broadcast %388 : vector<1x16xf32> to vector<2x16xf32>
    %554 = arith.addf %552, %553 : vector<2x16xf32>
    %555 = vector.extract_strided_slice %362 {offsets = [10, 0], sizes = [2, 16], strides = [1, 1]} : vector<16x16xf32> to vector<2x16xf32>
    %556 = arith.addf %555, %548 : vector<2x16xf32>
    %557 = arith.negf %556 : vector<2x16xf32>
    %558 = math.exp %557 : vector<2x16xf32>
    %cst_244 = arith.constant 1.000000e+00 : f32
    %559 = vector.broadcast %cst_244 : f32 to vector<2x16xf32>
    %560 = arith.addf %559, %558 : vector<2x16xf32>
    %561 = arith.divf %559, %560 : vector<2x16xf32>
    %562 = vector.extract_strided_slice %369 {offsets = [10, 0], sizes = [2, 16], strides = [1, 1]} : vector<16x16xf32> to vector<2x16xf32>
    %563 = arith.addf %562, %551 : vector<2x16xf32>
    %564 = arith.negf %563 : vector<2x16xf32>
    %565 = math.exp %564 : vector<2x16xf32>
    %cst_245 = arith.constant 1.000000e+00 : f32
    %566 = vector.broadcast %cst_245 : f32 to vector<2x16xf32>
    %567 = arith.addf %566, %565 : vector<2x16xf32>
    %568 = arith.divf %566, %567 : vector<2x16xf32>
    %569 = vector.extract_strided_slice %376 {offsets = [10, 0], sizes = [2, 16], strides = [1, 1]} : vector<16x16xf32> to vector<2x16xf32>
    %570 = arith.mulf %561, %554 : vector<2x16xf32>
    %571 = arith.addf %569, %570 : vector<2x16xf32>
    %572 = math.tanh %571 : vector<2x16xf32>
    %cst_246 = arith.constant 1.000000e+00 : f32
    %573 = vector.broadcast %cst_246 : f32 to vector<2x16xf32>
    %574 = arith.subf %573, %568 : vector<2x16xf32>
    %575 = arith.mulf %574, %572 : vector<2x16xf32>
    %576 = arith.mulf %568, %544 : vector<2x16xf32>
    %577 = arith.addf %575, %576 : vector<2x16xf32>
    %c10_247 = arith.constant 10 : index
    %c0_248 = arith.constant 0 : index
    %578 = vector.load %arg10[%c10_247, %c0_248] : memref<16x16xf32, #tpu.memory_space<vmem>>, vector<2x16xf32>
    tpu.vector_store %arg10[%c10_247, %c0_248], %577 {strides = array<i32>} : memref<16x16xf32, #tpu.memory_space<vmem>>, vector<2x16xf32>,
    %cst_249 = arith.constant dense<0.000000e+00> : vector<2x16xf32>
    %579 = tpu.matmul %577, %378, %cst_249 {dimension_numbers = #tpu.dot_dimension_numbers<[1], [0], [0], [1], [0, 0, 1, 1], [], []>} : vector<2x16xf32>, vector<16x16xf32>, vector<2x16xf32> -> vector<2x16xf32>
    %580 = vector.broadcast %384 : vector<1x16xf32> to vector<2x16xf32>
    %581 = arith.addf %579, %580 : vector<2x16xf32>
    %cst_250 = arith.constant dense<0.000000e+00> : vector<2x16xf32>
    %582 = tpu.matmul %577, %380, %cst_250 {dimension_numbers = #tpu.dot_dimension_numbers<[1], [0], [0], [1], [0, 0, 1, 1], [], []>} : vector<2x16xf32>, vector<16x16xf32>, vector<2x16xf32> -> vector<2x16xf32>
    %583 = vector.broadcast %386 : vector<1x16xf32> to vector<2x16xf32>
    %584 = arith.addf %582, %583 : vector<2x16xf32>
    %cst_251 = arith.constant dense<0.000000e+00> : vector<2x16xf32>
    %585 = tpu.matmul %577, %382, %cst_251 {dimension_numbers = #tpu.dot_dimension_numbers<[1], [0], [0], [1], [0, 0, 1, 1], [], []>} : vector<2x16xf32>, vector<16x16xf32>, vector<2x16xf32> -> vector<2x16xf32>
    %586 = vector.broadcast %388 : vector<1x16xf32> to vector<2x16xf32>
    %587 = arith.addf %585, %586 : vector<2x16xf32>
    %588 = vector.extract_strided_slice %362 {offsets = [12, 0], sizes = [2, 16], strides = [1, 1]} : vector<16x16xf32> to vector<2x16xf32>
    %589 = arith.addf %588, %581 : vector<2x16xf32>
    %590 = arith.negf %589 : vector<2x16xf32>
    %591 = math.exp %590 : vector<2x16xf32>
    %cst_252 = arith.constant 1.000000e+00 : f32
    %592 = vector.broadcast %cst_252 : f32 to vector<2x16xf32>
    %593 = arith.addf %592, %591 : vector<2x16xf32>
    %594 = arith.divf %592, %593 : vector<2x16xf32>
    %595 = vector.extract_strided_slice %369 {offsets = [12, 0], sizes = [2, 16], strides = [1, 1]} : vector<16x16xf32> to vector<2x16xf32>
    %596 = arith.addf %595, %584 : vector<2x16xf32>
    %597 = arith.negf %596 : vector<2x16xf32>
    %598 = math.exp %597 : vector<2x16xf32>
    %cst_253 = arith.constant 1.000000e+00 : f32
    %599 = vector.broadcast %cst_253 : f32 to vector<2x16xf32>
    %600 = arith.addf %599, %598 : vector<2x16xf32>
    %601 = arith.divf %599, %600 : vector<2x16xf32>
    %602 = vector.extract_strided_slice %376 {offsets = [12, 0], sizes = [2, 16], strides = [1, 1]} : vector<16x16xf32> to vector<2x16xf32>
    %603 = arith.mulf %594, %587 : vector<2x16xf32>
    %604 = arith.addf %602, %603 : vector<2x16xf32>
    %605 = math.tanh %604 : vector<2x16xf32>
    %cst_254 = arith.constant 1.000000e+00 : f32
    %606 = vector.broadcast %cst_254 : f32 to vector<2x16xf32>
    %607 = arith.subf %606, %601 : vector<2x16xf32>
    %608 = arith.mulf %607, %605 : vector<2x16xf32>
    %609 = arith.mulf %601, %577 : vector<2x16xf32>
    %610 = arith.addf %608, %609 : vector<2x16xf32>
    %c12_255 = arith.constant 12 : index
    %c0_256 = arith.constant 0 : index
    %611 = vector.load %arg10[%c12_255, %c0_256] : memref<16x16xf32, #tpu.memory_space<vmem>>, vector<2x16xf32>
    tpu.vector_store %arg10[%c12_255, %c0_256], %610 {strides = array<i32>} : memref<16x16xf32, #tpu.memory_space<vmem>>, vector<2x16xf32>,
    %cst_257 = arith.constant dense<0.000000e+00> : vector<2x16xf32>
    %612 = tpu.matmul %610, %378, %cst_257 {dimension_numbers = #tpu.dot_dimension_numbers<[1], [0], [0], [1], [0, 0, 1, 1], [], []>} : vector<2x16xf32>, vector<16x16xf32>, vector<2x16xf32> -> vector<2x16xf32>
    %613 = vector.broadcast %384 : vector<1x16xf32> to vector<2x16xf32>
    %614 = arith.addf %612, %613 : vector<2x16xf32>
    %cst_258 = arith.constant dense<0.000000e+00> : vector<2x16xf32>
    %615 = tpu.matmul %610, %380, %cst_258 {dimension_numbers = #tpu.dot_dimension_numbers<[1], [0], [0], [1], [0, 0, 1, 1], [], []>} : vector<2x16xf32>, vector<16x16xf32>, vector<2x16xf32> -> vector<2x16xf32>
    %616 = vector.broadcast %386 : vector<1x16xf32> to vector<2x16xf32>
    %617 = arith.addf %615, %616 : vector<2x16xf32>
    %cst_259 = arith.constant dense<0.000000e+00> : vector<2x16xf32>
    %618 = tpu.matmul %610, %382, %cst_259 {dimension_numbers = #tpu.dot_dimension_numbers<[1], [0], [0], [1], [0, 0, 1, 1], [], []>} : vector<2x16xf32>, vector<16x16xf32>, vector<2x16xf32> -> vector<2x16xf32>
    %619 = vector.broadcast %388 : vector<1x16xf32> to vector<2x16xf32>
    %620 = arith.addf %618, %619 : vector<2x16xf32>
    %621 = vector.extract_strided_slice %362 {offsets = [14, 0], sizes = [2, 16], strides = [1, 1]} : vector<16x16xf32> to vector<2x16xf32>
    %622 = arith.addf %621, %614 : vector<2x16xf32>
    %623 = arith.negf %622 : vector<2x16xf32>
    %624 = math.exp %623 : vector<2x16xf32>
    %cst_260 = arith.constant 1.000000e+00 : f32
    %625 = vector.broadcast %cst_260 : f32 to vector<2x16xf32>
    %626 = arith.addf %625, %624 : vector<2x16xf32>
    %627 = arith.divf %625, %626 : vector<2x16xf32>
    %628 = vector.extract_strided_slice %369 {offsets = [14, 0], sizes = [2, 16], strides = [1, 1]} : vector<16x16xf32> to vector<2x16xf32>
    %629 = arith.addf %628, %617 : vector<2x16xf32>
    %630 = arith.negf %629 : vector<2x16xf32>
    %631 = math.exp %630 : vector<2x16xf32>
    %cst_261 = arith.constant 1.000000e+00 : f32
    %632 = vector.broadcast %cst_261 : f32 to vector<2x16xf32>
    %633 = arith.addf %632, %631 : vector<2x16xf32>
    %634 = arith.divf %632, %633 : vector<2x16xf32>
    %635 = vector.extract_strided_slice %376 {offsets = [14, 0], sizes = [2, 16], strides = [1, 1]} : vector<16x16xf32> to vector<2x16xf32>
    %636 = arith.mulf %627, %620 : vector<2x16xf32>
    %637 = arith.addf %635, %636 : vector<2x16xf32>
    %638 = math.tanh %637 : vector<2x16xf32>
    %cst_262 = arith.constant 1.000000e+00 : f32
    %639 = vector.broadcast %cst_262 : f32 to vector<2x16xf32>
    %640 = arith.subf %639, %634 : vector<2x16xf32>
    %641 = arith.mulf %640, %638 : vector<2x16xf32>
    %642 = arith.mulf %634, %610 : vector<2x16xf32>
    %643 = arith.addf %641, %642 : vector<2x16xf32>
    %c14_263 = arith.constant 14 : index
    %c0_264 = arith.constant 0 : index
    %644 = vector.load %arg10[%c14_263, %c0_264] : memref<16x16xf32, #tpu.memory_space<vmem>>, vector<2x16xf32>
    tpu.vector_store %arg10[%c14_263, %c0_264], %643 {strides = array<i32>} : memref<16x16xf32, #tpu.memory_space<vmem>>, vector<2x16xf32>,
    %c0_265 = arith.constant 0 : index
    %c0_266 = arith.constant 0 : index
    %645 = vector.load %arg10[%c0_265, %c0_266] : memref<16x16xf32, #tpu.memory_space<vmem>>, vector<16x16xf32>
    %c6_267 = arith.constant 6 : index
    %c0_268 = arith.constant 0 : index
    %c0_269 = arith.constant 0 : index
    %646 = vector.load %arg3[%c6_267, %c0_268, %c0_269] : memref<12x16x16xf32, #tpu.memory_space<vmem>>, vector<1x16x16xf32>
    %647 = vector.shape_cast %646 : vector<1x16x16xf32> to vector<16x16xf32>
    %cst_270 = arith.constant dense<0.000000e+00> : vector<16x16xf32>
    %648 = tpu.matmul %645, %647, %cst_270 {dimension_numbers = #tpu.dot_dimension_numbers<[1], [0], [0], [1], [0, 0, 1, 1], [], []>} : vector<16x16xf32>, vector<16x16xf32>, vector<16x16xf32> -> vector<16x16xf32>
    %c6_271 = arith.constant 6 : index
    %c0_272 = arith.constant 0 : index
    %c0_273 = arith.constant 0 : index
    %649 = vector.load %arg5[%c6_271, %c0_272, %c0_273] : memref<12x1x16xf32, #tpu.memory_space<vmem>>, vector<1x1x16xf32>
    %650 = vector.shape_cast %649 : vector<1x1x16xf32> to vector<1x16xf32>
    %651 = vector.broadcast %650 : vector<1x16xf32> to vector<16x16xf32>
    %652 = arith.addf %648, %651 : vector<16x16xf32>
    %c7_274 = arith.constant 7 : index
    %c0_275 = arith.constant 0 : index
    %c0_276 = arith.constant 0 : index
    %653 = vector.load %arg3[%c7_274, %c0_275, %c0_276] : memref<12x16x16xf32, #tpu.memory_space<vmem>>, vector<1x16x16xf32>
    %654 = vector.shape_cast %653 : vector<1x16x16xf32> to vector<16x16xf32>
    %cst_277 = arith.constant dense<0.000000e+00> : vector<16x16xf32>
    %655 = tpu.matmul %645, %654, %cst_277 {dimension_numbers = #tpu.dot_dimension_numbers<[1], [0], [0], [1], [0, 0, 1, 1], [], []>} : vector<16x16xf32>, vector<16x16xf32>, vector<16x16xf32> -> vector<16x16xf32>
    %c7_278 = arith.constant 7 : index
    %c0_279 = arith.constant 0 : index
    %c0_280 = arith.constant 0 : index
    %656 = vector.load %arg5[%c7_278, %c0_279, %c0_280] : memref<12x1x16xf32, #tpu.memory_space<vmem>>, vector<1x1x16xf32>
    %657 = vector.shape_cast %656 : vector<1x1x16xf32> to vector<1x16xf32>
    %658 = vector.broadcast %657 : vector<1x16xf32> to vector<16x16xf32>
    %659 = arith.addf %655, %658 : vector<16x16xf32>
    %c8_281 = arith.constant 8 : index
    %c0_282 = arith.constant 0 : index
    %c0_283 = arith.constant 0 : index
    %660 = vector.load %arg3[%c8_281, %c0_282, %c0_283] : memref<12x16x16xf32, #tpu.memory_space<vmem>>, vector<1x16x16xf32>
    %661 = vector.shape_cast %660 : vector<1x16x16xf32> to vector<16x16xf32>
    %cst_284 = arith.constant dense<0.000000e+00> : vector<16x16xf32>
    %662 = tpu.matmul %645, %661, %cst_284 {dimension_numbers = #tpu.dot_dimension_numbers<[1], [0], [0], [1], [0, 0, 1, 1], [], []>} : vector<16x16xf32>, vector<16x16xf32>, vector<16x16xf32> -> vector<16x16xf32>
    %c8_285 = arith.constant 8 : index
    %c0_286 = arith.constant 0 : index
    %c0_287 = arith.constant 0 : index
    %663 = vector.load %arg5[%c8_285, %c0_286, %c0_287] : memref<12x1x16xf32, #tpu.memory_space<vmem>>, vector<1x1x16xf32>
    %664 = vector.shape_cast %663 : vector<1x1x16xf32> to vector<1x16xf32>
    %665 = vector.broadcast %664 : vector<1x16xf32> to vector<16x16xf32>
    %666 = arith.addf %662, %665 : vector<16x16xf32>
    %c6_288 = arith.constant 6 : index
    %c0_289 = arith.constant 0 : index
    %c0_290 = arith.constant 0 : index
    %667 = vector.load %arg4[%c6_288, %c0_289, %c0_290] : memref<12x16x16xf32, #tpu.memory_space<vmem>>, vector<1x16x16xf32>
    %668 = vector.shape_cast %667 : vector<1x16x16xf32> to vector<16x16xf32>
    %c7_291 = arith.constant 7 : index
    %c0_292 = arith.constant 0 : index
    %c0_293 = arith.constant 0 : index
    %669 = vector.load %arg4[%c7_291, %c0_292, %c0_293] : memref<12x16x16xf32, #tpu.memory_space<vmem>>, vector<1x16x16xf32>
    %670 = vector.shape_cast %669 : vector<1x16x16xf32> to vector<16x16xf32>
    %c8_294 = arith.constant 8 : index
    %c0_295 = arith.constant 0 : index
    %c0_296 = arith.constant 0 : index
    %671 = vector.load %arg4[%c8_294, %c0_295, %c0_296] : memref<12x16x16xf32, #tpu.memory_space<vmem>>, vector<1x16x16xf32>
    %672 = vector.shape_cast %671 : vector<1x16x16xf32> to vector<16x16xf32>
    %c6_297 = arith.constant 6 : index
    %c0_298 = arith.constant 0 : index
    %c0_299 = arith.constant 0 : index
    %673 = vector.load %arg6[%c6_297, %c0_298, %c0_299] : memref<12x1x16xf32, #tpu.memory_space<vmem>>, vector<1x1x16xf32>
    %674 = vector.shape_cast %673 : vector<1x1x16xf32> to vector<1x16xf32>
    %c7_300 = arith.constant 7 : index
    %c0_301 = arith.constant 0 : index
    %c0_302 = arith.constant 0 : index
    %675 = vector.load %arg6[%c7_300, %c0_301, %c0_302] : memref<12x1x16xf32, #tpu.memory_space<vmem>>, vector<1x1x16xf32>
    %676 = vector.shape_cast %675 : vector<1x1x16xf32> to vector<1x16xf32>
    %c8_303 = arith.constant 8 : index
    %c0_304 = arith.constant 0 : index
    %c0_305 = arith.constant 0 : index
    %677 = vector.load %arg6[%c8_303, %c0_304, %c0_305] : memref<12x1x16xf32, #tpu.memory_space<vmem>>, vector<1x1x16xf32>
    %678 = vector.shape_cast %677 : vector<1x1x16xf32> to vector<1x16xf32>
    %679 = vector.extract_strided_slice %652 {offsets = [0, 0], sizes = [2, 16], strides = [1, 1]} : vector<16x16xf32> to vector<2x16xf32>
    %680 = vector.broadcast %674 : vector<1x16xf32> to vector<2x16xf32>
    %681 = arith.addf %679, %680 : vector<2x16xf32>
    %682 = arith.negf %681 : vector<2x16xf32>
    %683 = math.exp %682 : vector<2x16xf32>
    %cst_306 = arith.constant 1.000000e+00 : f32
    %684 = vector.broadcast %cst_306 : f32 to vector<2x16xf32>
    %685 = arith.addf %684, %683 : vector<2x16xf32>
    %686 = arith.divf %684, %685 : vector<2x16xf32>
    %687 = vector.extract_strided_slice %659 {offsets = [0, 0], sizes = [2, 16], strides = [1, 1]} : vector<16x16xf32> to vector<2x16xf32>
    %688 = vector.broadcast %676 : vector<1x16xf32> to vector<2x16xf32>
    %689 = arith.addf %687, %688 : vector<2x16xf32>
    %690 = arith.negf %689 : vector<2x16xf32>
    %691 = math.exp %690 : vector<2x16xf32>
    %cst_307 = arith.constant 1.000000e+00 : f32
    %692 = vector.broadcast %cst_307 : f32 to vector<2x16xf32>
    %693 = arith.addf %692, %691 : vector<2x16xf32>
    %694 = arith.divf %692, %693 : vector<2x16xf32>
    %695 = vector.extract_strided_slice %666 {offsets = [0, 0], sizes = [2, 16], strides = [1, 1]} : vector<16x16xf32> to vector<2x16xf32>
    %696 = vector.broadcast %678 : vector<1x16xf32> to vector<2x16xf32>
    %697 = arith.mulf %686, %696 : vector<2x16xf32>
    %698 = arith.addf %695, %697 : vector<2x16xf32>
    %699 = math.tanh %698 : vector<2x16xf32>
    %cst_308 = arith.constant 1.000000e+00 : f32
    %700 = vector.broadcast %cst_308 : f32 to vector<2x16xf32>
    %701 = arith.subf %700, %694 : vector<2x16xf32>
    %702 = arith.mulf %701, %699 : vector<2x16xf32>
    %c0_309 = arith.constant 0 : index
    %c0_310 = arith.constant 0 : index
    %703 = vector.load %arg10[%c0_309, %c0_310] : memref<16x16xf32, #tpu.memory_space<vmem>>, vector<2x16xf32>
    tpu.vector_store %arg10[%c0_309, %c0_310], %702 {strides = array<i32>} : memref<16x16xf32, #tpu.memory_space<vmem>>, vector<2x16xf32>,
    %cst_311 = arith.constant dense<0.000000e+00> : vector<2x16xf32>
    %704 = tpu.matmul %702, %668, %cst_311 {dimension_numbers = #tpu.dot_dimension_numbers<[1], [0], [0], [1], [0, 0, 1, 1], [], []>} : vector<2x16xf32>, vector<16x16xf32>, vector<2x16xf32> -> vector<2x16xf32>
    %705 = vector.broadcast %674 : vector<1x16xf32> to vector<2x16xf32>
    %706 = arith.addf %704, %705 : vector<2x16xf32>
    %cst_312 = arith.constant dense<0.000000e+00> : vector<2x16xf32>
    %707 = tpu.matmul %702, %670, %cst_312 {dimension_numbers = #tpu.dot_dimension_numbers<[1], [0], [0], [1], [0, 0, 1, 1], [], []>} : vector<2x16xf32>, vector<16x16xf32>, vector<2x16xf32> -> vector<2x16xf32>
    %708 = vector.broadcast %676 : vector<1x16xf32> to vector<2x16xf32>
    %709 = arith.addf %707, %708 : vector<2x16xf32>
    %cst_313 = arith.constant dense<0.000000e+00> : vector<2x16xf32>
    %710 = tpu.matmul %702, %672, %cst_313 {dimension_numbers = #tpu.dot_dimension_numbers<[1], [0], [0], [1], [0, 0, 1, 1], [], []>} : vector<2x16xf32>, vector<16x16xf32>, vector<2x16xf32> -> vector<2x16xf32>
    %711 = vector.broadcast %678 : vector<1x16xf32> to vector<2x16xf32>
    %712 = arith.addf %710, %711 : vector<2x16xf32>
    %713 = vector.extract_strided_slice %652 {offsets = [2, 0], sizes = [2, 16], strides = [1, 1]} : vector<16x16xf32> to vector<2x16xf32>
    %714 = arith.addf %713, %706 : vector<2x16xf32>
    %715 = arith.negf %714 : vector<2x16xf32>
    %716 = math.exp %715 : vector<2x16xf32>
    %cst_314 = arith.constant 1.000000e+00 : f32
    %717 = vector.broadcast %cst_314 : f32 to vector<2x16xf32>
    %718 = arith.addf %717, %716 : vector<2x16xf32>
    %719 = arith.divf %717, %718 : vector<2x16xf32>
    %720 = vector.extract_strided_slice %659 {offsets = [2, 0], sizes = [2, 16], strides = [1, 1]} : vector<16x16xf32> to vector<2x16xf32>
    %721 = arith.addf %720, %709 : vector<2x16xf32>
    %722 = arith.negf %721 : vector<2x16xf32>
    %723 = math.exp %722 : vector<2x16xf32>
    %cst_315 = arith.constant 1.000000e+00 : f32
    %724 = vector.broadcast %cst_315 : f32 to vector<2x16xf32>
    %725 = arith.addf %724, %723 : vector<2x16xf32>
    %726 = arith.divf %724, %725 : vector<2x16xf32>
    %727 = vector.extract_strided_slice %666 {offsets = [2, 0], sizes = [2, 16], strides = [1, 1]} : vector<16x16xf32> to vector<2x16xf32>
    %728 = arith.mulf %719, %712 : vector<2x16xf32>
    %729 = arith.addf %727, %728 : vector<2x16xf32>
    %730 = math.tanh %729 : vector<2x16xf32>
    %cst_316 = arith.constant 1.000000e+00 : f32
    %731 = vector.broadcast %cst_316 : f32 to vector<2x16xf32>
    %732 = arith.subf %731, %726 : vector<2x16xf32>
    %733 = arith.mulf %732, %730 : vector<2x16xf32>
    %734 = arith.mulf %726, %702 : vector<2x16xf32>
    %735 = arith.addf %733, %734 : vector<2x16xf32>
    %c2_317 = arith.constant 2 : index
    %c0_318 = arith.constant 0 : index
    %736 = vector.load %arg10[%c2_317, %c0_318] : memref<16x16xf32, #tpu.memory_space<vmem>>, vector<2x16xf32>
    tpu.vector_store %arg10[%c2_317, %c0_318], %735 {strides = array<i32>} : memref<16x16xf32, #tpu.memory_space<vmem>>, vector<2x16xf32>,
    %cst_319 = arith.constant dense<0.000000e+00> : vector<2x16xf32>
    %737 = tpu.matmul %735, %668, %cst_319 {dimension_numbers = #tpu.dot_dimension_numbers<[1], [0], [0], [1], [0, 0, 1, 1], [], []>} : vector<2x16xf32>, vector<16x16xf32>, vector<2x16xf32> -> vector<2x16xf32>
    %738 = vector.broadcast %674 : vector<1x16xf32> to vector<2x16xf32>
    %739 = arith.addf %737, %738 : vector<2x16xf32>
    %cst_320 = arith.constant dense<0.000000e+00> : vector<2x16xf32>
    %740 = tpu.matmul %735, %670, %cst_320 {dimension_numbers = #tpu.dot_dimension_numbers<[1], [0], [0], [1], [0, 0, 1, 1], [], []>} : vector<2x16xf32>, vector<16x16xf32>, vector<2x16xf32> -> vector<2x16xf32>
    %741 = vector.broadcast %676 : vector<1x16xf32> to vector<2x16xf32>
    %742 = arith.addf %740, %741 : vector<2x16xf32>
    %cst_321 = arith.constant dense<0.000000e+00> : vector<2x16xf32>
    %743 = tpu.matmul %735, %672, %cst_321 {dimension_numbers = #tpu.dot_dimension_numbers<[1], [0], [0], [1], [0, 0, 1, 1], [], []>} : vector<2x16xf32>, vector<16x16xf32>, vector<2x16xf32> -> vector<2x16xf32>
    %744 = vector.broadcast %678 : vector<1x16xf32> to vector<2x16xf32>
    %745 = arith.addf %743, %744 : vector<2x16xf32>
    %746 = vector.extract_strided_slice %652 {offsets = [4, 0], sizes = [2, 16], strides = [1, 1]} : vector<16x16xf32> to vector<2x16xf32>
    %747 = arith.addf %746, %739 : vector<2x16xf32>
    %748 = arith.negf %747 : vector<2x16xf32>
    %749 = math.exp %748 : vector<2x16xf32>
    %cst_322 = arith.constant 1.000000e+00 : f32
    %750 = vector.broadcast %cst_322 : f32 to vector<2x16xf32>
    %751 = arith.addf %750, %749 : vector<2x16xf32>
    %752 = arith.divf %750, %751 : vector<2x16xf32>
    %753 = vector.extract_strided_slice %659 {offsets = [4, 0], sizes = [2, 16], strides = [1, 1]} : vector<16x16xf32> to vector<2x16xf32>
    %754 = arith.addf %753, %742 : vector<2x16xf32>
    %755 = arith.negf %754 : vector<2x16xf32>
    %756 = math.exp %755 : vector<2x16xf32>
    %cst_323 = arith.constant 1.000000e+00 : f32
    %757 = vector.broadcast %cst_323 : f32 to vector<2x16xf32>
    %758 = arith.addf %757, %756 : vector<2x16xf32>
    %759 = arith.divf %757, %758 : vector<2x16xf32>
    %760 = vector.extract_strided_slice %666 {offsets = [4, 0], sizes = [2, 16], strides = [1, 1]} : vector<16x16xf32> to vector<2x16xf32>
    %761 = arith.mulf %752, %745 : vector<2x16xf32>
    %762 = arith.addf %760, %761 : vector<2x16xf32>
    %763 = math.tanh %762 : vector<2x16xf32>
    %cst_324 = arith.constant 1.000000e+00 : f32
    %764 = vector.broadcast %cst_324 : f32 to vector<2x16xf32>
    %765 = arith.subf %764, %759 : vector<2x16xf32>
    %766 = arith.mulf %765, %763 : vector<2x16xf32>
    %767 = arith.mulf %759, %735 : vector<2x16xf32>
    %768 = arith.addf %766, %767 : vector<2x16xf32>
    %c4_325 = arith.constant 4 : index
    %c0_326 = arith.constant 0 : index
    %769 = vector.load %arg10[%c4_325, %c0_326] : memref<16x16xf32, #tpu.memory_space<vmem>>, vector<2x16xf32>
    tpu.vector_store %arg10[%c4_325, %c0_326], %768 {strides = array<i32>} : memref<16x16xf32, #tpu.memory_space<vmem>>, vector<2x16xf32>,
    %cst_327 = arith.constant dense<0.000000e+00> : vector<2x16xf32>
    %770 = tpu.matmul %768, %668, %cst_327 {dimension_numbers = #tpu.dot_dimension_numbers<[1], [0], [0], [1], [0, 0, 1, 1], [], []>} : vector<2x16xf32>, vector<16x16xf32>, vector<2x16xf32> -> vector<2x16xf32>
    %771 = vector.broadcast %674 : vector<1x16xf32> to vector<2x16xf32>
    %772 = arith.addf %770, %771 : vector<2x16xf32>
    %cst_328 = arith.constant dense<0.000000e+00> : vector<2x16xf32>
    %773 = tpu.matmul %768, %670, %cst_328 {dimension_numbers = #tpu.dot_dimension_numbers<[1], [0], [0], [1], [0, 0, 1, 1], [], []>} : vector<2x16xf32>, vector<16x16xf32>, vector<2x16xf32> -> vector<2x16xf32>
    %774 = vector.broadcast %676 : vector<1x16xf32> to vector<2x16xf32>
    %775 = arith.addf %773, %774 : vector<2x16xf32>
    %cst_329 = arith.constant dense<0.000000e+00> : vector<2x16xf32>
    %776 = tpu.matmul %768, %672, %cst_329 {dimension_numbers = #tpu.dot_dimension_numbers<[1], [0], [0], [1], [0, 0, 1, 1], [], []>} : vector<2x16xf32>, vector<16x16xf32>, vector<2x16xf32> -> vector<2x16xf32>
    %777 = vector.broadcast %678 : vector<1x16xf32> to vector<2x16xf32>
    %778 = arith.addf %776, %777 : vector<2x16xf32>
    %779 = vector.extract_strided_slice %652 {offsets = [6, 0], sizes = [2, 16], strides = [1, 1]} : vector<16x16xf32> to vector<2x16xf32>
    %780 = arith.addf %779, %772 : vector<2x16xf32>
    %781 = arith.negf %780 : vector<2x16xf32>
    %782 = math.exp %781 : vector<2x16xf32>
    %cst_330 = arith.constant 1.000000e+00 : f32
    %783 = vector.broadcast %cst_330 : f32 to vector<2x16xf32>
    %784 = arith.addf %783, %782 : vector<2x16xf32>
    %785 = arith.divf %783, %784 : vector<2x16xf32>
    %786 = vector.extract_strided_slice %659 {offsets = [6, 0], sizes = [2, 16], strides = [1, 1]} : vector<16x16xf32> to vector<2x16xf32>
    %787 = arith.addf %786, %775 : vector<2x16xf32>
    %788 = arith.negf %787 : vector<2x16xf32>
    %789 = math.exp %788 : vector<2x16xf32>
    %cst_331 = arith.constant 1.000000e+00 : f32
    %790 = vector.broadcast %cst_331 : f32 to vector<2x16xf32>
    %791 = arith.addf %790, %789 : vector<2x16xf32>
    %792 = arith.divf %790, %791 : vector<2x16xf32>
    %793 = vector.extract_strided_slice %666 {offsets = [6, 0], sizes = [2, 16], strides = [1, 1]} : vector<16x16xf32> to vector<2x16xf32>
    %794 = arith.mulf %785, %778 : vector<2x16xf32>
    %795 = arith.addf %793, %794 : vector<2x16xf32>
    %796 = math.tanh %795 : vector<2x16xf32>
    %cst_332 = arith.constant 1.000000e+00 : f32
    %797 = vector.broadcast %cst_332 : f32 to vector<2x16xf32>
    %798 = arith.subf %797, %792 : vector<2x16xf32>
    %799 = arith.mulf %798, %796 : vector<2x16xf32>
    %800 = arith.mulf %792, %768 : vector<2x16xf32>
    %801 = arith.addf %799, %800 : vector<2x16xf32>
    %c6_333 = arith.constant 6 : index
    %c0_334 = arith.constant 0 : index
    %802 = vector.load %arg10[%c6_333, %c0_334] : memref<16x16xf32, #tpu.memory_space<vmem>>, vector<2x16xf32>
    tpu.vector_store %arg10[%c6_333, %c0_334], %801 {strides = array<i32>} : memref<16x16xf32, #tpu.memory_space<vmem>>, vector<2x16xf32>,
    %cst_335 = arith.constant dense<0.000000e+00> : vector<2x16xf32>
    %803 = tpu.matmul %801, %668, %cst_335 {dimension_numbers = #tpu.dot_dimension_numbers<[1], [0], [0], [1], [0, 0, 1, 1], [], []>} : vector<2x16xf32>, vector<16x16xf32>, vector<2x16xf32> -> vector<2x16xf32>
    %804 = vector.broadcast %674 : vector<1x16xf32> to vector<2x16xf32>
    %805 = arith.addf %803, %804 : vector<2x16xf32>
    %cst_336 = arith.constant dense<0.000000e+00> : vector<2x16xf32>
    %806 = tpu.matmul %801, %670, %cst_336 {dimension_numbers = #tpu.dot_dimension_numbers<[1], [0], [0], [1], [0, 0, 1, 1], [], []>} : vector<2x16xf32>, vector<16x16xf32>, vector<2x16xf32> -> vector<2x16xf32>
    %807 = vector.broadcast %676 : vector<1x16xf32> to vector<2x16xf32>
    %808 = arith.addf %806, %807 : vector<2x16xf32>
    %cst_337 = arith.constant dense<0.000000e+00> : vector<2x16xf32>
    %809 = tpu.matmul %801, %672, %cst_337 {dimension_numbers = #tpu.dot_dimension_numbers<[1], [0], [0], [1], [0, 0, 1, 1], [], []>} : vector<2x16xf32>, vector<16x16xf32>, vector<2x16xf32> -> vector<2x16xf32>
    %810 = vector.broadcast %678 : vector<1x16xf32> to vector<2x16xf32>
    %811 = arith.addf %809, %810 : vector<2x16xf32>
    %812 = vector.extract_strided_slice %652 {offsets = [8, 0], sizes = [2, 16], strides = [1, 1]} : vector<16x16xf32> to vector<2x16xf32>
    %813 = arith.addf %812, %805 : vector<2x16xf32>
    %814 = arith.negf %813 : vector<2x16xf32>
    %815 = math.exp %814 : vector<2x16xf32>
    %cst_338 = arith.constant 1.000000e+00 : f32
    %816 = vector.broadcast %cst_338 : f32 to vector<2x16xf32>
    %817 = arith.addf %816, %815 : vector<2x16xf32>
    %818 = arith.divf %816, %817 : vector<2x16xf32>
    %819 = vector.extract_strided_slice %659 {offsets = [8, 0], sizes = [2, 16], strides = [1, 1]} : vector<16x16xf32> to vector<2x16xf32>
    %820 = arith.addf %819, %808 : vector<2x16xf32>
    %821 = arith.negf %820 : vector<2x16xf32>
    %822 = math.exp %821 : vector<2x16xf32>
    %cst_339 = arith.constant 1.000000e+00 : f32
    %823 = vector.broadcast %cst_339 : f32 to vector<2x16xf32>
    %824 = arith.addf %823, %822 : vector<2x16xf32>
    %825 = arith.divf %823, %824 : vector<2x16xf32>
    %826 = vector.extract_strided_slice %666 {offsets = [8, 0], sizes = [2, 16], strides = [1, 1]} : vector<16x16xf32> to vector<2x16xf32>
    %827 = arith.mulf %818, %811 : vector<2x16xf32>
    %828 = arith.addf %826, %827 : vector<2x16xf32>
    %829 = math.tanh %828 : vector<2x16xf32>
    %cst_340 = arith.constant 1.000000e+00 : f32
    %830 = vector.broadcast %cst_340 : f32 to vector<2x16xf32>
    %831 = arith.subf %830, %825 : vector<2x16xf32>
    %832 = arith.mulf %831, %829 : vector<2x16xf32>
    %833 = arith.mulf %825, %801 : vector<2x16xf32>
    %834 = arith.addf %832, %833 : vector<2x16xf32>
    %c8_341 = arith.constant 8 : index
    %c0_342 = arith.constant 0 : index
    %835 = vector.load %arg10[%c8_341, %c0_342] : memref<16x16xf32, #tpu.memory_space<vmem>>, vector<2x16xf32>
    tpu.vector_store %arg10[%c8_341, %c0_342], %834 {strides = array<i32>} : memref<16x16xf32, #tpu.memory_space<vmem>>, vector<2x16xf32>,
    %cst_343 = arith.constant dense<0.000000e+00> : vector<2x16xf32>
    %836 = tpu.matmul %834, %668, %cst_343 {dimension_numbers = #tpu.dot_dimension_numbers<[1], [0], [0], [1], [0, 0, 1, 1], [], []>} : vector<2x16xf32>, vector<16x16xf32>, vector<2x16xf32> -> vector<2x16xf32>
    %837 = vector.broadcast %674 : vector<1x16xf32> to vector<2x16xf32>
    %838 = arith.addf %836, %837 : vector<2x16xf32>
    %cst_344 = arith.constant dense<0.000000e+00> : vector<2x16xf32>
    %839 = tpu.matmul %834, %670, %cst_344 {dimension_numbers = #tpu.dot_dimension_numbers<[1], [0], [0], [1], [0, 0, 1, 1], [], []>} : vector<2x16xf32>, vector<16x16xf32>, vector<2x16xf32> -> vector<2x16xf32>
    %840 = vector.broadcast %676 : vector<1x16xf32> to vector<2x16xf32>
    %841 = arith.addf %839, %840 : vector<2x16xf32>
    %cst_345 = arith.constant dense<0.000000e+00> : vector<2x16xf32>
    %842 = tpu.matmul %834, %672, %cst_345 {dimension_numbers = #tpu.dot_dimension_numbers<[1], [0], [0], [1], [0, 0, 1, 1], [], []>} : vector<2x16xf32>, vector<16x16xf32>, vector<2x16xf32> -> vector<2x16xf32>
    %843 = vector.broadcast %678 : vector<1x16xf32> to vector<2x16xf32>
    %844 = arith.addf %842, %843 : vector<2x16xf32>
    %845 = vector.extract_strided_slice %652 {offsets = [10, 0], sizes = [2, 16], strides = [1, 1]} : vector<16x16xf32> to vector<2x16xf32>
    %846 = arith.addf %845, %838 : vector<2x16xf32>
    %847 = arith.negf %846 : vector<2x16xf32>
    %848 = math.exp %847 : vector<2x16xf32>
    %cst_346 = arith.constant 1.000000e+00 : f32
    %849 = vector.broadcast %cst_346 : f32 to vector<2x16xf32>
    %850 = arith.addf %849, %848 : vector<2x16xf32>
    %851 = arith.divf %849, %850 : vector<2x16xf32>
    %852 = vector.extract_strided_slice %659 {offsets = [10, 0], sizes = [2, 16], strides = [1, 1]} : vector<16x16xf32> to vector<2x16xf32>
    %853 = arith.addf %852, %841 : vector<2x16xf32>
    %854 = arith.negf %853 : vector<2x16xf32>
    %855 = math.exp %854 : vector<2x16xf32>
    %cst_347 = arith.constant 1.000000e+00 : f32
    %856 = vector.broadcast %cst_347 : f32 to vector<2x16xf32>
    %857 = arith.addf %856, %855 : vector<2x16xf32>
    %858 = arith.divf %856, %857 : vector<2x16xf32>
    %859 = vector.extract_strided_slice %666 {offsets = [10, 0], sizes = [2, 16], strides = [1, 1]} : vector<16x16xf32> to vector<2x16xf32>
    %860 = arith.mulf %851, %844 : vector<2x16xf32>
    %861 = arith.addf %859, %860 : vector<2x16xf32>
    %862 = math.tanh %861 : vector<2x16xf32>
    %cst_348 = arith.constant 1.000000e+00 : f32
    %863 = vector.broadcast %cst_348 : f32 to vector<2x16xf32>
    %864 = arith.subf %863, %858 : vector<2x16xf32>
    %865 = arith.mulf %864, %862 : vector<2x16xf32>
    %866 = arith.mulf %858, %834 : vector<2x16xf32>
    %867 = arith.addf %865, %866 : vector<2x16xf32>
    %c10_349 = arith.constant 10 : index
    %c0_350 = arith.constant 0 : index
    %868 = vector.load %arg10[%c10_349, %c0_350] : memref<16x16xf32, #tpu.memory_space<vmem>>, vector<2x16xf32>
    tpu.vector_store %arg10[%c10_349, %c0_350], %867 {strides = array<i32>} : memref<16x16xf32, #tpu.memory_space<vmem>>, vector<2x16xf32>,
    %cst_351 = arith.constant dense<0.000000e+00> : vector<2x16xf32>
    %869 = tpu.matmul %867, %668, %cst_351 {dimension_numbers = #tpu.dot_dimension_numbers<[1], [0], [0], [1], [0, 0, 1, 1], [], []>} : vector<2x16xf32>, vector<16x16xf32>, vector<2x16xf32> -> vector<2x16xf32>
    %870 = vector.broadcast %674 : vector<1x16xf32> to vector<2x16xf32>
    %871 = arith.addf %869, %870 : vector<2x16xf32>
    %cst_352 = arith.constant dense<0.000000e+00> : vector<2x16xf32>
    %872 = tpu.matmul %867, %670, %cst_352 {dimension_numbers = #tpu.dot_dimension_numbers<[1], [0], [0], [1], [0, 0, 1, 1], [], []>} : vector<2x16xf32>, vector<16x16xf32>, vector<2x16xf32> -> vector<2x16xf32>
    %873 = vector.broadcast %676 : vector<1x16xf32> to vector<2x16xf32>
    %874 = arith.addf %872, %873 : vector<2x16xf32>
    %cst_353 = arith.constant dense<0.000000e+00> : vector<2x16xf32>
    %875 = tpu.matmul %867, %672, %cst_353 {dimension_numbers = #tpu.dot_dimension_numbers<[1], [0], [0], [1], [0, 0, 1, 1], [], []>} : vector<2x16xf32>, vector<16x16xf32>, vector<2x16xf32> -> vector<2x16xf32>
    %876 = vector.broadcast %678 : vector<1x16xf32> to vector<2x16xf32>
    %877 = arith.addf %875, %876 : vector<2x16xf32>
    %878 = vector.extract_strided_slice %652 {offsets = [12, 0], sizes = [2, 16], strides = [1, 1]} : vector<16x16xf32> to vector<2x16xf32>
    %879 = arith.addf %878, %871 : vector<2x16xf32>
    %880 = arith.negf %879 : vector<2x16xf32>
    %881 = math.exp %880 : vector<2x16xf32>
    %cst_354 = arith.constant 1.000000e+00 : f32
    %882 = vector.broadcast %cst_354 : f32 to vector<2x16xf32>
    %883 = arith.addf %882, %881 : vector<2x16xf32>
    %884 = arith.divf %882, %883 : vector<2x16xf32>
    %885 = vector.extract_strided_slice %659 {offsets = [12, 0], sizes = [2, 16], strides = [1, 1]} : vector<16x16xf32> to vector<2x16xf32>
    %886 = arith.addf %885, %874 : vector<2x16xf32>
    %887 = arith.negf %886 : vector<2x16xf32>
    %888 = math.exp %887 : vector<2x16xf32>
    %cst_355 = arith.constant 1.000000e+00 : f32
    %889 = vector.broadcast %cst_355 : f32 to vector<2x16xf32>
    %890 = arith.addf %889, %888 : vector<2x16xf32>
    %891 = arith.divf %889, %890 : vector<2x16xf32>
    %892 = vector.extract_strided_slice %666 {offsets = [12, 0], sizes = [2, 16], strides = [1, 1]} : vector<16x16xf32> to vector<2x16xf32>
    %893 = arith.mulf %884, %877 : vector<2x16xf32>
    %894 = arith.addf %892, %893 : vector<2x16xf32>
    %895 = math.tanh %894 : vector<2x16xf32>
    %cst_356 = arith.constant 1.000000e+00 : f32
    %896 = vector.broadcast %cst_356 : f32 to vector<2x16xf32>
    %897 = arith.subf %896, %891 : vector<2x16xf32>
    %898 = arith.mulf %897, %895 : vector<2x16xf32>
    %899 = arith.mulf %891, %867 : vector<2x16xf32>
    %900 = arith.addf %898, %899 : vector<2x16xf32>
    %c12_357 = arith.constant 12 : index
    %c0_358 = arith.constant 0 : index
    %901 = vector.load %arg10[%c12_357, %c0_358] : memref<16x16xf32, #tpu.memory_space<vmem>>, vector<2x16xf32>
    tpu.vector_store %arg10[%c12_357, %c0_358], %900 {strides = array<i32>} : memref<16x16xf32, #tpu.memory_space<vmem>>, vector<2x16xf32>,
    %cst_359 = arith.constant dense<0.000000e+00> : vector<2x16xf32>
    %902 = tpu.matmul %900, %668, %cst_359 {dimension_numbers = #tpu.dot_dimension_numbers<[1], [0], [0], [1], [0, 0, 1, 1], [], []>} : vector<2x16xf32>, vector<16x16xf32>, vector<2x16xf32> -> vector<2x16xf32>
    %903 = vector.broadcast %674 : vector<1x16xf32> to vector<2x16xf32>
    %904 = arith.addf %902, %903 : vector<2x16xf32>
    %cst_360 = arith.constant dense<0.000000e+00> : vector<2x16xf32>
    %905 = tpu.matmul %900, %670, %cst_360 {dimension_numbers = #tpu.dot_dimension_numbers<[1], [0], [0], [1], [0, 0, 1, 1], [], []>} : vector<2x16xf32>, vector<16x16xf32>, vector<2x16xf32> -> vector<2x16xf32>
    %906 = vector.broadcast %676 : vector<1x16xf32> to vector<2x16xf32>
    %907 = arith.addf %905, %906 : vector<2x16xf32>
    %cst_361 = arith.constant dense<0.000000e+00> : vector<2x16xf32>
    %908 = tpu.matmul %900, %672, %cst_361 {dimension_numbers = #tpu.dot_dimension_numbers<[1], [0], [0], [1], [0, 0, 1, 1], [], []>} : vector<2x16xf32>, vector<16x16xf32>, vector<2x16xf32> -> vector<2x16xf32>
    %909 = vector.broadcast %678 : vector<1x16xf32> to vector<2x16xf32>
    %910 = arith.addf %908, %909 : vector<2x16xf32>
    %911 = vector.extract_strided_slice %652 {offsets = [14, 0], sizes = [2, 16], strides = [1, 1]} : vector<16x16xf32> to vector<2x16xf32>
    %912 = arith.addf %911, %904 : vector<2x16xf32>
    %913 = arith.negf %912 : vector<2x16xf32>
    %914 = math.exp %913 : vector<2x16xf32>
    %cst_362 = arith.constant 1.000000e+00 : f32
    %915 = vector.broadcast %cst_362 : f32 to vector<2x16xf32>
    %916 = arith.addf %915, %914 : vector<2x16xf32>
    %917 = arith.divf %915, %916 : vector<2x16xf32>
    %918 = vector.extract_strided_slice %659 {offsets = [14, 0], sizes = [2, 16], strides = [1, 1]} : vector<16x16xf32> to vector<2x16xf32>
    %919 = arith.addf %918, %907 : vector<2x16xf32>
    %920 = arith.negf %919 : vector<2x16xf32>
    %921 = math.exp %920 : vector<2x16xf32>
    %cst_363 = arith.constant 1.000000e+00 : f32
    %922 = vector.broadcast %cst_363 : f32 to vector<2x16xf32>
    %923 = arith.addf %922, %921 : vector<2x16xf32>
    %924 = arith.divf %922, %923 : vector<2x16xf32>
    %925 = vector.extract_strided_slice %666 {offsets = [14, 0], sizes = [2, 16], strides = [1, 1]} : vector<16x16xf32> to vector<2x16xf32>
    %926 = arith.mulf %917, %910 : vector<2x16xf32>
    %927 = arith.addf %925, %926 : vector<2x16xf32>
    %928 = math.tanh %927 : vector<2x16xf32>
    %cst_364 = arith.constant 1.000000e+00 : f32
    %929 = vector.broadcast %cst_364 : f32 to vector<2x16xf32>
    %930 = arith.subf %929, %924 : vector<2x16xf32>
    %931 = arith.mulf %930, %928 : vector<2x16xf32>
    %932 = arith.mulf %924, %900 : vector<2x16xf32>
    %933 = arith.addf %931, %932 : vector<2x16xf32>
    %c14_365 = arith.constant 14 : index
    %c0_366 = arith.constant 0 : index
    %934 = vector.load %arg10[%c14_365, %c0_366] : memref<16x16xf32, #tpu.memory_space<vmem>>, vector<2x16xf32>
    tpu.vector_store %arg10[%c14_365, %c0_366], %933 {strides = array<i32>} : memref<16x16xf32, #tpu.memory_space<vmem>>, vector<2x16xf32>,
    %c0_367 = arith.constant 0 : index
    %c0_368 = arith.constant 0 : index
    %935 = vector.load %arg10[%c0_367, %c0_368] : memref<16x16xf32, #tpu.memory_space<vmem>>, vector<16x16xf32>
    %c9 = arith.constant 9 : index
    %c0_369 = arith.constant 0 : index
    %c0_370 = arith.constant 0 : index
    %936 = vector.load %arg3[%c9, %c0_369, %c0_370] : memref<12x16x16xf32, #tpu.memory_space<vmem>>, vector<1x16x16xf32>
    %937 = vector.shape_cast %936 : vector<1x16x16xf32> to vector<16x16xf32>
    %cst_371 = arith.constant dense<0.000000e+00> : vector<16x16xf32>
    %938 = tpu.matmul %935, %937, %cst_371 {dimension_numbers = #tpu.dot_dimension_numbers<[1], [0], [0], [1], [0, 0, 1, 1], [], []>} : vector<16x16xf32>, vector<16x16xf32>, vector<16x16xf32> -> vector<16x16xf32>
    %c9_372 = arith.constant 9 : index
    %c0_373 = arith.constant 0 : index
    %c0_374 = arith.constant 0 : index
    %939 = vector.load %arg5[%c9_372, %c0_373, %c0_374] : memref<12x1x16xf32, #tpu.memory_space<vmem>>, vector<1x1x16xf32>
    %940 = vector.shape_cast %939 : vector<1x1x16xf32> to vector<1x16xf32>
    %941 = vector.broadcast %940 : vector<1x16xf32> to vector<16x16xf32>
    %942 = arith.addf %938, %941 : vector<16x16xf32>
    %c10_375 = arith.constant 10 : index
    %c0_376 = arith.constant 0 : index
    %c0_377 = arith.constant 0 : index
    %943 = vector.load %arg3[%c10_375, %c0_376, %c0_377] : memref<12x16x16xf32, #tpu.memory_space<vmem>>, vector<1x16x16xf32>
    %944 = vector.shape_cast %943 : vector<1x16x16xf32> to vector<16x16xf32>
    %cst_378 = arith.constant dense<0.000000e+00> : vector<16x16xf32>
    %945 = tpu.matmul %935, %944, %cst_378 {dimension_numbers = #tpu.dot_dimension_numbers<[1], [0], [0], [1], [0, 0, 1, 1], [], []>} : vector<16x16xf32>, vector<16x16xf32>, vector<16x16xf32> -> vector<16x16xf32>
    %c10_379 = arith.constant 10 : index
    %c0_380 = arith.constant 0 : index
    %c0_381 = arith.constant 0 : index
    %946 = vector.load %arg5[%c10_379, %c0_380, %c0_381] : memref<12x1x16xf32, #tpu.memory_space<vmem>>, vector<1x1x16xf32>
    %947 = vector.shape_cast %946 : vector<1x1x16xf32> to vector<1x16xf32>
    %948 = vector.broadcast %947 : vector<1x16xf32> to vector<16x16xf32>
    %949 = arith.addf %945, %948 : vector<16x16xf32>
    %c11 = arith.constant 11 : index
    %c0_382 = arith.constant 0 : index
    %c0_383 = arith.constant 0 : index
    %950 = vector.load %arg3[%c11, %c0_382, %c0_383] : memref<12x16x16xf32, #tpu.memory_space<vmem>>, vector<1x16x16xf32>
    %951 = vector.shape_cast %950 : vector<1x16x16xf32> to vector<16x16xf32>
    %cst_384 = arith.constant dense<0.000000e+00> : vector<16x16xf32>
    %952 = tpu.matmul %935, %951, %cst_384 {dimension_numbers = #tpu.dot_dimension_numbers<[1], [0], [0], [1], [0, 0, 1, 1], [], []>} : vector<16x16xf32>, vector<16x16xf32>, vector<16x16xf32> -> vector<16x16xf32>
    %c11_385 = arith.constant 11 : index
    %c0_386 = arith.constant 0 : index
    %c0_387 = arith.constant 0 : index
    %953 = vector.load %arg5[%c11_385, %c0_386, %c0_387] : memref<12x1x16xf32, #tpu.memory_space<vmem>>, vector<1x1x16xf32>
    %954 = vector.shape_cast %953 : vector<1x1x16xf32> to vector<1x16xf32>
    %955 = vector.broadcast %954 : vector<1x16xf32> to vector<16x16xf32>
    %956 = arith.addf %952, %955 : vector<16x16xf32>
    %c9_388 = arith.constant 9 : index
    %c0_389 = arith.constant 0 : index
    %c0_390 = arith.constant 0 : index
    %957 = vector.load %arg4[%c9_388, %c0_389, %c0_390] : memref<12x16x16xf32, #tpu.memory_space<vmem>>, vector<1x16x16xf32>
    %958 = vector.shape_cast %957 : vector<1x16x16xf32> to vector<16x16xf32>
    %c10_391 = arith.constant 10 : index
    %c0_392 = arith.constant 0 : index
    %c0_393 = arith.constant 0 : index
    %959 = vector.load %arg4[%c10_391, %c0_392, %c0_393] : memref<12x16x16xf32, #tpu.memory_space<vmem>>, vector<1x16x16xf32>
    %960 = vector.shape_cast %959 : vector<1x16x16xf32> to vector<16x16xf32>
    %c11_394 = arith.constant 11 : index
    %c0_395 = arith.constant 0 : index
    %c0_396 = arith.constant 0 : index
    %961 = vector.load %arg4[%c11_394, %c0_395, %c0_396] : memref<12x16x16xf32, #tpu.memory_space<vmem>>, vector<1x16x16xf32>
    %962 = vector.shape_cast %961 : vector<1x16x16xf32> to vector<16x16xf32>
    %c9_397 = arith.constant 9 : index
    %c0_398 = arith.constant 0 : index
    %c0_399 = arith.constant 0 : index
    %963 = vector.load %arg6[%c9_397, %c0_398, %c0_399] : memref<12x1x16xf32, #tpu.memory_space<vmem>>, vector<1x1x16xf32>
    %964 = vector.shape_cast %963 : vector<1x1x16xf32> to vector<1x16xf32>
    %c10_400 = arith.constant 10 : index
    %c0_401 = arith.constant 0 : index
    %c0_402 = arith.constant 0 : index
    %965 = vector.load %arg6[%c10_400, %c0_401, %c0_402] : memref<12x1x16xf32, #tpu.memory_space<vmem>>, vector<1x1x16xf32>
    %966 = vector.shape_cast %965 : vector<1x1x16xf32> to vector<1x16xf32>
    %c11_403 = arith.constant 11 : index
    %c0_404 = arith.constant 0 : index
    %c0_405 = arith.constant 0 : index
    %967 = vector.load %arg6[%c11_403, %c0_404, %c0_405] : memref<12x1x16xf32, #tpu.memory_space<vmem>>, vector<1x1x16xf32>
    %968 = vector.shape_cast %967 : vector<1x1x16xf32> to vector<1x16xf32>
    %969 = vector.extract_strided_slice %942 {offsets = [0, 0], sizes = [2, 16], strides = [1, 1]} : vector<16x16xf32> to vector<2x16xf32>
    %970 = vector.broadcast %964 : vector<1x16xf32> to vector<2x16xf32>
    %971 = arith.addf %969, %970 : vector<2x16xf32>
    %972 = arith.negf %971 : vector<2x16xf32>
    %973 = math.exp %972 : vector<2x16xf32>
    %cst_406 = arith.constant 1.000000e+00 : f32
    %974 = vector.broadcast %cst_406 : f32 to vector<2x16xf32>
    %975 = arith.addf %974, %973 : vector<2x16xf32>
    %976 = arith.divf %974, %975 : vector<2x16xf32>
    %977 = vector.extract_strided_slice %949 {offsets = [0, 0], sizes = [2, 16], strides = [1, 1]} : vector<16x16xf32> to vector<2x16xf32>
    %978 = vector.broadcast %966 : vector<1x16xf32> to vector<2x16xf32>
    %979 = arith.addf %977, %978 : vector<2x16xf32>
    %980 = arith.negf %979 : vector<2x16xf32>
    %981 = math.exp %980 : vector<2x16xf32>
    %cst_407 = arith.constant 1.000000e+00 : f32
    %982 = vector.broadcast %cst_407 : f32 to vector<2x16xf32>
    %983 = arith.addf %982, %981 : vector<2x16xf32>
    %984 = arith.divf %982, %983 : vector<2x16xf32>
    %985 = vector.extract_strided_slice %956 {offsets = [0, 0], sizes = [2, 16], strides = [1, 1]} : vector<16x16xf32> to vector<2x16xf32>
    %986 = vector.broadcast %968 : vector<1x16xf32> to vector<2x16xf32>
    %987 = arith.mulf %976, %986 : vector<2x16xf32>
    %988 = arith.addf %985, %987 : vector<2x16xf32>
    %989 = math.tanh %988 : vector<2x16xf32>
    %cst_408 = arith.constant 1.000000e+00 : f32
    %990 = vector.broadcast %cst_408 : f32 to vector<2x16xf32>
    %991 = arith.subf %990, %984 : vector<2x16xf32>
    %992 = arith.mulf %991, %989 : vector<2x16xf32>
    %c0_409 = arith.constant 0 : index
    %c0_410 = arith.constant 0 : index
    %993 = vector.load %arg10[%c0_409, %c0_410] : memref<16x16xf32, #tpu.memory_space<vmem>>, vector<2x16xf32>
    tpu.vector_store %arg10[%c0_409, %c0_410], %992 {strides = array<i32>} : memref<16x16xf32, #tpu.memory_space<vmem>>, vector<2x16xf32>,
    %cst_411 = arith.constant dense<0.000000e+00> : vector<2x16xf32>
    %994 = tpu.matmul %992, %958, %cst_411 {dimension_numbers = #tpu.dot_dimension_numbers<[1], [0], [0], [1], [0, 0, 1, 1], [], []>} : vector<2x16xf32>, vector<16x16xf32>, vector<2x16xf32> -> vector<2x16xf32>
    %995 = vector.broadcast %964 : vector<1x16xf32> to vector<2x16xf32>
    %996 = arith.addf %994, %995 : vector<2x16xf32>
    %cst_412 = arith.constant dense<0.000000e+00> : vector<2x16xf32>
    %997 = tpu.matmul %992, %960, %cst_412 {dimension_numbers = #tpu.dot_dimension_numbers<[1], [0], [0], [1], [0, 0, 1, 1], [], []>} : vector<2x16xf32>, vector<16x16xf32>, vector<2x16xf32> -> vector<2x16xf32>
    %998 = vector.broadcast %966 : vector<1x16xf32> to vector<2x16xf32>
    %999 = arith.addf %997, %998 : vector<2x16xf32>
    %cst_413 = arith.constant dense<0.000000e+00> : vector<2x16xf32>
    %1000 = tpu.matmul %992, %962, %cst_413 {dimension_numbers = #tpu.dot_dimension_numbers<[1], [0], [0], [1], [0, 0, 1, 1], [], []>} : vector<2x16xf32>, vector<16x16xf32>, vector<2x16xf32> -> vector<2x16xf32>
    %1001 = vector.broadcast %968 : vector<1x16xf32> to vector<2x16xf32>
    %1002 = arith.addf %1000, %1001 : vector<2x16xf32>
    %1003 = vector.extract_strided_slice %942 {offsets = [2, 0], sizes = [2, 16], strides = [1, 1]} : vector<16x16xf32> to vector<2x16xf32>
    %1004 = arith.addf %1003, %996 : vector<2x16xf32>
    %1005 = arith.negf %1004 : vector<2x16xf32>
    %1006 = math.exp %1005 : vector<2x16xf32>
    %cst_414 = arith.constant 1.000000e+00 : f32
    %1007 = vector.broadcast %cst_414 : f32 to vector<2x16xf32>
    %1008 = arith.addf %1007, %1006 : vector<2x16xf32>
    %1009 = arith.divf %1007, %1008 : vector<2x16xf32>
    %1010 = vector.extract_strided_slice %949 {offsets = [2, 0], sizes = [2, 16], strides = [1, 1]} : vector<16x16xf32> to vector<2x16xf32>
    %1011 = arith.addf %1010, %999 : vector<2x16xf32>
    %1012 = arith.negf %1011 : vector<2x16xf32>
    %1013 = math.exp %1012 : vector<2x16xf32>
    %cst_415 = arith.constant 1.000000e+00 : f32
    %1014 = vector.broadcast %cst_415 : f32 to vector<2x16xf32>
    %1015 = arith.addf %1014, %1013 : vector<2x16xf32>
    %1016 = arith.divf %1014, %1015 : vector<2x16xf32>
    %1017 = vector.extract_strided_slice %956 {offsets = [2, 0], sizes = [2, 16], strides = [1, 1]} : vector<16x16xf32> to vector<2x16xf32>
    %1018 = arith.mulf %1009, %1002 : vector<2x16xf32>
    %1019 = arith.addf %1017, %1018 : vector<2x16xf32>
    %1020 = math.tanh %1019 : vector<2x16xf32>
    %cst_416 = arith.constant 1.000000e+00 : f32
    %1021 = vector.broadcast %cst_416 : f32 to vector<2x16xf32>
    %1022 = arith.subf %1021, %1016 : vector<2x16xf32>
    %1023 = arith.mulf %1022, %1020 : vector<2x16xf32>
    %1024 = arith.mulf %1016, %992 : vector<2x16xf32>
    %1025 = arith.addf %1023, %1024 : vector<2x16xf32>
    %c2_417 = arith.constant 2 : index
    %c0_418 = arith.constant 0 : index
    %1026 = vector.load %arg10[%c2_417, %c0_418] : memref<16x16xf32, #tpu.memory_space<vmem>>, vector<2x16xf32>
    tpu.vector_store %arg10[%c2_417, %c0_418], %1025 {strides = array<i32>} : memref<16x16xf32, #tpu.memory_space<vmem>>, vector<2x16xf32>,
    %cst_419 = arith.constant dense<0.000000e+00> : vector<2x16xf32>
    %1027 = tpu.matmul %1025, %958, %cst_419 {dimension_numbers = #tpu.dot_dimension_numbers<[1], [0], [0], [1], [0, 0, 1, 1], [], []>} : vector<2x16xf32>, vector<16x16xf32>, vector<2x16xf32> -> vector<2x16xf32>
    %1028 = vector.broadcast %964 : vector<1x16xf32> to vector<2x16xf32>
    %1029 = arith.addf %1027, %1028 : vector<2x16xf32>
    %cst_420 = arith.constant dense<0.000000e+00> : vector<2x16xf32>
    %1030 = tpu.matmul %1025, %960, %cst_420 {dimension_numbers = #tpu.dot_dimension_numbers<[1], [0], [0], [1], [0, 0, 1, 1], [], []>} : vector<2x16xf32>, vector<16x16xf32>, vector<2x16xf32> -> vector<2x16xf32>
    %1031 = vector.broadcast %966 : vector<1x16xf32> to vector<2x16xf32>
    %1032 = arith.addf %1030, %1031 : vector<2x16xf32>
    %cst_421 = arith.constant dense<0.000000e+00> : vector<2x16xf32>
    %1033 = tpu.matmul %1025, %962, %cst_421 {dimension_numbers = #tpu.dot_dimension_numbers<[1], [0], [0], [1], [0, 0, 1, 1], [], []>} : vector<2x16xf32>, vector<16x16xf32>, vector<2x16xf32> -> vector<2x16xf32>
    %1034 = vector.broadcast %968 : vector<1x16xf32> to vector<2x16xf32>
    %1035 = arith.addf %1033, %1034 : vector<2x16xf32>
    %1036 = vector.extract_strided_slice %942 {offsets = [4, 0], sizes = [2, 16], strides = [1, 1]} : vector<16x16xf32> to vector<2x16xf32>
    %1037 = arith.addf %1036, %1029 : vector<2x16xf32>
    %1038 = arith.negf %1037 : vector<2x16xf32>
    %1039 = math.exp %1038 : vector<2x16xf32>
    %cst_422 = arith.constant 1.000000e+00 : f32
    %1040 = vector.broadcast %cst_422 : f32 to vector<2x16xf32>
    %1041 = arith.addf %1040, %1039 : vector<2x16xf32>
    %1042 = arith.divf %1040, %1041 : vector<2x16xf32>
    %1043 = vector.extract_strided_slice %949 {offsets = [4, 0], sizes = [2, 16], strides = [1, 1]} : vector<16x16xf32> to vector<2x16xf32>
    %1044 = arith.addf %1043, %1032 : vector<2x16xf32>
    %1045 = arith.negf %1044 : vector<2x16xf32>
    %1046 = math.exp %1045 : vector<2x16xf32>
    %cst_423 = arith.constant 1.000000e+00 : f32
    %1047 = vector.broadcast %cst_423 : f32 to vector<2x16xf32>
    %1048 = arith.addf %1047, %1046 : vector<2x16xf32>
    %1049 = arith.divf %1047, %1048 : vector<2x16xf32>
    %1050 = vector.extract_strided_slice %956 {offsets = [4, 0], sizes = [2, 16], strides = [1, 1]} : vector<16x16xf32> to vector<2x16xf32>
    %1051 = arith.mulf %1042, %1035 : vector<2x16xf32>
    %1052 = arith.addf %1050, %1051 : vector<2x16xf32>
    %1053 = math.tanh %1052 : vector<2x16xf32>
    %cst_424 = arith.constant 1.000000e+00 : f32
    %1054 = vector.broadcast %cst_424 : f32 to vector<2x16xf32>
    %1055 = arith.subf %1054, %1049 : vector<2x16xf32>
    %1056 = arith.mulf %1055, %1053 : vector<2x16xf32>
    %1057 = arith.mulf %1049, %1025 : vector<2x16xf32>
    %1058 = arith.addf %1056, %1057 : vector<2x16xf32>
    %c4_425 = arith.constant 4 : index
    %c0_426 = arith.constant 0 : index
    %1059 = vector.load %arg10[%c4_425, %c0_426] : memref<16x16xf32, #tpu.memory_space<vmem>>, vector<2x16xf32>
    tpu.vector_store %arg10[%c4_425, %c0_426], %1058 {strides = array<i32>} : memref<16x16xf32, #tpu.memory_space<vmem>>, vector<2x16xf32>,
    %cst_427 = arith.constant dense<0.000000e+00> : vector<2x16xf32>
    %1060 = tpu.matmul %1058, %958, %cst_427 {dimension_numbers = #tpu.dot_dimension_numbers<[1], [0], [0], [1], [0, 0, 1, 1], [], []>} : vector<2x16xf32>, vector<16x16xf32>, vector<2x16xf32> -> vector<2x16xf32>
    %1061 = vector.broadcast %964 : vector<1x16xf32> to vector<2x16xf32>
    %1062 = arith.addf %1060, %1061 : vector<2x16xf32>
    %cst_428 = arith.constant dense<0.000000e+00> : vector<2x16xf32>
    %1063 = tpu.matmul %1058, %960, %cst_428 {dimension_numbers = #tpu.dot_dimension_numbers<[1], [0], [0], [1], [0, 0, 1, 1], [], []>} : vector<2x16xf32>, vector<16x16xf32>, vector<2x16xf32> -> vector<2x16xf32>
    %1064 = vector.broadcast %966 : vector<1x16xf32> to vector<2x16xf32>
    %1065 = arith.addf %1063, %1064 : vector<2x16xf32>
    %cst_429 = arith.constant dense<0.000000e+00> : vector<2x16xf32>
    %1066 = tpu.matmul %1058, %962, %cst_429 {dimension_numbers = #tpu.dot_dimension_numbers<[1], [0], [0], [1], [0, 0, 1, 1], [], []>} : vector<2x16xf32>, vector<16x16xf32>, vector<2x16xf32> -> vector<2x16xf32>
    %1067 = vector.broadcast %968 : vector<1x16xf32> to vector<2x16xf32>
    %1068 = arith.addf %1066, %1067 : vector<2x16xf32>
    %1069 = vector.extract_strided_slice %942 {offsets = [6, 0], sizes = [2, 16], strides = [1, 1]} : vector<16x16xf32> to vector<2x16xf32>
    %1070 = arith.addf %1069, %1062 : vector<2x16xf32>
    %1071 = arith.negf %1070 : vector<2x16xf32>
    %1072 = math.exp %1071 : vector<2x16xf32>
    %cst_430 = arith.constant 1.000000e+00 : f32
    %1073 = vector.broadcast %cst_430 : f32 to vector<2x16xf32>
    %1074 = arith.addf %1073, %1072 : vector<2x16xf32>
    %1075 = arith.divf %1073, %1074 : vector<2x16xf32>
    %1076 = vector.extract_strided_slice %949 {offsets = [6, 0], sizes = [2, 16], strides = [1, 1]} : vector<16x16xf32> to vector<2x16xf32>
    %1077 = arith.addf %1076, %1065 : vector<2x16xf32>
    %1078 = arith.negf %1077 : vector<2x16xf32>
    %1079 = math.exp %1078 : vector<2x16xf32>
    %cst_431 = arith.constant 1.000000e+00 : f32
    %1080 = vector.broadcast %cst_431 : f32 to vector<2x16xf32>
    %1081 = arith.addf %1080, %1079 : vector<2x16xf32>
    %1082 = arith.divf %1080, %1081 : vector<2x16xf32>
    %1083 = vector.extract_strided_slice %956 {offsets = [6, 0], sizes = [2, 16], strides = [1, 1]} : vector<16x16xf32> to vector<2x16xf32>
    %1084 = arith.mulf %1075, %1068 : vector<2x16xf32>
    %1085 = arith.addf %1083, %1084 : vector<2x16xf32>
    %1086 = math.tanh %1085 : vector<2x16xf32>
    %cst_432 = arith.constant 1.000000e+00 : f32
    %1087 = vector.broadcast %cst_432 : f32 to vector<2x16xf32>
    %1088 = arith.subf %1087, %1082 : vector<2x16xf32>
    %1089 = arith.mulf %1088, %1086 : vector<2x16xf32>
    %1090 = arith.mulf %1082, %1058 : vector<2x16xf32>
    %1091 = arith.addf %1089, %1090 : vector<2x16xf32>
    %c6_433 = arith.constant 6 : index
    %c0_434 = arith.constant 0 : index
    %1092 = vector.load %arg10[%c6_433, %c0_434] : memref<16x16xf32, #tpu.memory_space<vmem>>, vector<2x16xf32>
    tpu.vector_store %arg10[%c6_433, %c0_434], %1091 {strides = array<i32>} : memref<16x16xf32, #tpu.memory_space<vmem>>, vector<2x16xf32>,
    %cst_435 = arith.constant dense<0.000000e+00> : vector<2x16xf32>
    %1093 = tpu.matmul %1091, %958, %cst_435 {dimension_numbers = #tpu.dot_dimension_numbers<[1], [0], [0], [1], [0, 0, 1, 1], [], []>} : vector<2x16xf32>, vector<16x16xf32>, vector<2x16xf32> -> vector<2x16xf32>
    %1094 = vector.broadcast %964 : vector<1x16xf32> to vector<2x16xf32>
    %1095 = arith.addf %1093, %1094 : vector<2x16xf32>
    %cst_436 = arith.constant dense<0.000000e+00> : vector<2x16xf32>
    %1096 = tpu.matmul %1091, %960, %cst_436 {dimension_numbers = #tpu.dot_dimension_numbers<[1], [0], [0], [1], [0, 0, 1, 1], [], []>} : vector<2x16xf32>, vector<16x16xf32>, vector<2x16xf32> -> vector<2x16xf32>
    %1097 = vector.broadcast %966 : vector<1x16xf32> to vector<2x16xf32>
    %1098 = arith.addf %1096, %1097 : vector<2x16xf32>
    %cst_437 = arith.constant dense<0.000000e+00> : vector<2x16xf32>
    %1099 = tpu.matmul %1091, %962, %cst_437 {dimension_numbers = #tpu.dot_dimension_numbers<[1], [0], [0], [1], [0, 0, 1, 1], [], []>} : vector<2x16xf32>, vector<16x16xf32>, vector<2x16xf32> -> vector<2x16xf32>
    %1100 = vector.broadcast %968 : vector<1x16xf32> to vector<2x16xf32>
    %1101 = arith.addf %1099, %1100 : vector<2x16xf32>
    %1102 = vector.extract_strided_slice %942 {offsets = [8, 0], sizes = [2, 16], strides = [1, 1]} : vector<16x16xf32> to vector<2x16xf32>
    %1103 = arith.addf %1102, %1095 : vector<2x16xf32>
    %1104 = arith.negf %1103 : vector<2x16xf32>
    %1105 = math.exp %1104 : vector<2x16xf32>
    %cst_438 = arith.constant 1.000000e+00 : f32
    %1106 = vector.broadcast %cst_438 : f32 to vector<2x16xf32>
    %1107 = arith.addf %1106, %1105 : vector<2x16xf32>
    %1108 = arith.divf %1106, %1107 : vector<2x16xf32>
    %1109 = vector.extract_strided_slice %949 {offsets = [8, 0], sizes = [2, 16], strides = [1, 1]} : vector<16x16xf32> to vector<2x16xf32>
    %1110 = arith.addf %1109, %1098 : vector<2x16xf32>
    %1111 = arith.negf %1110 : vector<2x16xf32>
    %1112 = math.exp %1111 : vector<2x16xf32>
    %cst_439 = arith.constant 1.000000e+00 : f32
    %1113 = vector.broadcast %cst_439 : f32 to vector<2x16xf32>
    %1114 = arith.addf %1113, %1112 : vector<2x16xf32>
    %1115 = arith.divf %1113, %1114 : vector<2x16xf32>
    %1116 = vector.extract_strided_slice %956 {offsets = [8, 0], sizes = [2, 16], strides = [1, 1]} : vector<16x16xf32> to vector<2x16xf32>
    %1117 = arith.mulf %1108, %1101 : vector<2x16xf32>
    %1118 = arith.addf %1116, %1117 : vector<2x16xf32>
    %1119 = math.tanh %1118 : vector<2x16xf32>
    %cst_440 = arith.constant 1.000000e+00 : f32
    %1120 = vector.broadcast %cst_440 : f32 to vector<2x16xf32>
    %1121 = arith.subf %1120, %1115 : vector<2x16xf32>
    %1122 = arith.mulf %1121, %1119 : vector<2x16xf32>
    %1123 = arith.mulf %1115, %1091 : vector<2x16xf32>
    %1124 = arith.addf %1122, %1123 : vector<2x16xf32>
    %c8_441 = arith.constant 8 : index
    %c0_442 = arith.constant 0 : index
    %1125 = vector.load %arg10[%c8_441, %c0_442] : memref<16x16xf32, #tpu.memory_space<vmem>>, vector<2x16xf32>
    tpu.vector_store %arg10[%c8_441, %c0_442], %1124 {strides = array<i32>} : memref<16x16xf32, #tpu.memory_space<vmem>>, vector<2x16xf32>,
    %cst_443 = arith.constant dense<0.000000e+00> : vector<2x16xf32>
    %1126 = tpu.matmul %1124, %958, %cst_443 {dimension_numbers = #tpu.dot_dimension_numbers<[1], [0], [0], [1], [0, 0, 1, 1], [], []>} : vector<2x16xf32>, vector<16x16xf32>, vector<2x16xf32> -> vector<2x16xf32>
    %1127 = vector.broadcast %964 : vector<1x16xf32> to vector<2x16xf32>
    %1128 = arith.addf %1126, %1127 : vector<2x16xf32>
    %cst_444 = arith.constant dense<0.000000e+00> : vector<2x16xf32>
    %1129 = tpu.matmul %1124, %960, %cst_444 {dimension_numbers = #tpu.dot_dimension_numbers<[1], [0], [0], [1], [0, 0, 1, 1], [], []>} : vector<2x16xf32>, vector<16x16xf32>, vector<2x16xf32> -> vector<2x16xf32>
    %1130 = vector.broadcast %966 : vector<1x16xf32> to vector<2x16xf32>
    %1131 = arith.addf %1129, %1130 : vector<2x16xf32>
    %cst_445 = arith.constant dense<0.000000e+00> : vector<2x16xf32>
    %1132 = tpu.matmul %1124, %962, %cst_445 {dimension_numbers = #tpu.dot_dimension_numbers<[1], [0], [0], [1], [0, 0, 1, 1], [], []>} : vector<2x16xf32>, vector<16x16xf32>, vector<2x16xf32> -> vector<2x16xf32>
    %1133 = vector.broadcast %968 : vector<1x16xf32> to vector<2x16xf32>
    %1134 = arith.addf %1132, %1133 : vector<2x16xf32>
    %1135 = vector.extract_strided_slice %942 {offsets = [10, 0], sizes = [2, 16], strides = [1, 1]} : vector<16x16xf32> to vector<2x16xf32>
    %1136 = arith.addf %1135, %1128 : vector<2x16xf32>
    %1137 = arith.negf %1136 : vector<2x16xf32>
    %1138 = math.exp %1137 : vector<2x16xf32>
    %cst_446 = arith.constant 1.000000e+00 : f32
    %1139 = vector.broadcast %cst_446 : f32 to vector<2x16xf32>
    %1140 = arith.addf %1139, %1138 : vector<2x16xf32>
    %1141 = arith.divf %1139, %1140 : vector<2x16xf32>
    %1142 = vector.extract_strided_slice %949 {offsets = [10, 0], sizes = [2, 16], strides = [1, 1]} : vector<16x16xf32> to vector<2x16xf32>
    %1143 = arith.addf %1142, %1131 : vector<2x16xf32>
    %1144 = arith.negf %1143 : vector<2x16xf32>
    %1145 = math.exp %1144 : vector<2x16xf32>
    %cst_447 = arith.constant 1.000000e+00 : f32
    %1146 = vector.broadcast %cst_447 : f32 to vector<2x16xf32>
    %1147 = arith.addf %1146, %1145 : vector<2x16xf32>
    %1148 = arith.divf %1146, %1147 : vector<2x16xf32>
    %1149 = vector.extract_strided_slice %956 {offsets = [10, 0], sizes = [2, 16], strides = [1, 1]} : vector<16x16xf32> to vector<2x16xf32>
    %1150 = arith.mulf %1141, %1134 : vector<2x16xf32>
    %1151 = arith.addf %1149, %1150 : vector<2x16xf32>
    %1152 = math.tanh %1151 : vector<2x16xf32>
    %cst_448 = arith.constant 1.000000e+00 : f32
    %1153 = vector.broadcast %cst_448 : f32 to vector<2x16xf32>
    %1154 = arith.subf %1153, %1148 : vector<2x16xf32>
    %1155 = arith.mulf %1154, %1152 : vector<2x16xf32>
    %1156 = arith.mulf %1148, %1124 : vector<2x16xf32>
    %1157 = arith.addf %1155, %1156 : vector<2x16xf32>
    %c10_449 = arith.constant 10 : index
    %c0_450 = arith.constant 0 : index
    %1158 = vector.load %arg10[%c10_449, %c0_450] : memref<16x16xf32, #tpu.memory_space<vmem>>, vector<2x16xf32>
    tpu.vector_store %arg10[%c10_449, %c0_450], %1157 {strides = array<i32>} : memref<16x16xf32, #tpu.memory_space<vmem>>, vector<2x16xf32>,
    %cst_451 = arith.constant dense<0.000000e+00> : vector<2x16xf32>
    %1159 = tpu.matmul %1157, %958, %cst_451 {dimension_numbers = #tpu.dot_dimension_numbers<[1], [0], [0], [1], [0, 0, 1, 1], [], []>} : vector<2x16xf32>, vector<16x16xf32>, vector<2x16xf32> -> vector<2x16xf32>
    %1160 = vector.broadcast %964 : vector<1x16xf32> to vector<2x16xf32>
    %1161 = arith.addf %1159, %1160 : vector<2x16xf32>
    %cst_452 = arith.constant dense<0.000000e+00> : vector<2x16xf32>
    %1162 = tpu.matmul %1157, %960, %cst_452 {dimension_numbers = #tpu.dot_dimension_numbers<[1], [0], [0], [1], [0, 0, 1, 1], [], []>} : vector<2x16xf32>, vector<16x16xf32>, vector<2x16xf32> -> vector<2x16xf32>
    %1163 = vector.broadcast %966 : vector<1x16xf32> to vector<2x16xf32>
    %1164 = arith.addf %1162, %1163 : vector<2x16xf32>
    %cst_453 = arith.constant dense<0.000000e+00> : vector<2x16xf32>
    %1165 = tpu.matmul %1157, %962, %cst_453 {dimension_numbers = #tpu.dot_dimension_numbers<[1], [0], [0], [1], [0, 0, 1, 1], [], []>} : vector<2x16xf32>, vector<16x16xf32>, vector<2x16xf32> -> vector<2x16xf32>
    %1166 = vector.broadcast %968 : vector<1x16xf32> to vector<2x16xf32>
    %1167 = arith.addf %1165, %1166 : vector<2x16xf32>
    %1168 = vector.extract_strided_slice %942 {offsets = [12, 0], sizes = [2, 16], strides = [1, 1]} : vector<16x16xf32> to vector<2x16xf32>
    %1169 = arith.addf %1168, %1161 : vector<2x16xf32>
    %1170 = arith.negf %1169 : vector<2x16xf32>
    %1171 = math.exp %1170 : vector<2x16xf32>
    %cst_454 = arith.constant 1.000000e+00 : f32
    %1172 = vector.broadcast %cst_454 : f32 to vector<2x16xf32>
    %1173 = arith.addf %1172, %1171 : vector<2x16xf32>
    %1174 = arith.divf %1172, %1173 : vector<2x16xf32>
    %1175 = vector.extract_strided_slice %949 {offsets = [12, 0], sizes = [2, 16], strides = [1, 1]} : vector<16x16xf32> to vector<2x16xf32>
    %1176 = arith.addf %1175, %1164 : vector<2x16xf32>
    %1177 = arith.negf %1176 : vector<2x16xf32>
    %1178 = math.exp %1177 : vector<2x16xf32>
    %cst_455 = arith.constant 1.000000e+00 : f32
    %1179 = vector.broadcast %cst_455 : f32 to vector<2x16xf32>
    %1180 = arith.addf %1179, %1178 : vector<2x16xf32>
    %1181 = arith.divf %1179, %1180 : vector<2x16xf32>
    %1182 = vector.extract_strided_slice %956 {offsets = [12, 0], sizes = [2, 16], strides = [1, 1]} : vector<16x16xf32> to vector<2x16xf32>
    %1183 = arith.mulf %1174, %1167 : vector<2x16xf32>
    %1184 = arith.addf %1182, %1183 : vector<2x16xf32>
    %1185 = math.tanh %1184 : vector<2x16xf32>
    %cst_456 = arith.constant 1.000000e+00 : f32
    %1186 = vector.broadcast %cst_456 : f32 to vector<2x16xf32>
    %1187 = arith.subf %1186, %1181 : vector<2x16xf32>
    %1188 = arith.mulf %1187, %1185 : vector<2x16xf32>
    %1189 = arith.mulf %1181, %1157 : vector<2x16xf32>
    %1190 = arith.addf %1188, %1189 : vector<2x16xf32>
    %c12_457 = arith.constant 12 : index
    %c0_458 = arith.constant 0 : index
    %1191 = vector.load %arg10[%c12_457, %c0_458] : memref<16x16xf32, #tpu.memory_space<vmem>>, vector<2x16xf32>
    tpu.vector_store %arg10[%c12_457, %c0_458], %1190 {strides = array<i32>} : memref<16x16xf32, #tpu.memory_space<vmem>>, vector<2x16xf32>,
    %cst_459 = arith.constant dense<0.000000e+00> : vector<2x16xf32>
    %1192 = tpu.matmul %1190, %958, %cst_459 {dimension_numbers = #tpu.dot_dimension_numbers<[1], [0], [0], [1], [0, 0, 1, 1], [], []>} : vector<2x16xf32>, vector<16x16xf32>, vector<2x16xf32> -> vector<2x16xf32>
    %1193 = vector.broadcast %964 : vector<1x16xf32> to vector<2x16xf32>
    %1194 = arith.addf %1192, %1193 : vector<2x16xf32>
    %cst_460 = arith.constant dense<0.000000e+00> : vector<2x16xf32>
    %1195 = tpu.matmul %1190, %960, %cst_460 {dimension_numbers = #tpu.dot_dimension_numbers<[1], [0], [0], [1], [0, 0, 1, 1], [], []>} : vector<2x16xf32>, vector<16x16xf32>, vector<2x16xf32> -> vector<2x16xf32>
    %1196 = vector.broadcast %966 : vector<1x16xf32> to vector<2x16xf32>
    %1197 = arith.addf %1195, %1196 : vector<2x16xf32>
    %cst_461 = arith.constant dense<0.000000e+00> : vector<2x16xf32>
    %1198 = tpu.matmul %1190, %962, %cst_461 {dimension_numbers = #tpu.dot_dimension_numbers<[1], [0], [0], [1], [0, 0, 1, 1], [], []>} : vector<2x16xf32>, vector<16x16xf32>, vector<2x16xf32> -> vector<2x16xf32>
    %1199 = vector.broadcast %968 : vector<1x16xf32> to vector<2x16xf32>
    %1200 = arith.addf %1198, %1199 : vector<2x16xf32>
    %1201 = vector.extract_strided_slice %942 {offsets = [14, 0], sizes = [2, 16], strides = [1, 1]} : vector<16x16xf32> to vector<2x16xf32>
    %1202 = arith.addf %1201, %1194 : vector<2x16xf32>
    %1203 = arith.negf %1202 : vector<2x16xf32>
    %1204 = math.exp %1203 : vector<2x16xf32>
    %cst_462 = arith.constant 1.000000e+00 : f32
    %1205 = vector.broadcast %cst_462 : f32 to vector<2x16xf32>
    %1206 = arith.addf %1205, %1204 : vector<2x16xf32>
    %1207 = arith.divf %1205, %1206 : vector<2x16xf32>
    %1208 = vector.extract_strided_slice %949 {offsets = [14, 0], sizes = [2, 16], strides = [1, 1]} : vector<16x16xf32> to vector<2x16xf32>
    %1209 = arith.addf %1208, %1197 : vector<2x16xf32>
    %1210 = arith.negf %1209 : vector<2x16xf32>
    %1211 = math.exp %1210 : vector<2x16xf32>
    %cst_463 = arith.constant 1.000000e+00 : f32
    %1212 = vector.broadcast %cst_463 : f32 to vector<2x16xf32>
    %1213 = arith.addf %1212, %1211 : vector<2x16xf32>
    %1214 = arith.divf %1212, %1213 : vector<2x16xf32>
    %1215 = vector.extract_strided_slice %956 {offsets = [14, 0], sizes = [2, 16], strides = [1, 1]} : vector<16x16xf32> to vector<2x16xf32>
    %1216 = arith.mulf %1207, %1200 : vector<2x16xf32>
    %1217 = arith.addf %1215, %1216 : vector<2x16xf32>
    %1218 = math.tanh %1217 : vector<2x16xf32>
    %cst_464 = arith.constant 1.000000e+00 : f32
    %1219 = vector.broadcast %cst_464 : f32 to vector<2x16xf32>
    %1220 = arith.subf %1219, %1214 : vector<2x16xf32>
    %1221 = arith.mulf %1220, %1218 : vector<2x16xf32>
    %1222 = arith.mulf %1214, %1190 : vector<2x16xf32>
    %1223 = arith.addf %1221, %1222 : vector<2x16xf32>
    %c14_465 = arith.constant 14 : index
    %c0_466 = arith.constant 0 : index
    %1224 = vector.load %arg10[%c14_465, %c0_466] : memref<16x16xf32, #tpu.memory_space<vmem>>, vector<2x16xf32>
    tpu.vector_store %arg10[%c14_465, %c0_466], %1223 {strides = array<i32>} : memref<16x16xf32, #tpu.memory_space<vmem>>, vector<2x16xf32>,
    %c0_467 = arith.constant 0 : index
    %c0_468 = arith.constant 0 : index
    %1225 = vector.load %arg10[%c0_467, %c0_468] : memref<16x16xf32, #tpu.memory_space<vmem>>, vector<2x16xf32>
    %c2_469 = arith.constant 2 : index
    %c0_470 = arith.constant 0 : index
    %1226 = vector.load %arg10[%c2_469, %c0_470] : memref<16x16xf32, #tpu.memory_space<vmem>>, vector<2x16xf32>
    %c4_471 = arith.constant 4 : index
    %c0_472 = arith.constant 0 : index
    %1227 = vector.load %arg10[%c4_471, %c0_472] : memref<16x16xf32, #tpu.memory_space<vmem>>, vector<2x16xf32>
    %c6_473 = arith.constant 6 : index
    %c0_474 = arith.constant 0 : index
    %1228 = vector.load %arg10[%c6_473, %c0_474] : memref<16x16xf32, #tpu.memory_space<vmem>>, vector<2x16xf32>
    %c8_475 = arith.constant 8 : index
    %c0_476 = arith.constant 0 : index
    %1229 = vector.load %arg10[%c8_475, %c0_476] : memref<16x16xf32, #tpu.memory_space<vmem>>, vector<2x16xf32>
    %c10_477 = arith.constant 10 : index
    %c0_478 = arith.constant 0 : index
    %1230 = vector.load %arg10[%c10_477, %c0_478] : memref<16x16xf32, #tpu.memory_space<vmem>>, vector<2x16xf32>
    %c12_479 = arith.constant 12 : index
    %c0_480 = arith.constant 0 : index
    %1231 = vector.load %arg10[%c12_479, %c0_480] : memref<16x16xf32, #tpu.memory_space<vmem>>, vector<2x16xf32>
    %c14_481 = arith.constant 14 : index
    %c0_482 = arith.constant 0 : index
    %1232 = vector.load %arg10[%c14_481, %c0_482] : memref<16x16xf32, #tpu.memory_space<vmem>>, vector<2x16xf32>
    %1233 = tpu.concatenate %1225, %1226, %1227, %1228, %1229, %1230, %1231, %1232 in 1 : vector<2x16xf32>, vector<2x16xf32>, vector<2x16xf32>, vector<2x16xf32>, vector<2x16xf32>, vector<2x16xf32>, vector<2x16xf32>, vector<2x16xf32> -> vector<2x128xf32>
    %c0_483 = arith.constant 0 : index
    %c0_484 = arith.constant 0 : index
    %1234 = vector.load %arg8[%c0_483, %c0_484] : memref<2x128xf32, #tpu.memory_space<vmem>>, vector<2x128xf32>
    tpu.vector_store %arg8[%c0_483, %c0_484], %1233 {strides = array<i32>} : memref<2x128xf32, #tpu.memory_space<vmem>>, vector<2x128xf32>,
    %c0_485 = arith.constant 0 : index
    %c0_486 = arith.constant 0 : index
    %c0_487 = arith.constant 0 : index
    %1235 = vector.load %arg7[%c0_485, %c0_486, %c0_487] : memref<16x1x128xf32, #tpu.memory_space<vmem>>, vector<16x1x128xf32>
    %1236 = vector.shape_cast %1233 : vector<2x128xf32> to vector<1x2x128xf32>
    %1237 = vector.broadcast %1236 : vector<1x2x128xf32> to vector<16x2x128xf32>
    %1238 = vector.broadcast %1235 : vector<16x1x128xf32> to vector<16x2x128xf32>
    %1239 = arith.subf %1237, %1238 : vector<16x2x128xf32>
    %1240 = math.absf %1239 : vector<16x2x128xf32>
    %cst_488 = arith.constant dense<0x7F800000> : vector<2x128xf32>
    %1241 = vector.multi_reduction <minimumf>, %1240, %cst_488 [0] : vector<16x2x128xf32> to vector<2x128xf32>
    %1242 = tpu.iota {dimensions = array<i32: 0>} : vector<16x2x128xi32>
    %1243 = arith.sitofp %1242 : vector<16x2x128xi32> to vector<16x2x128xf32>
    %1244 = vector.shape_cast %1241 : vector<2x128xf32> to vector<1x2x128xf32>
    %1245 = vector.broadcast %1244 : vector<1x2x128xf32> to vector<16x2x128xf32>
    %1246 = arith.cmpf ole, %1240, %1245 : vector<16x2x128xf32>
    %cst_489 = arith.constant 1.600000e+01 : f32
    %1247 = vector.broadcast %cst_489 : f32 to vector<16x2x128xf32>
    %1248 = arith.select %1246, %1243, %1247 : vector<16x2x128xi1>, vector<16x2x128xf32>
    %cst_490 = arith.constant dense<0x7F800000> : vector<2x128xf32>
    %1249 = vector.multi_reduction <minimumf>, %1248, %cst_490 [0] : vector<16x2x128xf32> to vector<2x128xf32>
    %c0_491 = arith.constant 0 : index
    %c0_492 = arith.constant 0 : index
    %1250 = vector.load %arg9[%c0_491, %c0_492] : memref<2x128xf32, #tpu.memory_space<vmem>>, vector<2x128xf32>
    tpu.vector_store %arg9[%c0_491, %c0_492], %1249 {strides = array<i32>} : memref<2x128xf32, #tpu.memory_space<vmem>>, vector<2x128xf32>,
    return
  }
}

</mosaic_0001>

<bundles_post_ra>
// kernel: tpu_custom_call.1
= control target key start
LH: loop header
LB: loop body
LE: loop exit
PB: predicated region body
PF: predicated region fallthrough
CT: control target
= control target key end

     0   :  { %15 = vsyncpa [#allocation4], 0  ;;  %s12860_s0 = inlined_call_operand.hbm [shape: f32[2,32], index: 0, kind: input, shape index: {}]   ;;  %s12861_s1 = inlined_call_operand.vmem [shape: f32[8,32,16], index: 1, kind: input, shape index: {}]   ;;  %s12862_s2 = inlined_call_operand.hbm [shape: f32[8,1,16], index: 2, kind: input, shape index: {}]   ;;  %s12863_s3 = inlined_call_operand.vmem [shape: f32[12,16,16], index: 3, kind: input, shape index: {}]   ;;  %s12864_s4 = inlined_call_operand.vmem [shape: f32[12,16,16], index: 4, kind: input, shape index: {}]   ;;  %s12865_s5 = inlined_call_operand.hbm [shape: f32[12,1,16], index: 5, kind: input, shape index: {}]   ;;  %s12866_s6 = inlined_call_operand.hbm [shape: f32[12,1,16], index: 6, kind: input, shape index: {}]   ;;  %s12867_s7 = inlined_call_operand.vmem [shape: f32[16,1,128], index: 7, kind: input, shape index: {}]   ;;  %s12868_s8 = inlined_call_operand.hbm [shape: f32[2,128], index: 8, kind: output, shape index: {0}]   ;;  %s12869_s9 = inlined_call_operand.hbm [shape: f32[2,128], index: 9, kind: output, shape index: {1}]  }
   0x1   :  { %16 = vsyncpa [#allocation7], 0 }
   0x2   :  { %17 = vsyncpa [#allocation10], 0 }
   0x3   :  { %18 = vsyncpa [#allocation5], 0 }
   0x4   :  { %19 = vsyncpa [#allocation13], 0  ;;  %s11470_s30 = smov [#allocation6]   ;;  %s11328_s13 = scalar_lea.hbm %s12862_s2, 128 }
   0x5   :  { %s37_s10 = sshll.u32 %s11470_s30, 4  ;;  %p11329_p0 = scmp.ne.s32.totalorder %s12862_s2, %s11328_s13  ;;  %s38_s10 = int_to_ptr.vmem [resolvable:$true] %s37_s10 }
   0x6   :  { %p11332_p1 = scmp.lt.u32.totalorder %s11328_s13, %s12862_s2 }
   0x8   :  { %p11334_p2 = pnand %p11332_p1, %p11329_p0 }
   0xa   :  { %11337 = shalt.err (!%p11334_p2)
}
   0xb   :  { %s11338_s18 = scalar_lea.vmem %s38_s10, 128  ;;  %p11343_p4 = scmp.lt.s32.totalorder %s38_s10, %s38_s10 }
   0xc   :  { %p11339_p3 = scmp.ne.s32.totalorder %s38_s10, %s11338_s18  ;;  %p11344_p5 = scmp.lt.s32.totalorder %s11338_s18, %s11338_s18 }
   0xe   :  { %p11345_p6 = por %p11344_p5, %p11343_p4 }
  0x10   :  { %p11346_p7 = pnand %p11345_p6, %p11339_p3 }
  0x12   :  { %11349 = shalt.err (!%p11346_p7)
}
  0x13   :  { %s11471_s19 = smov 16   ;;  %s11472_s20 = smov 1  }
  0x14   :  { %43 = dma.hbm_to_vmem [thread:$0]  %s12862_s2, 128, %s38_s10, [#allocation7], %s11471_s19, %s11471_s19, %s11472_s20  }
  0x15   :  { %s11473_s23 = smov [#allocation3]   ;;  %s11474_s25 = smov [#allocation8]  }
  0x16   :  { %s26_s24 = sshll.u32 %s11473_s23, 4  ;;  %s53_s26 = sshll.u32 %s11474_s25, 4  ;;  %s27_s24 = int_to_ptr.vmem [resolvable:$true] %s26_s24  ;;  %s54_s26 = int_to_ptr.vmem [resolvable:$true] %s53_s26 }
  0x17   :  { %s11350_s29 = scalar_lea.hbm %s12860_s0, 32 }
  0x18   :  { %p11351_p8 = scmp.ne.s32.totalorder %s12860_s0, %s11350_s29  ;;  %p11354_p9 = scmp.lt.u32.totalorder %s11350_s29, %s12860_s0 }
  0x1a   :  { %p11356_p10 = pnand %p11354_p9, %p11351_p8 }
  0x1c   :  { %11359 = shalt.err (!%p11356_p10)
}
  0x1d   :  { %s11360_s2 = scalar_lea.vmem %s27_s24, 32  ;;  %p11365_p12 = scmp.lt.s32.totalorder %s27_s24, %s27_s24 }
  0x1e   :  { %p11361_p11 = scmp.ne.s32.totalorder %s27_s24, %s11360_s2  ;;  %p11366_p13 = scmp.lt.s32.totalorder %s11360_s2, %s11360_s2 }
  0x20   :  { %p11367_p0 = por %p11366_p13, %p11365_p12 }
  0x22   :  { %p11368_p1 = pnand %p11367_p0, %p11361_p11 }
  0x24   :  { %11371 = shalt.err (!%p11368_p1)
}
  0x25   :  { %29 = dma.hbm_to_vmem [thread:$0]  %s12860_s0, 32, %s27_s24, [#allocation4]  }
  0x26   :  { %s11372_s17 = scalar_lea.hbm %s12865_s5, 192 }
  0x27   :  { %p11373_p2 = scmp.ne.s32.totalorder %s12865_s5, %s11372_s17  ;;  %p11376_p3 = scmp.lt.u32.totalorder %s11372_s17, %s12865_s5 }
  0x29   :  { %p11378_p4 = pnand %p11376_p3, %p11373_p2 }
  0x2b   :  { %11381 = shalt.err (!%p11378_p4)
}
  0x2c   :  { %s11382_s25 = scalar_lea.vmem %s54_s26, 192  ;;  %p11387_p6 = scmp.lt.s32.totalorder %s54_s26, %s54_s26 }
  0x2d   :  { %p11383_p5 = scmp.ne.s32.totalorder %s54_s26, %s11382_s25  ;;  %p11388_p7 = scmp.lt.s32.totalorder %s11382_s25, %s11382_s25 }
  0x2f   :  { %p11389_p8 = por %p11388_p7, %p11387_p6 }
  0x31   :  { %p11390_p9 = pnand %p11389_p8, %p11383_p5 }
  0x33   :  { %11393 = shalt.err (!%p11390_p9)
}
  0x34   :  { %59 = dma.hbm_to_vmem [thread:$0]  %s12865_s5, 192, %s54_s26, [#allocation7], %s11471_s19, %s11471_s19, %s11472_s20  }
  0x35   :  { %s11475_s27 = smov [#allocation9]   ;;  %s11394_s11 = scalar_lea.hbm %s12866_s6, 192 }
  0x36   :  { %s65_s28 = sshll.u32 %s11475_s27, 4  ;;  %p11395_p10 = scmp.ne.s32.totalorder %s12866_s6, %s11394_s11  ;;  %s66_s28 = int_to_ptr.vmem [resolvable:$true] %s65_s28 }
  0x37   :  { %p11398_p11 = scmp.lt.u32.totalorder %s11394_s11, %s12866_s6 }
  0x39   :  { %p11400_p12 = pnand %p11398_p11, %p11395_p10 }
  0x3b   :  { %11403 = shalt.err (!%p11400_p12)
}
  0x3c   :  { %s11404_s14 = scalar_lea.vmem %s66_s28, 192  ;;  %p11409_p0 = scmp.lt.s32.totalorder %s66_s28, %s66_s28 }
  0x3d   :  { %p11405_p13 = scmp.ne.s32.totalorder %s66_s28, %s11404_s14  ;;  %p11410_p1 = scmp.lt.s32.totalorder %s11404_s14, %s11404_s14 }
  0x3f   :  { %p11411_p2 = por %p11410_p1, %p11409_p0 }
  0x41   :  { %p11412_p3 = pnand %p11411_p2, %p11405_p13 }
  0x43   :  { %11415 = shalt.err (!%p11412_p3)
}
  0x44   :  { %71 = dma.hbm_to_vmem [thread:$0]  %s12866_s6, 192, %s66_s28, [#allocation10], %s11471_s19, %s11471_s19, %s11472_s20  }
  0x45   :  { %11460 = dma.done.wait [#allocation4], 32  }
  0x46   :  { %11461 = vsyncadd [#allocation4], 4294967264 }
  0x47   :  { %11462 = dma.done.wait [#allocation7], 320  }
  0x48   :  { %11463 = vsyncadd [#allocation7], 4294966976 }
  0x49   :  { %11464 = dma.done.wait [#allocation10], 192  }
  0x4a   :  { %11465 = vsyncadd [#allocation10], 4294967104  ;;  %v11476_v0 = vmov 0.0|0.0   ;;  %vm11477_vm0 = vmmov 0   ;;  %v11478_v1 = vmov 0.0   ;;  %v87_v2 = vld [vmem:[%s12861_s1] sm:$0xff] }
  0x4b   :  { %10642 = vmatprep.subr.bf16.mxu0 %v11476_v0  ;;  %10648 = vmatprep.subr.bf16.mxu1 %v11476_v0  ;;  %v88_v3 = vld [vmem:[%s12861_s1 + $0x8] sm:$0xff]  ;;  %v9244_v4 = vld [vmem:[%s12861_s1 + $0x20] sm:$0xff]  ;;  %v89_v7 = vld [vmem:[%s12861_s1 + $0x10] sm:$0xff]  ;;  %vm98_vm1 = vcmask 261120   ;;  %vm172_vm2 = vcmask 123904   ;;  %vm773_vm3 = vcmask 130048  }
  0x4c   :  { %9890 = vmatprep.mubr.msk.f32.mxu0 %vm11477_vm0, %v11478_v1  ;;  %9901 = vmatprep.mubr.msk.f32.mxu1 %vm11477_vm0, %v11478_v1  ;;  %v10643_v5 = vpack.c.bf16 %v88_v3, %v87_v2  ;;  %v9245_v6 = vld [vmem:[%s12861_s1 + $0x28] sm:$0xff]  ;;  %v90_v8 = vld [vmem:[%s12861_s1 + $0x18] sm:$0xff]  ;;  %v9246_v10 = vld [vmem:[%s12861_s1 + $0x30] sm:$0xff]  ;;  %vm1323_vm4 = vcmask 125954   ;;  %vm1571_vm5 = vcmask 128004   ;;  %vm1819_vm6 = vcmask 130054  }
  0x4d   :  { %v10649_v9 = vpack.c.bf16 %v9245_v6, %v9244_v4  ;;  %v9247_v11 = vld [vmem:[%s12861_s1 + $0x38] sm:$0xff]  ;;  %v10646_v12 = vpack.c.bf16 %v90_v8, %v89_v7  ;;  %v9250_v14 = vld [vmem:[%s12861_s1 + $0x40] sm:$0xff]  ;;  %v9251_v15 = vld [vmem:[%s12861_s1 + $0x48] sm:$0xff]  ;;  %s11481_s24 = smov 64   ;;  %s11482_s27 = smov 80   ;;  %vm8944_vm7 = vcmask 392192  }
  0x4e   :  { %10644 = vmatpush3.bf16.msra.mxu0 %v10643_v5  ;;  %v10652_v13 = vpack.c.bf16 %v9247_v11, %v9246_v10  ;;  %v9256_v16 = vld [vmem:[%s12861_s1 + $0x60] sm:$0xff]  ;;  %v9257_v17 = vld [vmem:[%s12861_s1 + $0x68] sm:$0xff]  ;;  %v11639_v18 = vld [vmem:[#allocation3] sm:$0x3]  ;;  %v10655_v19 = vpack.c.bf16 %v9251_v15, %v9250_v14  ;;  %s11483_s28 = smov 96   ;;  %s11484_s29 = smov 112  }
  0x4f   :  { %10650 = vmatpush3.bf16.msra.mxu1 %v10649_v9  ;;  %10645 = vmatprep.subr.bf16.mxu0 %v11476_v0  ;;  %v10661_v20 = vpack.c.bf16 %v9257_v17, %v9256_v16  ;;  %v9252_v21 = vld [vmem:[%s12861_s1 + $0x50] sm:$0xff]  ;;  %v9253_v22 = vld [vmem:[%s12861_s1 + $0x58] sm:$0xff]  ;;  %v9262_v27 = vld [vmem:[%s12861_s1 + $0x80] sm:$0xff]  ;;  %vm8946_vm8 = vcmask 523264   ;;  %vm8948_vm9 = vcmask 654336   ;;  %vm8950_vm10 = vcmask 785408  }
  0x50   :  { %10651 = vmatprep.subr.bf16.mxu1 %v11476_v0  ;;  %v9258_v23 = vld [vmem:[%s12861_s1 + $0x70] sm:$0xff]  ;;  %v9259_v24 = vld [vmem:[%s12861_s1 + $0x78] sm:$0xff]  ;;  %v10658_v25 = vpack.c.bf16 %v9253_v22, %v9252_v21  ;;  %v9263_v28 = vld [vmem:[%s12861_s1 + $0x88] sm:$0xff]  ;;  %s11485_s30 = smov [#allocation11]   ;;  %vm8952_vm11 = vcmask 916480  }
  0x51   :  { %v10664_v26 = vpack.c.bf16 %v9259_v24, %v9258_v23  ;;  %v9268_v29 = vld [vmem:[%s12861_s1 + $0xa0] sm:$0xff]  ;;  %v9269_v30 = vld [vmem:[%s12861_s1 + $0xa8] sm:$0xff]  ;;  %v10667_v31 = vpack.c.bf16 %v9263_v28, %v9262_v27  ;;  %v9264_v33 = vld [vmem:[%s12861_s1 + $0x90] sm:$0xff] }
  0x52   :  { %10647 = vmatpush3.bf16.msra.mxu0 %v10646_v12  ;;  %v10673_v32 = vpack.c.bf16 %v9269_v30, %v9268_v29  ;;  %v9265_v34 = vld [vmem:[%s12861_s1 + $0x98] sm:$0xff]  ;;  %v9270_v35 = vld [vmem:[%s12861_s1 + $0xb0] sm:$0xff]  ;;  %v9274_v39 = vld [vmem:[%s12861_s1 + $0xc0] sm:$0xff] }
  0x53   :  { %10653 = vmatpush3.bf16.msra.mxu1 %v10652_v13  ;;  %10654 = vmatprep.subr.bf16.mxu0 %v11476_v0  ;;  %v9271_v36 = vld [vmem:[%s12861_s1 + $0xb8] sm:$0xff]  ;;  %v10670_v37 = vpack.c.bf16 %v9265_v34, %v9264_v33  ;;  %v9275_v40 = vld [vmem:[%s12861_s1 + $0xc8] sm:$0xff]  ;;  %v9280_v41 = vld [vmem:[%s12861_s1 + $0xe0] sm:$0xff] }
  0x54   :  { %10660 = vmatprep.subr.bf16.mxu1 %v11476_v0  ;;  %v10676_v38 = vpack.c.bf16 %v9271_v36, %v9270_v35  ;;  %v9281_v42 = vld [vmem:[%s12861_s1 + $0xe8] sm:$0xff]  ;;  %v10679_v43 = vpack.c.bf16 %v9275_v40, %v9274_v39  ;;  %v9276_v45 = vld [vmem:[%s12861_s1 + $0xd0] sm:$0xff]  ;;  %v9277_v46 = vld [vmem:[%s12861_s1 + $0xd8] sm:$0xff] }
  0x55   :  { %9891 = vmatmul.mubr.msk.f32.vlgmr.msra.gmra.mrb[0].mxu0 %vm98_vm1, %v11639_v18  ;;  %v10685_v44 = vpack.c.bf16 %v9281_v42, %v9280_v41  ;;  %v9282_v47 = vld [vmem:[%s12861_s1 + $0xf0] sm:$0xff]  ;;  %v9283_v48 = vld [vmem:[%s12861_s1 + $0xf8] sm:$0xff]  ;;  %v10682_v49 = vpack.c.bf16 %v9277_v46, %v9276_v45  ;;  %v764_v51 = vld [vmem:[%s12863_s3] sm:$0xff]  ;;  %s9217_s1 = sshll.u32 %s11485_s30, 4  ;;  %s9218_s1 = int_to_ptr.vmem [resolvable:$true] %s9217_s1 }
  0x56   :  { %9902 = vmatmul.mubr.msk.f32.vlgmr.msra.gmra.mrb[0].mxu1 %vm98_vm1, %v11639_v18  ;;  %10656 = vmatpush3.bf16.msra.mxu0 %v10655_v19  ;;  %v10688_v50 = vpack.c.bf16 %v9283_v48, %v9282_v47  ;;  %v765_v52 = vld [vmem:[%s12863_s3 + $0x8] sm:$0xff]  ;;  %v9289_v53 = vld [vmem:[%s12863_s3 + $0x10] sm:$0xff]  ;;  %v9290_v55 = vld [vmem:[%s12863_s3 + $0x18] sm:$0xff]  ;;  %s11416_s12 = scalar_lea.vmem %s9218_s1, 32  ;;  %p11421_p5 = scmp.lt.s32.totalorder %s9218_s1, %s9218_s1 }
  0x57   :  { %10662 = vmatpush3.bf16.msra.mxu1 %v10661_v20  ;;  %10657 = vmatprep.subr.bf16.mxu0 %v11476_v0  ;;  %v10690_v54 = vpack.c.bf16 %v765_v52, %v764_v51  ;;  %v10694_v56 = vpack.c.bf16 %v9290_v55, %v9289_v53  ;;  %v9294_v57 = vld [vmem:[%s12863_s3 + $0x20] sm:$0xff]  ;;  %v9295_v58 = vld [vmem:[%s12863_s3 + $0x28] sm:$0xff]  ;;  %v9242_v60 = vld [vmem:[#allocation6] ss:$0 sm:$0xff]  ;;  %p11417_p4 = scmp.ne.s32.totalorder %s9218_s1, %s11416_s12  ;;  %p11422_p6 = scmp.lt.s32.totalorder %s11416_s12, %s11416_s12 }
  0x58   :  { %10663 = vmatprep.subr.bf16.mxu1 %v11476_v0  ;;  %9912 = vmatprep.mubr.msk.f32.mxu0 %vm11477_vm0, %v11478_v1  ;;  %v10698_v59 = vpack.c.bf16 %v9295_v58, %v9294_v57  ;;  %v9248_v61 = vld [vmem:[#allocation6 + $0x1] ss:$0 sm:$0xff]  ;;  %v9254_v6 = vld [vmem:[#allocation6 + $0x2] ss:$0 sm:$0xff]  ;;  %v9260_v7 = vld [vmem:[#allocation6 + $0x3] ss:$0 sm:$0xff] }
  0x59   :  { %9923 = vmatprep.mubr.msk.f32.mxu1 %vm11477_vm0, %v11478_v1  ;;  %v9266_v14 = vld [vmem:[#allocation6 + $0x4] ss:$0 sm:$0xff]  ;;  %v9272_v15 = vld [vmem:[#allocation6 + $0x5] ss:$0 sm:$0xff]  ;;  %v9278_v23 = vld [vmem:[#allocation6 + $0x6] ss:$0 sm:$0xff]  ;;  %p11423_p7 = por %p11422_p6, %p11421_p5 }
  0x5a   :  { %10659 = vmatpush3.bf16.msra.mxu0 %v10658_v25  ;;  %v9284_v24 = vld [vmem:[#allocation6 + $0x7] ss:$0 sm:$0xff]  ;;  %v1028_v33 = vld [vmem:[%s12864_s4 + $0x8] sm:$0xff]  ;;  %v9299_v34 = vld [vmem:[%s12864_s4 + $0x10] sm:$0xff] }
  0x5b   :  { %10665 = vmatpush3.bf16.msra.mxu1 %v10664_v26  ;;  %10666 = vmatprep.subr.bf16.mxu0 %v11476_v0  ;;  %v9300_v36 = vld [vmem:[%s12864_s4 + $0x18] sm:$0xff]  ;;  %v11803_v45 = vld [vmem:[#allocation9] ss:$0 sm:$0xff]  ;;  %v11811_v51 = vld [vmem:[#allocation9 + $0x1] ss:$0 sm:$0xff]  ;;  %p11424_p8 = pnand %p11423_p7, %p11417_p4 }
  0x5c   :  { %10672 = vmatprep.subr.bf16.mxu1 %v11476_v0  ;;  %v9291_v39 = vld [vmem:[#allocation8 + $0x1] ss:$0 sm:$0xff]  ;;  %v9296_v48 = vld [vmem:[#allocation8 + $0x2] ss:$0 sm:$0xff] }
  0x5d   :  { %9913 = vmatmul.mubr.msk.f32.vlgmr.msra.gmra.mrb[2].mxu0 %vm98_vm1, %v11639_v18 }
  0x5e   :  { %9924 = vmatmul.mubr.msk.f32.vlgmr.msra.gmra.mrb[2].mxu1 %vm98_vm1, %v11639_v18  ;;  %10668 = vmatpush3.bf16.msra.mxu0 %v10667_v31 }
  0x5f   :  { %10674 = vmatpush3.bf16.msra.mxu1 %v10673_v32  ;;  %10669 = vmatprep.subr.bf16.mxu0 %v11476_v0  ;;  %v1027_v32 = vld [vmem:[%s12864_s4] sm:$0xff] }
  0x60   :  { %10675 = vmatprep.subr.bf16.mxu1 %v11476_v0  ;;  %9934 = vmatprep.mubr.msk.f32.mxu0 %vm11477_vm0, %v11478_v1  ;;  %v11788_v35 = vpack.c.bf16 %v1028_v33, %v1027_v32 }
  0x61   :  { %9945 = vmatprep.mubr.msk.f32.mxu1 %vm11477_vm0, %v11478_v1 }
  0x62   :  { %10671 = vmatpush3.bf16.msra.mxu0 %v10670_v37  ;;  %v11793_v37 = vpack.c.bf16 %v9300_v36, %v9299_v34 }
  0x63   :  { %10677 = vmatpush3.bf16.msra.mxu1 %v10676_v38  ;;  %10678 = vmatprep.subr.bf16.mxu0 %v11476_v0  ;;  %v9286_v38 = vld [vmem:[#allocation8] ss:$0 sm:$0xff] }
  0x64   :  { %10684 = vmatprep.subr.bf16.mxu1 %v11476_v0 }
  0x65   :  { %9935 = vmatmul.mubr.msk.f32.vlgmr.msra.gmra.mrb[4].mxu0 %vm98_vm1, %v11639_v18 }
  0x66   :  { %9946 = vmatmul.mubr.msk.f32.vlgmr.msra.gmra.mrb[4].mxu1 %vm98_vm1, %v11639_v18  ;;  %10680 = vmatpush3.bf16.msra.mxu0 %v10679_v43 }
  0x67   :  { %10686 = vmatpush3.bf16.msra.mxu1 %v10685_v44  ;;  %10681 = vmatprep.subr.bf16.mxu0 %v11476_v0 }
  0x68   :  { %10687 = vmatprep.subr.bf16.mxu1 %v11476_v0  ;;  %9956 = vmatprep.mubr.msk.f32.mxu0 %vm11477_vm0, %v11478_v1 }
  0x69   :  { %9967 = vmatprep.mubr.msk.f32.mxu1 %vm11477_vm0, %v11478_v1 }
  0x6a   :  { %10683 = vmatpush3.bf16.msra.mxu0 %v10682_v49 }
  0x6b   :  { %10689 = vmatpush3.bf16.msra.mxu1 %v10688_v50  ;;  %10691 = vmatprep.subr.bf16.mxu0 %v10690_v54 }
  0x6c   :  { %10695 = vmatprep.subr.bf16.mxu1 %v10694_v56 }
  0x6d   :  { %9957 = vmatmul.mubr.msk.f32.vlgmr.msra.gmra.mrb[6].mxu0 %vm98_vm1, %v11639_v18 }
  0x6e   :  { %9968 = vmatmul.mubr.msk.f32.vlgmr.msra.gmra.mrb[6].mxu1 %vm98_vm1, %v11639_v18  ;;  %10693 = vmatpush3.bf16.msra.mxu0 %v10690_v54 }
  0x6f   :  { %10697 = vmatpush3.bf16.msra.mxu1 %v10694_v56  ;;  %10699 = vmatprep.subr.bf16.mxu0 %v10698_v59 }
  0x70   :  { %10702 = vmatprep.subr.bf16.mxu1 %v11476_v0 }
 0x128   :  { %v168_v62 = vpop.f32.mrb[0].mxu0 }
 0x129   :  { %v169_v63 = vadd.f32 %v9242_v60, %v168_v62  ;;  %v253_v2 = vpop.f32.mrb[0].mxu1  ;;  %v9892_v3 = vpop.f32.mrb[1].mxu0  ;;  %v11817_v62 = vld [vmem:[#allocation9 + $0x2] ss:$0 sm:$0xff] }
 0x12a   :  { %v254_v4 = vadd.f32 %v9248_v61, %v253_v2  ;;  %v9903_v5 = vpop.f32.mrb[1].mxu1 }
 0x12b   :  { %173 = vst.msk [vmem:[#allocation2] sm:$0x3] %vm172_vm2, %v169_v63 }
 0x12c   :  { %257 = vst.msk [vmem:[#allocation2 + $0x2] sm:$0x3] %vm172_vm2, %v254_v4 }
 0x130   :  { %v337_v8 = vpop.f32.mrb[2].mxu0 }
 0x131   :  { %v338_v9 = vadd.f32 %v9254_v6, %v337_v8  ;;  %v421_v10 = vpop.f32.mrb[2].mxu1  ;;  %v9914_v11 = vpop.f32.mrb[3].mxu0  ;;  %v9301_v6 = vld [vmem:[%s12864_s4 + $0x20] sm:$0xff] }
 0x132   :  { %v422_v12 = vadd.f32 %v9260_v7, %v421_v10  ;;  %v9925_v13 = vpop.f32.mrb[3].mxu1  ;;  %v9302_v7 = vld [vmem:[%s12864_s4 + $0x28] sm:$0xff] }
 0x133   :  { %341 = vst.msk [vmem:[#allocation2 + $0x4] sm:$0x3] %vm172_vm2, %v338_v9  ;;  %v11829_v10 = vpack.c.bf16 %v9302_v7, %v9301_v6 }
 0x134   :  { %425 = vst.msk [vmem:[#allocation2 + $0x6] sm:$0x3] %vm172_vm2, %v422_v12 }
 0x138   :  { %v505_v16 = vpop.f32.mrb[4].mxu0 }
 0x139   :  { %v506_v17 = vadd.f32 %v9266_v14, %v505_v16  ;;  %v589_v18 = vpop.f32.mrb[4].mxu1  ;;  %v9936_v19 = vpop.f32.mrb[5].mxu0 }
 0x13a   :  { %v590_v20 = vadd.f32 %v9272_v15, %v589_v18  ;;  %v9947_v21 = vpop.f32.mrb[5].mxu1 }
 0x13b   :  { %v762_v22 = vld [vmem:[#allocation2] sm:$0xff]  ;;  %509 = vst.msk [vmem:[#allocation2 + $0x8] sm:$0x3] %vm172_vm2, %v506_v17 }
 0x13c   :  { %593 = vst.msk [vmem:[#allocation2 + $0xa] sm:$0x3] %vm172_vm2, %v590_v20  ;;  %9974 = vmatprep.mubr.msk.f32.mxu0 %vm773_vm3, %v762_v22  ;;  %9981 = vmatprep.mubr.msk.f32.mxu1 %vm773_vm3, %v762_v22 }
 0x140   :  { %v673_v25 = vpop.f32.mrb[6].mxu0 }
 0x141   :  { %v674_v26 = vadd.f32 %v9278_v23, %v673_v25  ;;  %v757_v27 = vpop.f32.mrb[6].mxu1  ;;  %v9958_v28 = vpop.f32.mrb[7].mxu0 }
 0x142   :  { %v758_v29 = vadd.f32 %v9284_v24, %v757_v27  ;;  %v9969_v30 = vpop.f32.mrb[7].mxu1 }
 0x143   :  { %677 = vst.msk [vmem:[#allocation2 + $0xc] sm:$0x3] %vm172_vm2, %v674_v26 }
 0x144   :  { %761 = vst.msk [vmem:[#allocation2 + $0xe] sm:$0x3] %vm172_vm2, %v758_v29 }
 0x14b   :  { %v763_v31 = vld [vmem:[#allocation2 + $0x8] sm:$0xff] }
 0x14c   :  { %9975 = vmatmul.mubr.msk.f32.vlgmr.msra.gmra.mrb[8].mxu0 %vm773_vm3, %v763_v31  ;;  %9982 = vmatmul.mubr.msk.f32.vlgmr.msra.gmra.mrb[8].mxu1 %vm773_vm3, %v763_v31 }
 0x14d   :  { %10701 = vmatpush3.bf16.msra.mxu0 %v10698_v59  ;;  %9988 = vmatprep.mubr.msk.f32.mxu0 %vm773_vm3, %v762_v22 }
 0x14e   :  { %10705 = vmatprep.subr.bf16.mxu0 %v11476_v0  ;;  %9995 = vmatprep.mubr.msk.f32.mxu1 %vm11477_vm0, %v11478_v1 }
 0x14f   :  { %10704 = vmatpush3.bf16.msra.mxu1 %v11788_v35 }
 0x150   :  { %9989 = vmatmul.mubr.msk.f32.vlgmr.msra.gmra.mrb[10].mxu0 %vm773_vm3, %v763_v31  ;;  %10708 = vmatprep.subr.bf16.mxu1 %v11476_v0 }
 0x151   :  { %10002 = vmatprep.mubr.msk.f32.mxu0 %vm11477_vm0, %v11478_v1  ;;  %10707 = vmatpush3.bf16.msra.mxu0 %v11793_v37 }
 0x152   :  { %10711 = vmatprep.subr.bf16.mxu0 %v11476_v0 }
 0x21f   :  { %v9976_v40 = vpop.f32.mrb[8].mxu0  ;;  %v9983_v41 = vpop.f32.mrb[8].mxu1 }
 0x220   :  { %v11799_v42 = vadd.f32 %v9976_v40, %v9286_v38  ;;  %v11801_v43 = vadd.f32 %v9983_v41, %v9291_v39  ;;  %v846_v44 = vpop.f32.mrb[9].mxu0  ;;  %v932_v46 = vpop.f32.mrb[9].mxu1 }
 0x221   :  { %v11805_v47 = vadd.f32 %v9286_v38, %v846_v44  ;;  %v11807_v49 = vadd.f32 %v9291_v39, %v932_v46 }
 0x223   :  { %v1046_v50 = vadd.f32 %v11803_v45, %v11805_v47  ;;  %v9990_v52 = vpop.f32.mrb[10].mxu0  ;;  %v1059_v56 = vadd.f32 %v11811_v51, %v11807_v49 }
 0x224   :  { %v11813_v53 = vadd.f32 %v9990_v52, %v9296_v48  ;;  %v1018_v54 = vpop.f32.mrb[11].mxu0 }
 0x225   :  { %v9304_v55 = vmul.f32 -1.442695, %v1046_v50  ;;  %v9306_v57 = vmul.f32 -1.442695, %v1059_v56  ;;  %v11819_v2 = vadd.f32 %v9296_v48, %v1018_v54 }
 0x227   :  { %11008 = vpow2.f32 %v9304_v55 }
 0x228   :  { %11010 = vpow2.f32 %v9306_v57 }
 0x231   :  { %v11009_v58 = vpop.eup %11008 }
 0x232   :  { %v1050_v59 = vadd.f32 1.0, %v11009_v58  ;;  %v11011_v60 = vpop.eup %11010 }
 0x233   :  { %v1063_v61 = vadd.f32 1.0, %v11011_v60 }
 0x234   :  { %11012 = vrcp.f32 %v1050_v59 }
 0x235   :  { %11014 = vrcp.f32 %v1063_v61 }
 0x23e   :  { %v11013_v63 = vpop.eup %11012 }
 0x23f   :  { %v1072_v3 = vmul.f32 %v11013_v63, %v11817_v62  ;;  %v11015_v5 = vpop.eup %11014 }
 0x240   :  { %v1075_v8 = vsub.f32 1.0, %v11015_v5 }
 0x241   :  { %v1073_v4 = vadd.f32 %v1072_v3, %v11819_v2 }
 0x243   :  { %11016 = vtanh.f32 %v1073_v4 }
 0x24d   :  { %v11017_v9 = vpop.eup %11016 }
 0x24e   :  { %v1076_v11 = vmul.f32 %v11017_v9, %v1075_v8 }
 0x250   :  { %1077 = vst.msk [vmem:[#allocation2] sm:$0x3] %vm172_vm2, %v1076_v11  ;;  %9996 = vmatmul.mubr.msk.f32.vlgmr.msra.gmra.mrb[10].mxu1 %vm773_vm3, %v1076_v11  ;;  %10003 = vmatmul.mubr.msk.f32.vlgmr.msra.gmra.mrb[12].mxu0 %vm773_vm3, %v1076_v11  ;;  %v1319_v33 = vrot.slane %v1076_v11, 6 }
 0x251   :  { %10710 = vmatpush3.bf16.msra.mxu1 %v11829_v10  ;;  %10009 = vmatprep.mubr.msk.f32.mxu1 %vm11477_vm0, %v11478_v1 }
 0x252   :  { %10713 = vmatpush3.bf16.msra.mxu0 %v11788_v35  ;;  %10714 = vmatprep.subr.bf16.mxu1 %v11476_v0 }
 0x253   :  { %10016 = vmatprep.mubr.msk.f32.mxu0 %vm11477_vm0, %v11478_v1  ;;  %10717 = vmatprep.subr.bf16.mxu0 %v11476_v0 }
 0x254   :  { %10010 = vmatmul.mubr.msk.f32.vlgmr.msra.gmra.mrb[12].mxu1 %vm773_vm3, %v1076_v11 }
 0x255   :  { %10716 = vmatpush3.bf16.msra.mxu1 %v11793_v37  ;;  %10023 = vmatprep.mubr.msk.f32.mxu1 %vm11477_vm0, %v11478_v1 }
 0x256   :  { %10720 = vmatprep.subr.bf16.mxu1 %v11476_v0 }
 0x323   :  { %v1147_v12 = vpop.f32.mrb[10].mxu1  ;;  %v1217_v13 = vpop.f32.mrb[12].mxu0 }
 0x324   :  { %v1148_v14 = vadd.f32 %v11803_v45, %v1147_v12  ;;  %v1218_v15 = vadd.f32 %v11811_v51, %v1217_v13  ;;  %v9997_v16 = vpop.f32.mrb[11].mxu1  ;;  %v10004_v17 = vpop.f32.mrb[13].mxu0 }
 0x326   :  { %v1292_v18 = vrot.slane %v1148_v14, 6  ;;  %v1302_v19 = vrot.slane %v1218_v15, 6 }
 0x327   :  { %v1287_v20 = vpop.f32.mrb[12].mxu1 }
 0x328   :  { %v1294_v21 = vadd.f32 %v1292_v18, %v11805_v47  ;;  %v1304_v22 = vadd.f32 %v1302_v19, %v11807_v49  ;;  %v10011_v23 = vpop.f32.mrb[13].mxu1  ;;  %v1288_v30 = vadd.f32 %v11817_v62, %v1287_v20 }
 0x32a   :  { %v9311_v24 = vmul.f32 -1.442695, %v1294_v21  ;;  %v9312_v25 = vmul.f32 -1.442695, %v1304_v22  ;;  %v1312_v31 = vrot.slane %v1288_v30, 6 }
 0x32c   :  { %11018 = vpow2.f32 %v9311_v24 }
 0x32d   :  { %11020 = vpow2.f32 %v9312_v25 }
 0x336   :  { %v11019_v26 = vpop.eup %11018 }
 0x337   :  { %v11021_v27 = vpop.eup %11020  ;;  %v1298_v28 = vadd.f32 1.0, %v11019_v26 }
 0x338   :  { %v1308_v29 = vadd.f32 1.0, %v11021_v27 }
 0x339   :  { %11022 = vrcp.f32 %v1298_v28 }
 0x33a   :  { %11024 = vrcp.f32 %v1308_v29 }
 0x343   :  { %v11023_v32 = vpop.eup %11022 }
 0x344   :  { %v11025_v34 = vpop.eup %11024  ;;  %v1314_v36 = vmul.f32 %v11023_v32, %v1312_v31 }
 0x345   :  { %v1321_v38 = vmul.f32 %v11025_v34, %v1319_v33  ;;  %v1317_v40 = vsub.f32 1.0, %v11025_v34 }
 0x346   :  { %v1315_v39 = vadd.f32 %v1314_v36, %v11819_v2 }
 0x348   :  { %11026 = vtanh.f32 %v1315_v39 }
 0x352   :  { %v11027_v41 = vpop.eup %11026 }
 0x353   :  { %v1318_v44 = vmul.f32 %v11027_v41, %v1317_v40 }
 0x355   :  { %v1322_v46 = vadd.f32 %v1321_v38, %v1318_v44 }
 0x357   :  { %1324 = vst.msk [vmem:[#allocation2] sm:$0xc] %vm1323_vm4, %v1322_v46  ;;  %v1326_v48 = vrot.slane %v1322_v46, 2  ;;  %v1567_v14 = vrot.slane %v1322_v46, 6 }
 0x359   :  { %10017 = vmatmul.mubr.msk.f32.vlgmr.msra.gmra.mrb[14].mxu0 %vm773_vm3, %v1326_v48  ;;  %10024 = vmatmul.mubr.msk.f32.vlgmr.msra.gmra.mrb[14].mxu1 %vm773_vm3, %v1326_v48 }
 0x35a   :  { %10719 = vmatpush3.bf16.msra.mxu0 %v11829_v10  ;;  %10030 = vmatprep.mubr.msk.f32.mxu0 %vm11477_vm0, %v11478_v1 }
 0x35b   :  { %10722 = vmatpush3.bf16.msra.mxu1 %v11788_v35  ;;  %10723 = vmatprep.subr.bf16.mxu0 %v11476_v0 }
 0x35c   :  { %10037 = vmatprep.mubr.msk.f32.mxu1 %vm11477_vm0, %v11478_v1  ;;  %10726 = vmatprep.subr.bf16.mxu1 %v11476_v0 }
 0x35d   :  { %10031 = vmatmul.mubr.msk.f32.vlgmr.msra.gmra.mrb[16].mxu0 %vm773_vm3, %v1326_v48 }
 0x35e   :  { %10725 = vmatpush3.bf16.msra.mxu0 %v11793_v37  ;;  %10044 = vmatprep.mubr.msk.f32.mxu0 %vm11477_vm0, %v11478_v1 }
 0x35f   :  { %10729 = vmatprep.subr.bf16.mxu0 %v11476_v0 }
 0x42c   :  { %v1395_v50 = vpop.f32.mrb[14].mxu0  ;;  %v1465_v52 = vpop.f32.mrb[14].mxu1 }
 0x42d   :  { %v1396_v54 = vadd.f32 %v11803_v45, %v1395_v50  ;;  %v1466_v55 = vadd.f32 %v11811_v51, %v1465_v52  ;;  %v10018_v56 = vpop.f32.mrb[15].mxu0  ;;  %v10025_v57 = vpop.f32.mrb[15].mxu1 }
 0x42f   :  { %v1540_v58 = vrot.slane %v1396_v54, 4  ;;  %v1550_v59 = vrot.slane %v1466_v55, 4 }
 0x430   :  { %v1535_v60 = vpop.f32.mrb[16].mxu0 }
 0x431   :  { %v1542_v61 = vadd.f32 %v1540_v58, %v11805_v47  ;;  %v1552_v63 = vadd.f32 %v1550_v59, %v11807_v49  ;;  %v10032_v3 = vpop.f32.mrb[17].mxu0  ;;  %v1536_v11 = vadd.f32 %v11817_v62, %v1535_v60 }
 0x433   :  { %v9316_v4 = vmul.f32 -1.442695, %v1542_v61  ;;  %v9317_v5 = vmul.f32 -1.442695, %v1552_v63  ;;  %v1560_v12 = vrot.slane %v1536_v11, 4 }
 0x435   :  { %11028 = vpow2.f32 %v9316_v4 }
 0x436   :  { %11030 = vpow2.f32 %v9317_v5 }
 0x43f   :  { %v11029_v6 = vpop.eup %11028 }
 0x440   :  { %v11031_v7 = vpop.eup %11030  ;;  %v1546_v8 = vadd.f32 1.0, %v11029_v6 }
 0x441   :  { %v1556_v9 = vadd.f32 1.0, %v11031_v7 }
 0x442   :  { %11032 = vrcp.f32 %v1546_v8 }
 0x443   :  { %11034 = vrcp.f32 %v1556_v9 }
 0x44c   :  { %v11033_v13 = vpop.eup %11032 }
 0x44d   :  { %v11035_v15 = vpop.eup %11034  ;;  %v1562_v16 = vmul.f32 %v11033_v13, %v1560_v12 }
 0x44e   :  { %v1569_v17 = vmul.f32 %v11035_v15, %v1567_v14  ;;  %v1565_v19 = vsub.f32 1.0, %v11035_v15 }
 0x44f   :  { %v1563_v18 = vadd.f32 %v1562_v16, %v11819_v2 }
 0x451   :  { %11036 = vtanh.f32 %v1563_v18 }
 0x45b   :  { %v11037_v20 = vpop.eup %11036 }
 0x45c   :  { %v1566_v21 = vmul.f32 %v11037_v20, %v1565_v19 }
 0x45e   :  { %v1570_v22 = vadd.f32 %v1569_v17, %v1566_v21 }
 0x460   :  { %1572 = vst.msk [vmem:[#allocation2] sm:$0x30] %vm1571_vm5, %v1570_v22  ;;  %v1574_v23 = vrot.slane %v1570_v22, 4  ;;  %v1815_v54 = vrot.slane %v1570_v22, 6 }
 0x462   :  { %10038 = vmatmul.mubr.msk.f32.vlgmr.msra.gmra.mrb[16].mxu1 %vm773_vm3, %v1574_v23  ;;  %10045 = vmatmul.mubr.msk.f32.vlgmr.msra.gmra.mrb[18].mxu0 %vm773_vm3, %v1574_v23 }
 0x463   :  { %10728 = vmatpush3.bf16.msra.mxu1 %v11829_v10  ;;  %10051 = vmatprep.mubr.msk.f32.mxu1 %vm11477_vm0, %v11478_v1 }
 0x464   :  { %10731 = vmatpush3.bf16.msra.mxu0 %v11788_v35  ;;  %10732 = vmatprep.subr.bf16.mxu1 %v11476_v0 }
 0x465   :  { %10058 = vmatprep.mubr.msk.f32.mxu0 %vm11477_vm0, %v11478_v1  ;;  %10735 = vmatprep.subr.bf16.mxu0 %v11476_v0 }
 0x466   :  { %10052 = vmatmul.mubr.msk.f32.vlgmr.msra.gmra.mrb[18].mxu1 %vm773_vm3, %v1574_v23 }
 0x467   :  { %10734 = vmatpush3.bf16.msra.mxu1 %v11793_v37  ;;  %10065 = vmatprep.mubr.msk.f32.mxu1 %vm11477_vm0, %v11478_v1 }
 0x468   :  { %10738 = vmatprep.subr.bf16.mxu1 %v11476_v0 }
 0x535   :  { %v1643_v24 = vpop.f32.mrb[16].mxu1  ;;  %v1713_v25 = vpop.f32.mrb[18].mxu0 }
 0x536   :  { %v1644_v26 = vadd.f32 %v11803_v45, %v1643_v24  ;;  %v1714_v27 = vadd.f32 %v11811_v51, %v1713_v25  ;;  %v10039_v28 = vpop.f32.mrb[17].mxu1  ;;  %v10046_v29 = vpop.f32.mrb[19].mxu0 }
 0x538   :  { %v1788_v30 = vrot.slane %v1644_v26, 2  ;;  %v1798_v31 = vrot.slane %v1714_v27, 2 }
 0x539   :  { %v1783_v32 = vpop.f32.mrb[18].mxu1 }
 0x53a   :  { %v1790_v33 = vadd.f32 %v1788_v30, %v11805_v47  ;;  %v1800_v34 = vadd.f32 %v1798_v31, %v11807_v49  ;;  %v10053_v36 = vpop.f32.mrb[19].mxu1  ;;  %v1784_v48 = vadd.f32 %v11817_v62, %v1783_v32 }
 0x53c   :  { %v9321_v38 = vmul.f32 -1.442695, %v1790_v33  ;;  %v9322_v39 = vmul.f32 -1.442695, %v1800_v34  ;;  %v1808_v50 = vrot.slane %v1784_v48, 2 }
 0x53e   :  { %11038 = vpow2.f32 %v9321_v38 }
 0x53f   :  { %11040 = vpow2.f32 %v9322_v39 }
 0x548   :  { %v11039_v40 = vpop.eup %11038 }
 0x549   :  { %v11041_v41 = vpop.eup %11040  ;;  %v1794_v44 = vadd.f32 1.0, %v11039_v40 }
 0x54a   :  { %v1804_v46 = vadd.f32 1.0, %v11041_v41 }
 0x54b   :  { %11042 = vrcp.f32 %v1794_v44 }
 0x54c   :  { %11044 = vrcp.f32 %v1804_v46 }
 0x555   :  { %v11043_v52 = vpop.eup %11042 }
 0x556   :  { %v11045_v55 = vpop.eup %11044  ;;  %v1810_v47 = vmul.f32 %v11043_v52, %v1808_v50 }
 0x557   :  { %v1817_v56 = vmul.f32 %v11045_v55, %v1815_v54  ;;  %v1813_v57 = vsub.f32 1.0, %v11045_v55 }
 0x558   :  { %v1811_v49 = vadd.f32 %v1810_v47, %v11819_v2 }
 0x55a   :  { %11046 = vtanh.f32 %v1811_v49 }
 0x564   :  { %v11047_v58 = vpop.eup %11046 }
 0x565   :  { %v1814_v59 = vmul.f32 %v11047_v58, %v1813_v57 }
 0x567   :  { %v1818_v60 = vadd.f32 %v1817_v56, %v1814_v59 }
 0x569   :  { %1820 = vst.msk [vmem:[#allocation2] sm:$0xc0] %vm1819_vm6, %v1818_v60  ;;  %v1822_v61 = vrot.slane %v1818_v60, 6 }
 0x56b   :  { %10059 = vmatmul.mubr.msk.f32.vlgmr.msra.gmra.mrb[20].mxu0 %vm773_vm3, %v1822_v61  ;;  %10066 = vmatmul.mubr.msk.f32.vlgmr.msra.gmra.mrb[20].mxu1 %vm773_vm3, %v1822_v61 }
 0x56c   :  { %10737 = vmatpush3.bf16.msra.mxu0 %v11829_v10  ;;  %10072 = vmatprep.mubr.msk.f32.mxu0 %vm11477_vm0, %v11478_v1 }
 0x56d   :  { %10740 = vmatpush3.bf16.msra.mxu1 %v11788_v35  ;;  %10741 = vmatprep.subr.bf16.mxu0 %v11476_v0 }
 0x56e   :  { %10079 = vmatprep.mubr.msk.f32.mxu1 %vm11477_vm0, %v11478_v1  ;;  %10744 = vmatprep.subr.bf16.mxu1 %v11476_v0 }
 0x56f   :  { %10073 = vmatmul.mubr.msk.f32.vlgmr.msra.gmra.mrb[22].mxu0 %vm773_vm3, %v1822_v61 }
 0x570   :  { %10743 = vmatpush3.bf16.msra.mxu0 %v11793_v37  ;;  %10086 = vmatprep.mubr.msk.f32.mxu0 %vm11477_vm0, %v11478_v1 }
 0x571   :  { %10747 = vmatprep.subr.bf16.mxu0 %v11476_v0 }
 0x63e   :  { %v1891_v2 = vpop.f32.mrb[20].mxu0  ;;  %v1961_v63 = vpop.f32.mrb[20].mxu1 }
 0x63f   :  { %v1892_v3 = vadd.f32 %v11803_v45, %v1891_v2  ;;  %v10060_v4 = vpop.f32.mrb[21].mxu0  ;;  %v10067_v5 = vpop.f32.mrb[21].mxu1  ;;  %v1962_v6 = vadd.f32 %v11811_v51, %v1961_v63 }
 0x641   :  { %v2035_v7 = vadd.f32 %v1892_v3, %v11799_v42  ;;  %v2042_v12 = vadd.f32 %v1962_v6, %v11801_v43 }
 0x642   :  { %v2031_v8 = vpop.f32.mrb[22].mxu0 }
 0x643   :  { %v9326_v9 = vmul.f32 -1.442695, %v2035_v7  ;;  %v10074_v11 = vpop.f32.mrb[23].mxu0  ;;  %v9327_v13 = vmul.f32 -1.442695, %v2042_v12  ;;  %v2032_v18 = vadd.f32 %v11817_v62, %v2031_v8 }
 0x645   :  { %11048 = vpow2.f32 %v9326_v9 }
 0x646   :  { %11050 = vpow2.f32 %v9327_v13 }
 0x64f   :  { %v11049_v14 = vpop.eup %11048 }
 0x650   :  { %v2039_v15 = vadd.f32 1.0, %v11049_v14  ;;  %v11051_v16 = vpop.eup %11050 }
 0x651   :  { %v2046_v17 = vadd.f32 1.0, %v11051_v16 }
 0x652   :  { %11052 = vrcp.f32 %v2039_v15 }
 0x653   :  { %11054 = vrcp.f32 %v2046_v17 }
 0x65c   :  { %v11053_v19 = vpop.eup %11052 }
 0x65d   :  { %v2049_v20 = vmul.f32 %v11053_v19, %v2032_v18  ;;  %v11055_v22 = vpop.eup %11054 }
 0x65e   :  { %v2052_v23 = vsub.f32 1.0, %v11055_v22  ;;  %v2055_v26 = vmul.f32 %v11055_v22, %v1822_v61 }
 0x65f   :  { %v2050_v21 = vadd.f32 %v2049_v20, %v11813_v53 }
 0x661   :  { %11056 = vtanh.f32 %v2050_v21 }
 0x66b   :  { %v11057_v24 = vpop.eup %11056 }
 0x66c   :  { %v2053_v25 = vmul.f32 %v11057_v24, %v2052_v23 }
 0x66e   :  { %v2056_v27 = vadd.f32 %v2055_v26, %v2053_v25 }
 0x670   :  { %2057 = vst.msk [vmem:[#allocation2 + $0x8] sm:$0x3] %vm172_vm2, %v2056_v27  ;;  %10080 = vmatmul.mubr.msk.f32.vlgmr.msra.gmra.mrb[22].mxu1 %vm773_vm3, %v2056_v27  ;;  %10087 = vmatmul.mubr.msk.f32.vlgmr.msra.gmra.mrb[24].mxu0 %vm773_vm3, %v2056_v27  ;;  %v2299_v49 = vrot.slane %v2056_v27, 6 }
 0x671   :  { %10746 = vmatpush3.bf16.msra.mxu1 %v11829_v10  ;;  %10093 = vmatprep.mubr.msk.f32.mxu1 %vm11477_vm0, %v11478_v1 }
 0x672   :  { %10749 = vmatpush3.bf16.msra.mxu0 %v11788_v35  ;;  %10750 = vmatprep.subr.bf16.mxu1 %v11476_v0 }
 0x673   :  { %10100 = vmatprep.mubr.msk.f32.mxu0 %vm11477_vm0, %v11478_v1  ;;  %10753 = vmatprep.subr.bf16.mxu0 %v11476_v0 }
 0x674   :  { %10094 = vmatmul.mubr.msk.f32.vlgmr.msra.gmra.mrb[24].mxu1 %vm773_vm3, %v2056_v27 }
 0x675   :  { %10752 = vmatpush3.bf16.msra.mxu1 %v11793_v37  ;;  %10107 = vmatprep.mubr.msk.f32.mxu1 %vm11477_vm0, %v11478_v1 }
 0x676   :  { %10756 = vmatprep.subr.bf16.mxu1 %v11476_v0 }
 0x743   :  { %v2127_v28 = vpop.f32.mrb[22].mxu1  ;;  %v2197_v29 = vpop.f32.mrb[24].mxu0 }
 0x744   :  { %v2128_v30 = vadd.f32 %v11803_v45, %v2127_v28  ;;  %v2198_v31 = vadd.f32 %v11811_v51, %v2197_v29  ;;  %v10081_v32 = vpop.f32.mrb[23].mxu1  ;;  %v10088_v33 = vpop.f32.mrb[25].mxu0 }
 0x746   :  { %v2272_v34 = vrot.slane %v2128_v30, 6  ;;  %v2282_v36 = vrot.slane %v2198_v31, 6 }
 0x747   :  { %v2267_v38 = vpop.f32.mrb[24].mxu1 }
 0x748   :  { %v2274_v39 = vadd.f32 %v2272_v34, %v11799_v42  ;;  %v2284_v40 = vadd.f32 %v2282_v36, %v11801_v43  ;;  %v10095_v41 = vpop.f32.mrb[25].mxu1  ;;  %v2268_v55 = vadd.f32 %v11817_v62, %v2267_v38  ;;  %v2798_v36 = vld [vmem:[#allocation2] sm:$0xff]  ;;  %v9343_v38 = vld [vmem:[%s12863_s3 + $0x30] sm:$0xff] }
 0x749   :  { %v9349_v41 = vld [vmem:[%s12863_s3 + $0x48] sm:$0xff] }
 0x74a   :  { %v9331_v44 = vmul.f32 -1.442695, %v2274_v39  ;;  %v9332_v46 = vmul.f32 -1.442695, %v2284_v40  ;;  %v2292_v47 = vrot.slane %v2268_v55, 6  ;;  %v9344_v39 = vld [vmem:[%s12863_s3 + $0x38] sm:$0xff] }
 0x74b   :  { %v10765_v40 = vpack.c.bf16 %v9344_v39, %v9343_v38 }
 0x74c   :  { %11058 = vpow2.f32 %v9331_v44 }
 0x74d   :  { %11060 = vpow2.f32 %v9332_v46  ;;  %v9353_v46 = vld [vmem:[%s12863_s3 + $0x50] sm:$0xff] }
 0x756   :  { %v11059_v48 = vpop.eup %11058 }
 0x757   :  { %v11061_v50 = vpop.eup %11060  ;;  %v2278_v52 = vadd.f32 1.0, %v11059_v48  ;;  %v9354_v48 = vld [vmem:[%s12863_s3 + $0x58] sm:$0xff] }
 0x758   :  { %v2288_v54 = vadd.f32 1.0, %v11061_v50  ;;  %v10773_v50 = vpack.c.bf16 %v9354_v48, %v9353_v46 }
 0x759   :  { %11062 = vrcp.f32 %v2278_v52 }
 0x75a   :  { %11064 = vrcp.f32 %v2288_v54 }
 0x763   :  { %v11063_v56 = vpop.eup %11062 }
 0x764   :  { %v11065_v57 = vpop.eup %11064  ;;  %v2294_v58 = vmul.f32 %v11063_v56, %v2292_v47 }
 0x765   :  { %v2301_v59 = vmul.f32 %v11065_v57, %v2299_v49  ;;  %v2297_v61 = vsub.f32 1.0, %v11065_v57 }
 0x766   :  { %v2295_v60 = vadd.f32 %v2294_v58, %v11813_v53 }
 0x768   :  { %11066 = vtanh.f32 %v2295_v60 }
 0x772   :  { %v11067_v2 = vpop.eup %11066 }
 0x773   :  { %v2298_v63 = vmul.f32 %v11067_v2, %v2297_v61 }
 0x775   :  { %v2302_v3 = vadd.f32 %v2301_v59, %v2298_v63 }
 0x777   :  { %2303 = vst.msk [vmem:[#allocation2 + $0x8] sm:$0xc] %vm1323_vm4, %v2302_v3  ;;  %v2305_v4 = vrot.slane %v2302_v3, 2  ;;  %v2546_v25 = vrot.slane %v2302_v3, 6 }
 0x779   :  { %10101 = vmatmul.mubr.msk.f32.vlgmr.msra.gmra.mrb[26].mxu0 %vm773_vm3, %v2305_v4  ;;  %10108 = vmatmul.mubr.msk.f32.vlgmr.msra.gmra.mrb[26].mxu1 %vm773_vm3, %v2305_v4 }
 0x77a   :  { %10755 = vmatpush3.bf16.msra.mxu0 %v11829_v10  ;;  %10114 = vmatprep.mubr.msk.f32.mxu0 %vm11477_vm0, %v11478_v1 }
 0x77b   :  { %10758 = vmatpush3.bf16.msra.mxu1 %v11788_v35  ;;  %10759 = vmatprep.subr.bf16.mxu0 %v11476_v0 }
 0x77c   :  { %10121 = vmatprep.mubr.msk.f32.mxu1 %vm11477_vm0, %v11478_v1  ;;  %10762 = vmatprep.subr.bf16.mxu1 %v11476_v0 }
 0x77d   :  { %10115 = vmatmul.mubr.msk.f32.vlgmr.msra.gmra.mrb[28].mxu0 %vm773_vm3, %v2305_v4 }
 0x77e   :  { %10761 = vmatpush3.bf16.msra.mxu0 %v11793_v37  ;;  %10128 = vmatprep.mubr.msk.f32.mxu0 %vm11477_vm0, %v11478_v1 }
 0x77f   :  { %10766 = vmatprep.subr.bf16.mxu0 %v10765_v40 }
 0x84c   :  { %v2374_v5 = vpop.f32.mrb[26].mxu0  ;;  %v2444_v6 = vpop.f32.mrb[26].mxu1 }
 0x84d   :  { %v2375_v7 = vadd.f32 %v11803_v45, %v2374_v5  ;;  %v2445_v35 = vadd.f32 %v11811_v51, %v2444_v6  ;;  %v10102_v8 = vpop.f32.mrb[27].mxu0  ;;  %v10109_v9 = vpop.f32.mrb[27].mxu1 }
 0x84f   :  { %v2519_v11 = vrot.slane %v2375_v7, 4  ;;  %v2529_v12 = vrot.slane %v2445_v35, 4 }
 0x850   :  { %v2514_v13 = vpop.f32.mrb[28].mxu0 }
 0x851   :  { %v2521_v14 = vadd.f32 %v2519_v11, %v11799_v42  ;;  %v2531_v15 = vadd.f32 %v2529_v12, %v11801_v43  ;;  %v10116_v16 = vpop.f32.mrb[29].mxu0  ;;  %v2515_v22 = vadd.f32 %v11817_v62, %v2514_v13 }
 0x853   :  { %v9336_v37 = vmul.f32 -1.442695, %v2521_v14  ;;  %v9337_v17 = vmul.f32 -1.442695, %v2531_v15  ;;  %v2539_v23 = vrot.slane %v2515_v22, 4 }
 0x855   :  { %11068 = vpow2.f32 %v9336_v37  ;;  %v9360_v37 = vld [vmem:[%s12864_s4 + $0x40] sm:$0xff] }
 0x856   :  { %11070 = vpow2.f32 %v9337_v17 }
 0x85f   :  { %v11069_v18 = vpop.eup %11068 }
 0x860   :  { %v11071_v19 = vpop.eup %11070  ;;  %v2525_v20 = vadd.f32 1.0, %v11069_v18  ;;  %v9361_v18 = vld [vmem:[%s12864_s4 + $0x48] sm:$0xff] }
 0x861   :  { %v2535_v21 = vadd.f32 1.0, %v11071_v19  ;;  %v12020_v19 = vpack.c.bf16 %v9361_v18, %v9360_v37 }
 0x862   :  { %11072 = vrcp.f32 %v2525_v20  ;;  %v9345_v20 = vld [vmem:[#allocation8 + $0x3] ss:$0 sm:$0xff] }
 0x863   :  { %11074 = vrcp.f32 %v2535_v21  ;;  %v9350_v21 = vld [vmem:[#allocation8 + $0x4] ss:$0 sm:$0xff] }
 0x86c   :  { %v11073_v24 = vpop.eup %11072 }
 0x86d   :  { %v11075_v26 = vpop.eup %11074  ;;  %v2541_v27 = vmul.f32 %v11073_v24, %v2539_v23 }
 0x86e   :  { %v2548_v28 = vmul.f32 %v11075_v26, %v2546_v25  ;;  %v2544_v30 = vsub.f32 1.0, %v11075_v26 }
 0x86f   :  { %v2542_v29 = vadd.f32 %v2541_v27, %v11813_v53  ;;  %v12030_v27 = vld [vmem:[#allocation9 + $0x3] ss:$0 sm:$0xff] }
 0x871   :  { %11076 = vtanh.f32 %v2542_v29 }
 0x87b   :  { %v11077_v31 = vpop.eup %11076 }
 0x87c   :  { %v2545_v32 = vmul.f32 %v11077_v31, %v2544_v30  ;;  %v9355_v30 = vld [vmem:[#allocation8 + $0x5] ss:$0 sm:$0xff] }
 0x87e   :  { %v2549_v33 = vadd.f32 %v2548_v28, %v2545_v32 }
 0x880   :  { %2550 = vst.msk [vmem:[#allocation2 + $0x8] sm:$0x30] %vm1571_vm5, %v2549_v33  ;;  %v2552_v34 = vrot.slane %v2549_v33, 4  ;;  %v2793_v8 = vrot.slane %v2549_v33, 6  ;;  %v12038_v33 = vld [vmem:[#allocation9 + $0x4] ss:$0 sm:$0xff] }
 0x882   :  { %10122 = vmatmul.mubr.msk.f32.vlgmr.msra.gmra.mrb[28].mxu1 %vm773_vm3, %v2552_v34  ;;  %10129 = vmatmul.mubr.msk.f32.vlgmr.msra.gmra.mrb[30].mxu0 %vm773_vm3, %v2552_v34 }
 0x883   :  { %10764 = vmatpush3.bf16.msra.mxu1 %v11829_v10  ;;  %10142 = vmatprep.mubr.msk.f32.mxu0 %vm773_vm3, %v2798_v36  ;;  %v9348_v10 = vld [vmem:[%s12863_s3 + $0x40] sm:$0xff] }
 0x884   :  { %10135 = vmatprep.mubr.msk.f32.mxu1 %vm11477_vm0, %v11478_v1  ;;  %v10769_v44 = vpack.c.bf16 %v9349_v41, %v9348_v10  ;;  %10768 = vmatpush3.bf16.msra.mxu0 %v10765_v40 }
 0x885   :  { %10774 = vmatprep.subr.bf16.mxu0 %v10773_v50 }
 0x886   :  { %10136 = vmatmul.mubr.msk.f32.vlgmr.msra.gmra.mrb[30].mxu1 %vm773_vm3, %v2552_v34  ;;  %10770 = vmatprep.subr.bf16.mxu1 %v10769_v44 }
 0x887   :  { %10149 = vmatprep.mubr.msk.f32.mxu1 %vm773_vm3, %v2798_v36  ;;  %10772 = vmatpush3.bf16.msra.mxu1 %v10769_v44 }
 0x888   :  { %10777 = vmatprep.subr.bf16.mxu1 %v11476_v0 }
 0x955   :  { %v2621_v52 = vpop.f32.mrb[28].mxu1  ;;  %v2691_v54 = vpop.f32.mrb[30].mxu0 }
 0x956   :  { %v2622_v55 = vadd.f32 %v11803_v45, %v2621_v52  ;;  %v2692_v47 = vadd.f32 %v11811_v51, %v2691_v54  ;;  %v10123_v56 = vpop.f32.mrb[29].mxu1  ;;  %v10130_v49 = vpop.f32.mrb[31].mxu0 }
 0x957   :  { %v9362_v49 = vld [vmem:[%s12864_s4 + $0x50] sm:$0xff] }
 0x958   :  { %v2766_v57 = vrot.slane %v2622_v55, 2  ;;  %v2776_v58 = vrot.slane %v2692_v47, 2 }
 0x959   :  { %v2761_v59 = vpop.f32.mrb[30].mxu1 }
 0x95a   :  { %v2768_v60 = vadd.f32 %v2766_v57, %v11799_v42  ;;  %v2778_v61 = vadd.f32 %v2776_v58, %v11801_v43  ;;  %v10137_v2 = vpop.f32.mrb[31].mxu1  ;;  %v2762_v51 = vadd.f32 %v11817_v62, %v2761_v59  ;;  %v9359_v62 = vld [vmem:[%s12864_s4 + $0x38] sm:$0xff] }
 0x95b   :  { %v9363_v57 = vld [vmem:[%s12864_s4 + $0x58] sm:$0xff] }
 0x95c   :  { %v9341_v63 = vmul.f32 -1.442695, %v2768_v60  ;;  %v9342_v3 = vmul.f32 -1.442695, %v2778_v61  ;;  %v2786_v7 = vrot.slane %v2762_v51, 2  ;;  %v12056_v60 = vpack.c.bf16 %v9363_v57, %v9362_v49 }
 0x95e   :  { %11078 = vpow2.f32 %v9341_v63 }
 0x95f   :  { %11080 = vpow2.f32 %v9342_v3 }
 0x968   :  { %v11079_v4 = vpop.eup %11078 }
 0x969   :  { %v11081_v5 = vpop.eup %11080  ;;  %v2772_v6 = vadd.f32 1.0, %v11079_v4 }
 0x96a   :  { %v2782_v45 = vadd.f32 1.0, %v11081_v5 }
 0x96b   :  { %11082 = vrcp.f32 %v2772_v6 }
 0x96c   :  { %11084 = vrcp.f32 %v2782_v45 }
 0x975   :  { %v11083_v35 = vpop.eup %11082 }
 0x976   :  { %v11085_v9 = vpop.eup %11084  ;;  %v2788_v42 = vmul.f32 %v11083_v35, %v2786_v7 }
 0x977   :  { %v2795_v11 = vmul.f32 %v11085_v9, %v2793_v8  ;;  %v2791_v12 = vsub.f32 1.0, %v11085_v9 }
 0x978   :  { %v2789_v43 = vadd.f32 %v2788_v42, %v11813_v53  ;;  %v9358_v53 = vld [vmem:[%s12864_s4 + $0x30] sm:$0xff] }
 0x979   :  { %v12015_v17 = vpack.c.bf16 %v9359_v62, %v9358_v53 }
 0x97a   :  { %11086 = vtanh.f32 %v2789_v43 }
 0x984   :  { %v11087_v13 = vpop.eup %11086 }
 0x985   :  { %v2792_v14 = vmul.f32 %v11087_v13, %v2791_v12 }
 0x987   :  { %v2796_v15 = vadd.f32 %v2795_v11, %v2792_v14 }
 0x989   :  { %2797 = vst.msk [vmem:[#allocation2 + $0x8] sm:$0xc0] %vm1819_vm6, %v2796_v15 }
 0x990   :  { %v2799_v16 = vld [vmem:[#allocation2 + $0x8] sm:$0xff] }
 0x991   :  { %10143 = vmatmul.mubr.msk.f32.vlgmr.msra.gmra.mrb[32].mxu0 %vm773_vm3, %v2799_v16  ;;  %10150 = vmatmul.mubr.msk.f32.vlgmr.msra.gmra.mrb[32].mxu1 %vm773_vm3, %v2799_v16 }
 0x992   :  { %10776 = vmatpush3.bf16.msra.mxu0 %v10773_v50  ;;  %10156 = vmatprep.mubr.msk.f32.mxu0 %vm773_vm3, %v2798_v36  ;;  %v12044_v50 = vld [vmem:[#allocation9 + $0x5] ss:$0 sm:$0xff] }
 0x993   :  { %10780 = vmatprep.subr.bf16.mxu0 %v11476_v0  ;;  %10163 = vmatprep.mubr.msk.f32.mxu1 %vm11477_vm0, %v11478_v1 }
 0x994   :  { %10779 = vmatpush3.bf16.msra.mxu1 %v12015_v17 }
 0x995   :  { %10157 = vmatmul.mubr.msk.f32.vlgmr.msra.gmra.mrb[34].mxu0 %vm773_vm3, %v2799_v16  ;;  %10783 = vmatprep.subr.bf16.mxu1 %v11476_v0 }
 0x996   :  { %10170 = vmatprep.mubr.msk.f32.mxu0 %vm11477_vm0, %v11478_v1  ;;  %10782 = vmatpush3.bf16.msra.mxu0 %v12020_v19 }
 0x997   :  { %10786 = vmatprep.subr.bf16.mxu0 %v11476_v0 }
 0xa64   :  { %v10144_v22 = vpop.f32.mrb[32].mxu0  ;;  %v10151_v23 = vpop.f32.mrb[32].mxu1 }
 0xa65   :  { %v12026_v24 = vadd.f32 %v10144_v22, %v9345_v20  ;;  %v12028_v25 = vadd.f32 %v10151_v23, %v9350_v21  ;;  %v2883_v26 = vpop.f32.mrb[33].mxu0  ;;  %v2969_v28 = vpop.f32.mrb[33].mxu1 }
 0xa66   :  { %v12032_v29 = vadd.f32 %v9345_v20, %v2883_v26  ;;  %v12034_v31 = vadd.f32 %v9350_v21, %v2969_v28 }
 0xa68   :  { %v3085_v32 = vadd.f32 %v12030_v27, %v12032_v29  ;;  %v10158_v34 = vpop.f32.mrb[34].mxu0  ;;  %v3098_v10 = vadd.f32 %v12038_v33, %v12034_v31 }
 0xa69   :  { %v12040_v36 = vadd.f32 %v10158_v34, %v9355_v30  ;;  %v3055_v38 = vpop.f32.mrb[35].mxu0 }
 0xa6a   :  { %v9365_v39 = vmul.f32 -1.442695, %v3085_v32  ;;  %v9367_v40 = vmul.f32 -1.442695, %v3098_v10  ;;  %v12046_v54 = vadd.f32 %v9355_v30, %v3055_v38 }
 0xa6c   :  { %11088 = vpow2.f32 %v9365_v39 }
 0xa6d   :  { %11090 = vpow2.f32 %v9367_v40 }
 0xa76   :  { %v11089_v41 = vpop.eup %11088 }
 0xa77   :  { %v3089_v44 = vadd.f32 1.0, %v11089_v41  ;;  %v11091_v46 = vpop.eup %11090 }
 0xa78   :  { %v3102_v48 = vadd.f32 1.0, %v11091_v46 }
 0xa79   :  { %11092 = vrcp.f32 %v3089_v44 }
 0xa7a   :  { %11094 = vrcp.f32 %v3102_v48 }
 0xa83   :  { %v11093_v52 = vpop.eup %11092 }
 0xa84   :  { %v3111_v55 = vmul.f32 %v11093_v52, %v12044_v50  ;;  %v11095_v56 = vpop.eup %11094 }
 0xa85   :  { %v3114_v58 = vsub.f32 1.0, %v11095_v56 }
 0xa86   :  { %v3112_v47 = vadd.f32 %v3111_v55, %v12046_v54 }
 0xa88   :  { %11096 = vtanh.f32 %v3112_v47 }
 0xa92   :  { %v11097_v59 = vpop.eup %11096 }
 0xa93   :  { %v3115_v61 = vmul.f32 %v11097_v59, %v3114_v58 }
 0xa95   :  { %3116 = vst.msk [vmem:[#allocation2] sm:$0x3] %vm172_vm2, %v3115_v61  ;;  %10164 = vmatmul.mubr.msk.f32.vlgmr.msra.gmra.mrb[34].mxu1 %vm773_vm3, %v3115_v61  ;;  %10171 = vmatmul.mubr.msk.f32.vlgmr.msra.gmra.mrb[36].mxu0 %vm773_vm3, %v3115_v61  ;;  %v3358_v62 = vrot.slane %v3115_v61, 6 }
 0xa96   :  { %10785 = vmatpush3.bf16.msra.mxu1 %v12056_v60  ;;  %10177 = vmatprep.mubr.msk.f32.mxu1 %vm11477_vm0, %v11478_v1 }
 0xa97   :  { %10788 = vmatpush3.bf16.msra.mxu0 %v12015_v17  ;;  %10789 = vmatprep.subr.bf16.mxu1 %v11476_v0 }
 0xa98   :  { %10184 = vmatprep.mubr.msk.f32.mxu0 %vm11477_vm0, %v11478_v1  ;;  %10792 = vmatprep.subr.bf16.mxu0 %v11476_v0 }
 0xa99   :  { %10178 = vmatmul.mubr.msk.f32.vlgmr.msra.gmra.mrb[36].mxu1 %vm773_vm3, %v3115_v61 }
 0xa9a   :  { %10791 = vmatpush3.bf16.msra.mxu1 %v12020_v19  ;;  %10191 = vmatprep.mubr.msk.f32.mxu1 %vm11477_vm0, %v11478_v1 }
 0xa9b   :  { %10795 = vmatprep.subr.bf16.mxu1 %v11476_v0 }
 0xb68   :  { %v3186_v2 = vpop.f32.mrb[34].mxu1  ;;  %v3256_v63 = vpop.f32.mrb[36].mxu0 }
 0xb69   :  { %v3187_v3 = vadd.f32 %v12030_v27, %v3186_v2  ;;  %v3257_v4 = vadd.f32 %v12038_v33, %v3256_v63  ;;  %v10165_v5 = vpop.f32.mrb[35].mxu1  ;;  %v10172_v6 = vpop.f32.mrb[37].mxu0 }
 0xb6b   :  { %v3331_v45 = vrot.slane %v3187_v3, 6  ;;  %v3341_v51 = vrot.slane %v3257_v4, 6 }
 0xb6c   :  { %v3326_v7 = vpop.f32.mrb[36].mxu1 }
 0xb6d   :  { %v3333_v35 = vadd.f32 %v3331_v45, %v12032_v29  ;;  %v3343_v8 = vadd.f32 %v3341_v51, %v12034_v31  ;;  %v10179_v9 = vpop.f32.mrb[37].mxu1  ;;  %v3327_v15 = vadd.f32 %v12044_v50, %v3326_v7 }
 0xb6f   :  { %v9372_v42 = vmul.f32 -1.442695, %v3333_v35  ;;  %v9373_v11 = vmul.f32 -1.442695, %v3343_v8  ;;  %v3351_v16 = vrot.slane %v3327_v15, 6 }
 0xb71   :  { %11098 = vpow2.f32 %v9372_v42 }
 0xb72   :  { %11100 = vpow2.f32 %v9373_v11 }
 0xb7b   :  { %v11099_v43 = vpop.eup %11098 }
 0xb7c   :  { %v11101_v12 = vpop.eup %11100  ;;  %v3337_v13 = vadd.f32 1.0, %v11099_v43 }
 0xb7d   :  { %v3347_v14 = vadd.f32 1.0, %v11101_v12 }
 0xb7e   :  { %11102 = vrcp.f32 %v3337_v13 }
 0xb7f   :  { %11104 = vrcp.f32 %v3347_v14 }
 0xb88   :  { %v11103_v53 = vpop.eup %11102 }
 0xb89   :  { %v11105_v37 = vpop.eup %11104  ;;  %v3353_v18 = vmul.f32 %v11103_v53, %v3351_v16 }
 0xb8a   :  { %v3360_v20 = vmul.f32 %v11105_v37, %v3358_v62  ;;  %v3356_v22 = vsub.f32 1.0, %v11105_v37 }
 0xb8b   :  { %v3354_v21 = vadd.f32 %v3353_v18, %v12046_v54 }
 0xb8d   :  { %11106 = vtanh.f32 %v3354_v21 }
 0xb97   :  { %v11107_v23 = vpop.eup %11106 }
 0xb98   :  { %v3357_v26 = vmul.f32 %v11107_v23, %v3356_v22 }
 0xb9a   :  { %v3361_v28 = vadd.f32 %v3360_v20, %v3357_v26 }
 0xb9c   :  { %3362 = vst.msk [vmem:[#allocation2] sm:$0xc] %vm1323_vm4, %v3361_v28  ;;  %v3364_v30 = vrot.slane %v3361_v28, 2  ;;  %v3605_v3 = vrot.slane %v3361_v28, 6 }
 0xb9e   :  { %10185 = vmatmul.mubr.msk.f32.vlgmr.msra.gmra.mrb[38].mxu0 %vm773_vm3, %v3364_v30  ;;  %10192 = vmatmul.mubr.msk.f32.vlgmr.msra.gmra.mrb[38].mxu1 %vm773_vm3, %v3364_v30 }
 0xb9f   :  { %10794 = vmatpush3.bf16.msra.mxu0 %v12056_v60  ;;  %10198 = vmatprep.mubr.msk.f32.mxu0 %vm11477_vm0, %v11478_v1 }
 0xba0   :  { %10797 = vmatpush3.bf16.msra.mxu1 %v12015_v17  ;;  %10798 = vmatprep.subr.bf16.mxu0 %v11476_v0 }
 0xba1   :  { %10205 = vmatprep.mubr.msk.f32.mxu1 %vm11477_vm0, %v11478_v1  ;;  %10801 = vmatprep.subr.bf16.mxu1 %v11476_v0 }
 0xba2   :  { %10199 = vmatmul.mubr.msk.f32.vlgmr.msra.gmra.mrb[40].mxu0 %vm773_vm3, %v3364_v30 }
 0xba3   :  { %10800 = vmatpush3.bf16.msra.mxu0 %v12020_v19  ;;  %10212 = vmatprep.mubr.msk.f32.mxu0 %vm11477_vm0, %v11478_v1 }
 0xba4   :  { %10804 = vmatprep.subr.bf16.mxu0 %v11476_v0 }
 0xc71   :  { %v3433_v32 = vpop.f32.mrb[38].mxu0  ;;  %v3503_v34 = vpop.f32.mrb[38].mxu1 }
 0xc72   :  { %v3434_v38 = vadd.f32 %v12030_v27, %v3433_v32  ;;  %v3504_v39 = vadd.f32 %v12038_v33, %v3503_v34  ;;  %v10186_v10 = vpop.f32.mrb[39].mxu0  ;;  %v10193_v40 = vpop.f32.mrb[39].mxu1 }
 0xc74   :  { %v3578_v41 = vrot.slane %v3434_v38, 4  ;;  %v3588_v44 = vrot.slane %v3504_v39, 4 }
 0xc75   :  { %v3573_v46 = vpop.f32.mrb[40].mxu0 }
 0xc76   :  { %v3580_v48 = vadd.f32 %v3578_v41, %v12032_v29  ;;  %v3590_v52 = vadd.f32 %v3588_v44, %v12034_v31  ;;  %v10200_v55 = vpop.f32.mrb[41].mxu0  ;;  %v3574_v61 = vadd.f32 %v12044_v50, %v3573_v46 }
 0xc78   :  { %v9377_v47 = vmul.f32 -1.442695, %v3580_v48  ;;  %v9378_v56 = vmul.f32 -1.442695, %v3590_v52  ;;  %v3598_v2 = vrot.slane %v3574_v61, 4 }
 0xc7a   :  { %11108 = vpow2.f32 %v9377_v47 }
 0xc7b   :  { %11110 = vpow2.f32 %v9378_v56 }
 0xc84   :  { %v11109_v49 = vpop.eup %11108 }
 0xc85   :  { %v11111_v57 = vpop.eup %11110  ;;  %v3584_v58 = vadd.f32 1.0, %v11109_v49 }
 0xc86   :  { %v3594_v59 = vadd.f32 1.0, %v11111_v57 }
 0xc87   :  { %11112 = vrcp.f32 %v3584_v58 }
 0xc88   :  { %11114 = vrcp.f32 %v3594_v59 }
 0xc91   :  { %v11113_v63 = vpop.eup %11112 }
 0xc92   :  { %v11115_v4 = vpop.eup %11114  ;;  %v3600_v5 = vmul.f32 %v11113_v63, %v3598_v2 }
 0xc93   :  { %v3607_v6 = vmul.f32 %v11115_v4, %v3605_v3  ;;  %v3603_v51 = vsub.f32 1.0, %v11115_v4 }
 0xc94   :  { %v3601_v45 = vadd.f32 %v3600_v5, %v12046_v54 }
 0xc96   :  { %11116 = vtanh.f32 %v3601_v45 }
 0xca0   :  { %v11117_v7 = vpop.eup %11116 }
 0xca1   :  { %v3604_v35 = vmul.f32 %v11117_v7, %v3603_v51 }
 0xca3   :  { %v3608_v8 = vadd.f32 %v3607_v6, %v3604_v35 }
 0xca5   :  { %3609 = vst.msk [vmem:[#allocation2] sm:$0x30] %vm1571_vm5, %v3608_v8  ;;  %v3611_v9 = vrot.slane %v3608_v8, 4  ;;  %v3852_v38 = vrot.slane %v3608_v8, 6 }
 0xca7   :  { %10206 = vmatmul.mubr.msk.f32.vlgmr.msra.gmra.mrb[40].mxu1 %vm773_vm3, %v3611_v9  ;;  %10213 = vmatmul.mubr.msk.f32.vlgmr.msra.gmra.mrb[42].mxu0 %vm773_vm3, %v3611_v9 }
 0xca8   :  { %10803 = vmatpush3.bf16.msra.mxu1 %v12056_v60  ;;  %10219 = vmatprep.mubr.msk.f32.mxu1 %vm11477_vm0, %v11478_v1 }
 0xca9   :  { %10806 = vmatpush3.bf16.msra.mxu0 %v12015_v17  ;;  %10807 = vmatprep.subr.bf16.mxu1 %v11476_v0 }
 0xcaa   :  { %10226 = vmatprep.mubr.msk.f32.mxu0 %vm11477_vm0, %v11478_v1  ;;  %10810 = vmatprep.subr.bf16.mxu0 %v11476_v0 }
 0xcab   :  { %10220 = vmatmul.mubr.msk.f32.vlgmr.msra.gmra.mrb[42].mxu1 %vm773_vm3, %v3611_v9 }
 0xcac   :  { %10809 = vmatpush3.bf16.msra.mxu1 %v12020_v19  ;;  %10233 = vmatprep.mubr.msk.f32.mxu1 %vm11477_vm0, %v11478_v1 }
 0xcad   :  { %10813 = vmatprep.subr.bf16.mxu1 %v11476_v0 }
 0xd7a   :  { %v3680_v42 = vpop.f32.mrb[40].mxu1  ;;  %v3750_v11 = vpop.f32.mrb[42].mxu0 }
 0xd7b   :  { %v3681_v43 = vadd.f32 %v12030_v27, %v3680_v42  ;;  %v3751_v12 = vadd.f32 %v12038_v33, %v3750_v11  ;;  %v10207_v13 = vpop.f32.mrb[41].mxu1  ;;  %v10214_v14 = vpop.f32.mrb[43].mxu0 }
 0xd7d   :  { %v3825_v15 = vrot.slane %v3681_v43, 2  ;;  %v3835_v16 = vrot.slane %v3751_v12, 2 }
 0xd7e   :  { %v3820_v53 = vpop.f32.mrb[42].mxu1 }
 0xd7f   :  { %v3827_v62 = vadd.f32 %v3825_v15, %v12032_v29  ;;  %v3837_v37 = vadd.f32 %v3835_v16, %v12034_v31  ;;  %v10221_v18 = vpop.f32.mrb[43].mxu1  ;;  %v3821_v30 = vadd.f32 %v12044_v50, %v3820_v53 }
 0xd81   :  { %v9382_v20 = vmul.f32 -1.442695, %v3827_v62  ;;  %v9383_v21 = vmul.f32 -1.442695, %v3837_v37  ;;  %v3845_v32 = vrot.slane %v3821_v30, 2 }
 0xd83   :  { %11118 = vpow2.f32 %v9382_v20 }
 0xd84   :  { %11120 = vpow2.f32 %v9383_v21 }
 0xd8d   :  { %v11119_v22 = vpop.eup %11118 }
 0xd8e   :  { %v11121_v23 = vpop.eup %11120  ;;  %v3831_v26 = vadd.f32 1.0, %v11119_v22 }
 0xd8f   :  { %v3841_v28 = vadd.f32 1.0, %v11121_v23 }
 0xd90   :  { %11122 = vrcp.f32 %v3831_v26 }
 0xd91   :  { %11124 = vrcp.f32 %v3841_v28 }
 0xd9a   :  { %v11123_v34 = vpop.eup %11122 }
 0xd9b   :  { %v11125_v39 = vpop.eup %11124  ;;  %v3847_v29 = vmul.f32 %v11123_v34, %v3845_v32 }
 0xd9c   :  { %v3854_v10 = vmul.f32 %v11125_v39, %v3852_v38  ;;  %v3850_v40 = vsub.f32 1.0, %v11125_v39 }
 0xd9d   :  { %v3848_v31 = vadd.f32 %v3847_v29, %v12046_v54 }
 0xd9f   :  { %11126 = vtanh.f32 %v3848_v31 }
 0xda9   :  { %v11127_v41 = vpop.eup %11126 }
 0xdaa   :  { %v3851_v44 = vmul.f32 %v11127_v41, %v3850_v40 }
 0xdac   :  { %v3855_v46 = vadd.f32 %v3854_v10, %v3851_v44 }
 0xdae   :  { %3856 = vst.msk [vmem:[#allocation2] sm:$0xc0] %vm1819_vm6, %v3855_v46  ;;  %v3858_v48 = vrot.slane %v3855_v46, 6 }
 0xdb0   :  { %10227 = vmatmul.mubr.msk.f32.vlgmr.msra.gmra.mrb[44].mxu0 %vm773_vm3, %v3858_v48  ;;  %10234 = vmatmul.mubr.msk.f32.vlgmr.msra.gmra.mrb[44].mxu1 %vm773_vm3, %v3858_v48 }
 0xdb1   :  { %10812 = vmatpush3.bf16.msra.mxu0 %v12056_v60  ;;  %10240 = vmatprep.mubr.msk.f32.mxu0 %vm11477_vm0, %v11478_v1 }
 0xdb2   :  { %10815 = vmatpush3.bf16.msra.mxu1 %v12015_v17  ;;  %10816 = vmatprep.subr.bf16.mxu0 %v11476_v0 }
 0xdb3   :  { %10247 = vmatprep.mubr.msk.f32.mxu1 %vm11477_vm0, %v11478_v1  ;;  %10819 = vmatprep.subr.bf16.mxu1 %v11476_v0 }
 0xdb4   :  { %10241 = vmatmul.mubr.msk.f32.vlgmr.msra.gmra.mrb[46].mxu0 %vm773_vm3, %v3858_v48 }
 0xdb5   :  { %10818 = vmatpush3.bf16.msra.mxu0 %v12020_v19  ;;  %10254 = vmatprep.mubr.msk.f32.mxu0 %vm11477_vm0, %v11478_v1 }
 0xdb6   :  { %10822 = vmatprep.subr.bf16.mxu0 %v11476_v0 }
 0xe83   :  { %v3927_v54 = vpop.f32.mrb[44].mxu0  ;;  %v3997_v52 = vpop.f32.mrb[44].mxu1 }
 0xe84   :  { %v3928_v55 = vadd.f32 %v12030_v27, %v3927_v54  ;;  %v10228_v47 = vpop.f32.mrb[45].mxu0  ;;  %v10235_v56 = vpop.f32.mrb[45].mxu1  ;;  %v3998_v49 = vadd.f32 %v12038_v33, %v3997_v52 }
 0xe86   :  { %v4071_v57 = vadd.f32 %v3928_v55, %v12026_v24  ;;  %v4078_v2 = vadd.f32 %v3998_v49, %v12028_v25 }
 0xe87   :  { %v4067_v58 = vpop.f32.mrb[46].mxu0 }
 0xe88   :  { %v9387_v59 = vmul.f32 -1.442695, %v4071_v57  ;;  %v10242_v61 = vpop.f32.mrb[47].mxu0  ;;  %v9388_v63 = vmul.f32 -1.442695, %v4078_v2  ;;  %v4068_v45 = vadd.f32 %v12044_v50, %v4067_v58 }
 0xe8a   :  { %11128 = vpow2.f32 %v9387_v59 }
 0xe8b   :  { %11130 = vpow2.f32 %v9388_v63 }
 0xe94   :  { %v11129_v3 = vpop.eup %11128 }
 0xe95   :  { %v4075_v4 = vadd.f32 1.0, %v11129_v3  ;;  %v11131_v5 = vpop.eup %11130 }
 0xe96   :  { %v4082_v6 = vadd.f32 1.0, %v11131_v5 }
 0xe97   :  { %11132 = vrcp.f32 %v4075_v4 }
 0xe98   :  { %11134 = vrcp.f32 %v4082_v6 }
 0xea1   :  { %v11133_v51 = vpop.eup %11132 }
 0xea2   :  { %v4085_v7 = vmul.f32 %v11133_v51, %v4068_v45  ;;  %v11135_v8 = vpop.eup %11134 }
 0xea3   :  { %v4088_v9 = vsub.f32 1.0, %v11135_v8  ;;  %v4091_v43 = vmul.f32 %v11135_v8, %v3858_v48 }
 0xea4   :  { %v4086_v35 = vadd.f32 %v4085_v7, %v12040_v36 }
 0xea6   :  { %11136 = vtanh.f32 %v4086_v35 }
 0xeb0   :  { %v11137_v42 = vpop.eup %11136 }
 0xeb1   :  { %v4089_v11 = vmul.f32 %v11137_v42, %v4088_v9 }
 0xeb3   :  { %v4092_v12 = vadd.f32 %v4091_v43, %v4089_v11 }
 0xeb5   :  { %4093 = vst.msk [vmem:[#allocation2 + $0x8] sm:$0x3] %vm172_vm2, %v4092_v12  ;;  %10248 = vmatmul.mubr.msk.f32.vlgmr.msra.gmra.mrb[46].mxu1 %vm773_vm3, %v4092_v12  ;;  %10255 = vmatmul.mubr.msk.f32.vlgmr.msra.gmra.mrb[48].mxu0 %vm773_vm3, %v4092_v12  ;;  %v4335_v31 = vrot.slane %v4092_v12, 6 }
 0xeb6   :  { %10821 = vmatpush3.bf16.msra.mxu1 %v12056_v60  ;;  %10261 = vmatprep.mubr.msk.f32.mxu1 %vm11477_vm0, %v11478_v1 }
 0xeb7   :  { %10824 = vmatpush3.bf16.msra.mxu0 %v12015_v17  ;;  %10825 = vmatprep.subr.bf16.mxu1 %v11476_v0 }
 0xeb8   :  { %10268 = vmatprep.mubr.msk.f32.mxu0 %vm11477_vm0, %v11478_v1  ;;  %10828 = vmatprep.subr.bf16.mxu0 %v11476_v0 }
 0xeb9   :  { %10262 = vmatmul.mubr.msk.f32.vlgmr.msra.gmra.mrb[48].mxu1 %vm773_vm3, %v4092_v12 }
 0xeba   :  { %10827 = vmatpush3.bf16.msra.mxu1 %v12020_v19  ;;  %10275 = vmatprep.mubr.msk.f32.mxu1 %vm11477_vm0, %v11478_v1 }
 0xebb   :  { %10831 = vmatprep.subr.bf16.mxu1 %v11476_v0 }
 0xf88   :  { %v4163_v13 = vpop.f32.mrb[46].mxu1  ;;  %v4233_v14 = vpop.f32.mrb[48].mxu0 }
 0xf89   :  { %v4164_v15 = vadd.f32 %v12030_v27, %v4163_v13  ;;  %v4234_v16 = vadd.f32 %v12038_v33, %v4233_v14  ;;  %v10249_v53 = vpop.f32.mrb[47].mxu1  ;;  %v10256_v62 = vpop.f32.mrb[49].mxu0 }
 0xf8b   :  { %v4308_v37 = vrot.slane %v4164_v15, 6  ;;  %v4318_v18 = vrot.slane %v4234_v16, 6 }
 0xf8c   :  { %v4303_v20 = vpop.f32.mrb[48].mxu1 }
 0xf8d   :  { %v4310_v21 = vadd.f32 %v4308_v37, %v12026_v24  ;;  %v4320_v22 = vadd.f32 %v4318_v18, %v12028_v25  ;;  %v10263_v23 = vpop.f32.mrb[49].mxu1  ;;  %v4304_v39 = vadd.f32 %v12044_v50, %v4303_v20  ;;  %v4834_v18 = vld [vmem:[#allocation2] sm:$0xff] }
 0xf8e   :  { %v9404_v20 = vld [vmem:[%s12863_s3 + $0x60] sm:$0xff]  ;;  %v9410_v23 = vld [vmem:[%s12863_s3 + $0x78] sm:$0xff] }
 0xf8f   :  { %v9392_v26 = vmul.f32 -1.442695, %v4310_v21  ;;  %v9393_v28 = vmul.f32 -1.442695, %v4320_v22  ;;  %v4328_v29 = vrot.slane %v4304_v39, 6  ;;  %v9405_v21 = vld [vmem:[%s12863_s3 + $0x68] sm:$0xff] }
 0xf90   :  { %v10840_v22 = vpack.c.bf16 %v9405_v21, %v9404_v20 }
 0xf91   :  { %11138 = vpow2.f32 %v9392_v26 }
 0xf92   :  { %11140 = vpow2.f32 %v9393_v28  ;;  %v9414_v28 = vld [vmem:[%s12863_s3 + $0x80] sm:$0xff] }
 0xf9b   :  { %v11139_v30 = vpop.eup %11138 }
 0xf9c   :  { %v11141_v32 = vpop.eup %11140  ;;  %v4314_v34 = vadd.f32 1.0, %v11139_v30  ;;  %v9415_v30 = vld [vmem:[%s12863_s3 + $0x88] sm:$0xff] }
 0xf9d   :  { %v4324_v38 = vadd.f32 1.0, %v11141_v32  ;;  %v10848_v32 = vpack.c.bf16 %v9415_v30, %v9414_v28 }
 0xf9e   :  { %11142 = vrcp.f32 %v4314_v34 }
 0xf9f   :  { %11144 = vrcp.f32 %v4324_v38 }
 0xfa8   :  { %v11143_v10 = vpop.eup %11142 }
 0xfa9   :  { %v11145_v40 = vpop.eup %11144  ;;  %v4330_v41 = vmul.f32 %v11143_v10, %v4328_v29 }
 0xfaa   :  { %v4337_v44 = vmul.f32 %v11145_v40, %v4335_v31  ;;  %v4333_v48 = vsub.f32 1.0, %v11145_v40 }
 0xfab   :  { %v4331_v46 = vadd.f32 %v4330_v41, %v12040_v36 }
 0xfad   :  { %11146 = vtanh.f32 %v4331_v46 }
 0xfb7   :  { %v11147_v54 = vpop.eup %11146 }
 0xfb8   :  { %v4334_v52 = vmul.f32 %v11147_v54, %v4333_v48 }
 0xfba   :  { %v4338_v55 = vadd.f32 %v4337_v44, %v4334_v52 }
 0xfbc   :  { %4339 = vst.msk [vmem:[#allocation2 + $0x8] sm:$0xc] %vm1323_vm4, %v4338_v55  ;;  %v4341_v47 = vrot.slane %v4338_v55, 2  ;;  %v4582_v11 = vrot.slane %v4338_v55, 6 }
 0xfbe   :  { %10269 = vmatmul.mubr.msk.f32.vlgmr.msra.gmra.mrb[50].mxu0 %vm773_vm3, %v4341_v47  ;;  %10276 = vmatmul.mubr.msk.f32.vlgmr.msra.gmra.mrb[50].mxu1 %vm773_vm3, %v4341_v47 }
 0xfbf   :  { %10830 = vmatpush3.bf16.msra.mxu0 %v12056_v60  ;;  %10282 = vmatprep.mubr.msk.f32.mxu0 %vm11477_vm0, %v11478_v1 }
 0xfc0   :  { %10833 = vmatpush3.bf16.msra.mxu1 %v12015_v17  ;;  %10834 = vmatprep.subr.bf16.mxu0 %v11476_v0 }
 0xfc1   :  { %10289 = vmatprep.mubr.msk.f32.mxu1 %vm11477_vm0, %v11478_v1  ;;  %10837 = vmatprep.subr.bf16.mxu1 %v11476_v0 }
 0xfc2   :  { %10283 = vmatmul.mubr.msk.f32.vlgmr.msra.gmra.mrb[52].mxu0 %vm773_vm3, %v4341_v47 }
 0xfc3   :  { %10836 = vmatpush3.bf16.msra.mxu0 %v12020_v19  ;;  %10296 = vmatprep.mubr.msk.f32.mxu0 %vm11477_vm0, %v11478_v1 }
 0xfc4   :  { %10841 = vmatprep.subr.bf16.mxu0 %v10840_v22 }
0x1091   :  { %v4410_v56 = vpop.f32.mrb[50].mxu0  ;;  %v4480_v49 = vpop.f32.mrb[50].mxu1 }
0x1092   :  { %v4411_v57 = vadd.f32 %v12030_v27, %v4410_v56  ;;  %v4481_v17 = vadd.f32 %v12038_v33, %v4480_v49  ;;  %v10270_v58 = vpop.f32.mrb[51].mxu0  ;;  %v10277_v59 = vpop.f32.mrb[51].mxu1 }
0x1094   :  { %v4555_v61 = vrot.slane %v4411_v57, 4  ;;  %v4565_v2 = vrot.slane %v4481_v17, 4 }
0x1095   :  { %v4550_v63 = vpop.f32.mrb[52].mxu0 }
0x1096   :  { %v4557_v3 = vadd.f32 %v4555_v61, %v12026_v24  ;;  %v4567_v4 = vadd.f32 %v4565_v2, %v12028_v25  ;;  %v10284_v5 = vpop.f32.mrb[53].mxu0  ;;  %v4551_v8 = vadd.f32 %v12044_v50, %v4550_v63 }
0x1098   :  { %v9397_v19 = vmul.f32 -1.442695, %v4557_v3  ;;  %v9398_v6 = vmul.f32 -1.442695, %v4567_v4  ;;  %v4575_v9 = vrot.slane %v4551_v8, 4 }
0x109a   :  { %11148 = vpow2.f32 %v9397_v19  ;;  %v9421_v19 = vld [vmem:[%s12864_s4 + $0x70] sm:$0xff] }
0x109b   :  { %11150 = vpow2.f32 %v9398_v6 }
0x10a4   :  { %v11149_v45 = vpop.eup %11148 }
0x10a5   :  { %v11151_v51 = vpop.eup %11150  ;;  %v4561_v7 = vadd.f32 1.0, %v11149_v45  ;;  %v9422_v45 = vld [vmem:[%s12864_s4 + $0x78] sm:$0xff] }
0x10a6   :  { %v4571_v35 = vadd.f32 1.0, %v11151_v51  ;;  %v12247_v51 = vpack.c.bf16 %v9422_v45, %v9421_v19 }
0x10a7   :  { %11152 = vrcp.f32 %v4561_v7  ;;  %v9406_v7 = vld [vmem:[#allocation8 + $0x6] ss:$0 sm:$0xff] }
0x10a8   :  { %11154 = vrcp.f32 %v4571_v35  ;;  %v9411_v35 = vld [vmem:[#allocation8 + $0x7] ss:$0 sm:$0xff] }
0x10b1   :  { %v11153_v42 = vpop.eup %11152 }
0x10b2   :  { %v11155_v43 = vpop.eup %11154  ;;  %v4577_v12 = vmul.f32 %v11153_v42, %v4575_v9 }
0x10b3   :  { %v4584_v13 = vmul.f32 %v11155_v43, %v4582_v11  ;;  %v4580_v15 = vsub.f32 1.0, %v11155_v43 }
0x10b4   :  { %v4578_v14 = vadd.f32 %v4577_v12, %v12040_v36  ;;  %v12257_v12 = vld [vmem:[#allocation9 + $0x6] ss:$0 sm:$0xff] }
0x10b6   :  { %11156 = vtanh.f32 %v4578_v14 }
0x10c0   :  { %v11157_v16 = vpop.eup %11156 }
0x10c1   :  { %v4581_v53 = vmul.f32 %v11157_v16, %v4580_v15  ;;  %v9416_v15 = vld [vmem:[#allocation8 + $0x8] ss:$0 sm:$0xff] }
0x10c3   :  { %v4585_v62 = vadd.f32 %v4584_v13, %v4581_v53 }
0x10c5   :  { %4586 = vst.msk [vmem:[#allocation2 + $0x8] sm:$0x30] %vm1571_vm5, %v4585_v62  ;;  %v4588_v37 = vrot.slane %v4585_v62, 4  ;;  %v4829_v58 = vrot.slane %v4585_v62, 6  ;;  %v12265_v62 = vld [vmem:[#allocation9 + $0x7] ss:$0 sm:$0xff] }
0x10c7   :  { %10290 = vmatmul.mubr.msk.f32.vlgmr.msra.gmra.mrb[52].mxu1 %vm773_vm3, %v4588_v37  ;;  %10297 = vmatmul.mubr.msk.f32.vlgmr.msra.gmra.mrb[54].mxu0 %vm773_vm3, %v4588_v37 }
0x10c8   :  { %10839 = vmatpush3.bf16.msra.mxu1 %v12056_v60  ;;  %10310 = vmatprep.mubr.msk.f32.mxu0 %vm773_vm3, %v4834_v18  ;;  %v9409_v60 = vld [vmem:[%s12863_s3 + $0x70] sm:$0xff] }
0x10c9   :  { %10303 = vmatprep.mubr.msk.f32.mxu1 %vm11477_vm0, %v11478_v1  ;;  %v10844_v26 = vpack.c.bf16 %v9410_v23, %v9409_v60  ;;  %10843 = vmatpush3.bf16.msra.mxu0 %v10840_v22 }
0x10ca   :  { %10849 = vmatprep.subr.bf16.mxu0 %v10848_v32 }
0x10cb   :  { %10304 = vmatmul.mubr.msk.f32.vlgmr.msra.gmra.mrb[54].mxu1 %vm773_vm3, %v4588_v37  ;;  %10845 = vmatprep.subr.bf16.mxu1 %v10844_v26 }
0x10cc   :  { %10317 = vmatprep.mubr.msk.f32.mxu1 %vm773_vm3, %v4834_v18  ;;  %10847 = vmatpush3.bf16.msra.mxu1 %v10844_v26 }
0x10cd   :  { %10852 = vmatprep.subr.bf16.mxu1 %v11476_v0 }
0x119a   :  { %v4657_v34 = vpop.f32.mrb[52].mxu1  ;;  %v4727_v38 = vpop.f32.mrb[54].mxu0 }
0x119b   :  { %v4658_v39 = vadd.f32 %v12030_v27, %v4657_v34  ;;  %v4728_v29 = vadd.f32 %v12038_v33, %v4727_v38  ;;  %v10291_v10 = vpop.f32.mrb[53].mxu1  ;;  %v10298_v31 = vpop.f32.mrb[55].mxu0 }
0x119c   :  { %v9423_v31 = vld [vmem:[%s12864_s4 + $0x80] sm:$0xff] }
0x119d   :  { %v4802_v40 = vrot.slane %v4658_v39, 2  ;;  %v4812_v41 = vrot.slane %v4728_v29, 2 }
0x119e   :  { %v4797_v44 = vpop.f32.mrb[54].mxu1 }
0x119f   :  { %v4804_v46 = vadd.f32 %v4802_v40, %v12026_v24  ;;  %v4814_v48 = vadd.f32 %v4812_v41, %v12028_v25  ;;  %v10305_v54 = vpop.f32.mrb[55].mxu1  ;;  %v4798_v33 = vadd.f32 %v12044_v50, %v4797_v44  ;;  %v9420_v50 = vld [vmem:[%s12864_s4 + $0x68] sm:$0xff] }
0x11a0   :  { %v9424_v40 = vld [vmem:[%s12864_s4 + $0x88] sm:$0xff] }
0x11a1   :  { %v9402_v52 = vmul.f32 -1.442695, %v4804_v46  ;;  %v9403_v55 = vmul.f32 -1.442695, %v4814_v48  ;;  %v4822_v57 = vrot.slane %v4798_v33, 2  ;;  %v12283_v46 = vpack.c.bf16 %v9424_v40, %v9423_v31 }
0x11a3   :  { %11158 = vpow2.f32 %v9402_v52 }
0x11a4   :  { %11160 = vpow2.f32 %v9403_v55 }
0x11ad   :  { %v11159_v47 = vpop.eup %11158 }
0x11ae   :  { %v11161_v56 = vpop.eup %11160  ;;  %v4808_v49 = vadd.f32 1.0, %v11159_v47 }
0x11af   :  { %v4818_v27 = vadd.f32 1.0, %v11161_v56 }
0x11b0   :  { %11162 = vrcp.f32 %v4808_v49 }
0x11b1   :  { %11164 = vrcp.f32 %v4818_v27 }
0x11ba   :  { %v11163_v17 = vpop.eup %11162 }
0x11bb   :  { %v11165_v59 = vpop.eup %11164  ;;  %v4824_v24 = vmul.f32 %v11163_v17, %v4822_v57 }
0x11bc   :  { %v4831_v61 = vmul.f32 %v11165_v59, %v4829_v58  ;;  %v4827_v2 = vsub.f32 1.0, %v11165_v59 }
0x11bd   :  { %v4825_v25 = vadd.f32 %v4824_v24, %v12040_v36  ;;  %v9419_v36 = vld [vmem:[%s12864_s4 + $0x60] sm:$0xff] }
0x11be   :  { %v12242_v6 = vpack.c.bf16 %v9420_v50, %v9419_v36 }
0x11bf   :  { %11166 = vtanh.f32 %v4825_v25 }
0x11c9   :  { %v11167_v63 = vpop.eup %11166 }
0x11ca   :  { %v4828_v3 = vmul.f32 %v11167_v63, %v4827_v2 }
0x11cc   :  { %v4832_v4 = vadd.f32 %v4831_v61, %v4828_v3 }
0x11ce   :  { %4833 = vst.msk [vmem:[#allocation2 + $0x8] sm:$0xc0] %vm1819_vm6, %v4832_v4 }
0x11d5   :  { %v4835_v5 = vld [vmem:[#allocation2 + $0x8] sm:$0xff] }
0x11d6   :  { %10311 = vmatmul.mubr.msk.f32.vlgmr.msra.gmra.mrb[56].mxu0 %vm773_vm3, %v4835_v5  ;;  %10318 = vmatmul.mubr.msk.f32.vlgmr.msra.gmra.mrb[56].mxu1 %vm773_vm3, %v4835_v5 }
0x11d7   :  { %10851 = vmatpush3.bf16.msra.mxu0 %v10848_v32  ;;  %10324 = vmatprep.mubr.msk.f32.mxu0 %vm773_vm3, %v4834_v18  ;;  %v12271_v32 = vld [vmem:[#allocation9 + $0x8] ss:$0 sm:$0xff] }
0x11d8   :  { %10855 = vmatprep.subr.bf16.mxu0 %v11476_v0  ;;  %10331 = vmatprep.mubr.msk.f32.mxu1 %vm11477_vm0, %v11478_v1 }
0x11d9   :  { %10854 = vmatpush3.bf16.msra.mxu1 %v12242_v6 }
0x11da   :  { %10325 = vmatmul.mubr.msk.f32.vlgmr.msra.gmra.mrb[58].mxu0 %vm773_vm3, %v4835_v5  ;;  %10858 = vmatprep.subr.bf16.mxu1 %v11476_v0 }
0x11db   :  { %10338 = vmatprep.mubr.msk.f32.mxu0 %vm11477_vm0, %v11478_v1  ;;  %10857 = vmatpush3.bf16.msra.mxu0 %v12247_v51 }
0x11dc   :  { %10861 = vmatprep.subr.bf16.mxu0 %v11476_v0 }
0x12a9   :  { %v10312_v8 = vpop.f32.mrb[56].mxu0  ;;  %v10319_v9 = vpop.f32.mrb[56].mxu1 }
0x12aa   :  { %v12253_v42 = vadd.f32 %v10312_v8, %v9406_v7  ;;  %v12255_v11 = vadd.f32 %v10319_v9, %v9411_v35  ;;  %v4919_v43 = vpop.f32.mrb[57].mxu0  ;;  %v5005_v13 = vpop.f32.mrb[57].mxu1 }
0x12ab   :  { %v12259_v14 = vadd.f32 %v9406_v7, %v4919_v43  ;;  %v12261_v16 = vadd.f32 %v9411_v35, %v5005_v13 }
0x12ad   :  { %v5121_v53 = vadd.f32 %v12257_v12, %v12259_v14  ;;  %v10326_v37 = vpop.f32.mrb[58].mxu0  ;;  %v5134_v60 = vadd.f32 %v12265_v62, %v12261_v16 }
0x12ae   :  { %v12267_v18 = vadd.f32 %v10326_v37, %v9416_v15  ;;  %v5091_v20 = vpop.f32.mrb[59].mxu0 }
0x12af   :  { %v9426_v21 = vmul.f32 -1.442695, %v5121_v53  ;;  %v9428_v22 = vmul.f32 -1.442695, %v5134_v60  ;;  %v12273_v38 = vadd.f32 %v9416_v15, %v5091_v20 }
0x12b1   :  { %11168 = vpow2.f32 %v9426_v21 }
0x12b2   :  { %11170 = vpow2.f32 %v9428_v22 }
0x12bb   :  { %v11169_v23 = vpop.eup %11168 }
0x12bc   :  { %v5125_v26 = vadd.f32 1.0, %v11169_v23  ;;  %v11171_v28 = vpop.eup %11170 }
0x12bd   :  { %v5138_v30 = vadd.f32 1.0, %v11171_v28 }
0x12be   :  { %11172 = vrcp.f32 %v5125_v26 }
0x12bf   :  { %11174 = vrcp.f32 %v5138_v30 }
0x12c8   :  { %v11173_v34 = vpop.eup %11172 }
0x12c9   :  { %v5147_v39 = vmul.f32 %v11173_v34, %v12271_v32  ;;  %v11175_v10 = vpop.eup %11174 }
0x12ca   :  { %v5150_v41 = vsub.f32 1.0, %v11175_v10 }
0x12cb   :  { %v5148_v29 = vadd.f32 %v5147_v39, %v12273_v38 }
0x12cd   :  { %11176 = vtanh.f32 %v5148_v29 }
0x12d7   :  { %v11177_v44 = vpop.eup %11176 }
0x12d8   :  { %v5151_v48 = vmul.f32 %v11177_v44, %v5150_v41 }
0x12da   :  { %5152 = vst.msk [vmem:[#allocation2] sm:$0x3] %vm172_vm2, %v5151_v48  ;;  %10332 = vmatmul.mubr.msk.f32.vlgmr.msra.gmra.mrb[58].mxu1 %vm773_vm3, %v5151_v48  ;;  %10339 = vmatmul.mubr.msk.f32.vlgmr.msra.gmra.mrb[60].mxu0 %vm773_vm3, %v5151_v48  ;;  %v5394_v50 = vrot.slane %v5151_v48, 6 }
0x12db   :  { %10860 = vmatpush3.bf16.msra.mxu1 %v12283_v46  ;;  %10345 = vmatprep.mubr.msk.f32.mxu1 %vm11477_vm0, %v11478_v1 }
0x12dc   :  { %10863 = vmatpush3.bf16.msra.mxu0 %v12242_v6  ;;  %10864 = vmatprep.subr.bf16.mxu1 %v11476_v0 }
0x12dd   :  { %10352 = vmatprep.mubr.msk.f32.mxu0 %vm11477_vm0, %v11478_v1  ;;  %10867 = vmatprep.subr.bf16.mxu0 %v11476_v0 }
0x12de   :  { %10346 = vmatmul.mubr.msk.f32.vlgmr.msra.gmra.mrb[60].mxu1 %vm773_vm3, %v5151_v48 }
0x12df   :  { %10866 = vmatpush3.bf16.msra.mxu1 %v12247_v51  ;;  %10359 = vmatprep.mubr.msk.f32.mxu1 %vm11477_vm0, %v11478_v1 }
0x12e0   :  { %10870 = vmatprep.subr.bf16.mxu1 %v11476_v0 }
0x13ad   :  { %v5222_v54 = vpop.f32.mrb[58].mxu1  ;;  %v5292_v52 = vpop.f32.mrb[60].mxu0 }
0x13ae   :  { %v5223_v55 = vadd.f32 %v12257_v12, %v5222_v54  ;;  %v5293_v47 = vadd.f32 %v12265_v62, %v5292_v52  ;;  %v10333_v56 = vpop.f32.mrb[59].mxu1  ;;  %v10340_v49 = vpop.f32.mrb[61].mxu0 }
0x13b0   :  { %v5367_v27 = vrot.slane %v5223_v55, 6  ;;  %v5377_v33 = vrot.slane %v5293_v47, 6 }
0x13b1   :  { %v5362_v57 = vpop.f32.mrb[60].mxu1 }
0x13b2   :  { %v5369_v17 = vadd.f32 %v5367_v27, %v12259_v14  ;;  %v5379_v58 = vadd.f32 %v5377_v33, %v12261_v16  ;;  %v10347_v59 = vpop.f32.mrb[61].mxu1  ;;  %v5363_v4 = vadd.f32 %v12271_v32, %v5362_v57 }
0x13b4   :  { %v9433_v24 = vmul.f32 -1.442695, %v5369_v17  ;;  %v9434_v61 = vmul.f32 -1.442695, %v5379_v58  ;;  %v5387_v5 = vrot.slane %v5363_v4, 6 }
0x13b6   :  { %11178 = vpow2.f32 %v9433_v24 }
0x13b7   :  { %11180 = vpow2.f32 %v9434_v61 }
0x13c0   :  { %v11179_v25 = vpop.eup %11178 }
0x13c1   :  { %v11181_v2 = vpop.eup %11180  ;;  %v5373_v63 = vadd.f32 1.0, %v11179_v25 }
0x13c2   :  { %v5383_v3 = vadd.f32 1.0, %v11181_v2 }
0x13c3   :  { %11182 = vrcp.f32 %v5373_v63 }
0x13c4   :  { %11184 = vrcp.f32 %v5383_v3 }
0x13cd   :  { %v11183_v36 = vpop.eup %11182 }
0x13ce   :  { %v11185_v19 = vpop.eup %11184  ;;  %v5389_v45 = vmul.f32 %v11183_v36, %v5387_v5 }
0x13cf   :  { %v5396_v7 = vmul.f32 %v11185_v19, %v5394_v50  ;;  %v5392_v8 = vsub.f32 1.0, %v11185_v19 }
0x13d0   :  { %v5390_v35 = vadd.f32 %v5389_v45, %v12273_v38 }
0x13d2   :  { %11186 = vtanh.f32 %v5390_v35 }
0x13dc   :  { %v11187_v9 = vpop.eup %11186 }
0x13dd   :  { %v5393_v43 = vmul.f32 %v11187_v9, %v5392_v8 }
0x13df   :  { %v5397_v13 = vadd.f32 %v5396_v7, %v5393_v43 }
0x13e1   :  { %5398 = vst.msk [vmem:[#allocation2] sm:$0xc] %vm1323_vm4, %v5397_v13  ;;  %v5400_v15 = vrot.slane %v5397_v13, 2  ;;  %v5641_v55 = vrot.slane %v5397_v13, 6 }
0x13e3   :  { %10353 = vmatmul.mubr.msk.f32.vlgmr.msra.gmra.mrb[62].mxu0 %vm773_vm3, %v5400_v15  ;;  %10360 = vmatmul.mubr.msk.f32.vlgmr.msra.gmra.mrb[62].mxu1 %vm773_vm3, %v5400_v15 }
0x13e4   :  { %10869 = vmatpush3.bf16.msra.mxu0 %v12283_v46  ;;  %10366 = vmatprep.mubr.msk.f32.mxu0 %vm11477_vm0, %v11478_v1 }
0x13e5   :  { %10872 = vmatpush3.bf16.msra.mxu1 %v12242_v6  ;;  %10873 = vmatprep.subr.bf16.mxu0 %v11476_v0 }
0x13e6   :  { %10373 = vmatprep.mubr.msk.f32.mxu1 %vm11477_vm0, %v11478_v1  ;;  %10876 = vmatprep.subr.bf16.mxu1 %v11476_v0 }
0x13e7   :  { %10367 = vmatmul.mubr.msk.f32.vlgmr.msra.gmra.mrb[64].mxu0 %vm773_vm3, %v5400_v15 }
0x13e8   :  { %10875 = vmatpush3.bf16.msra.mxu0 %v12247_v51  ;;  %10380 = vmatprep.mubr.msk.f32.mxu0 %vm11477_vm0, %v11478_v1 }
0x13e9   :  { %10879 = vmatprep.subr.bf16.mxu0 %v11476_v0 }
0x14b6   :  { %v5469_v53 = vpop.f32.mrb[62].mxu0  ;;  %v5539_v37 = vpop.f32.mrb[62].mxu1 }
0x14b7   :  { %v5470_v20 = vadd.f32 %v12257_v12, %v5469_v53  ;;  %v5540_v21 = vadd.f32 %v12265_v62, %v5539_v37  ;;  %v10354_v60 = vpop.f32.mrb[63].mxu0  ;;  %v10361_v22 = vpop.f32.mrb[63].mxu1 }
0x14b9   :  { %v5614_v23 = vrot.slane %v5470_v20, 4  ;;  %v5624_v26 = vrot.slane %v5540_v21, 4 }
0x14ba   :  { %v5609_v28 = vpop.f32.mrb[64].mxu0 }
0x14bb   :  { %v5616_v30 = vadd.f32 %v5614_v23, %v12259_v14  ;;  %v5626_v34 = vadd.f32 %v5624_v26, %v12261_v16  ;;  %v10368_v39 = vpop.f32.mrb[65].mxu0  ;;  %v5610_v48 = vadd.f32 %v12271_v32, %v5609_v28 }
0x14bd   :  { %v9438_v29 = vmul.f32 -1.442695, %v5616_v30  ;;  %v9439_v10 = vmul.f32 -1.442695, %v5626_v34  ;;  %v5634_v54 = vrot.slane %v5610_v48, 4 }
0x14bf   :  { %11188 = vpow2.f32 %v9438_v29 }
0x14c0   :  { %11190 = vpow2.f32 %v9439_v10 }
0x14c9   :  { %v11189_v31 = vpop.eup %11188 }
0x14ca   :  { %v11191_v40 = vpop.eup %11190  ;;  %v5620_v41 = vadd.f32 1.0, %v11189_v31 }
0x14cb   :  { %v5630_v44 = vadd.f32 1.0, %v11191_v40 }
0x14cc   :  { %11192 = vrcp.f32 %v5620_v41 }
0x14cd   :  { %11194 = vrcp.f32 %v5630_v44 }
0x14d6   :  { %v11193_v52 = vpop.eup %11192 }
0x14d7   :  { %v11195_v47 = vpop.eup %11194  ;;  %v5636_v56 = vmul.f32 %v11193_v52, %v5634_v54 }
0x14d8   :  { %v5643_v49 = vmul.f32 %v11195_v47, %v5641_v55  ;;  %v5639_v33 = vsub.f32 1.0, %v11195_v47 }
0x14d9   :  { %v5637_v27 = vadd.f32 %v5636_v56, %v12273_v38 }
0x14db   :  { %11196 = vtanh.f32 %v5637_v27 }
0x14e5   :  { %v11197_v57 = vpop.eup %11196 }
0x14e6   :  { %v5640_v17 = vmul.f32 %v11197_v57, %v5639_v33 }
0x14e8   :  { %v5644_v58 = vadd.f32 %v5643_v49, %v5640_v17 }
0x14ea   :  { %5645 = vst.msk [vmem:[#allocation2] sm:$0x30] %vm1571_vm5, %v5644_v58  ;;  %v5647_v59 = vrot.slane %v5644_v58, 4  ;;  %v5888_v20 = vrot.slane %v5644_v58, 6 }
0x14ec   :  { %10374 = vmatmul.mubr.msk.f32.vlgmr.msra.gmra.mrb[64].mxu1 %vm773_vm3, %v5647_v59  ;;  %10381 = vmatmul.mubr.msk.f32.vlgmr.msra.gmra.mrb[66].mxu0 %vm773_vm3, %v5647_v59 }
0x14ed   :  { %10878 = vmatpush3.bf16.msra.mxu1 %v12283_v46  ;;  %10387 = vmatprep.mubr.msk.f32.mxu1 %vm11477_vm0, %v11478_v1 }
0x14ee   :  { %10881 = vmatpush3.bf16.msra.mxu0 %v12242_v6  ;;  %10882 = vmatprep.subr.bf16.mxu1 %v11476_v0 }
0x14ef   :  { %10394 = vmatprep.mubr.msk.f32.mxu0 %vm11477_vm0, %v11478_v1  ;;  %10885 = vmatprep.subr.bf16.mxu0 %v11476_v0 }
0x14f0   :  { %10388 = vmatmul.mubr.msk.f32.vlgmr.msra.gmra.mrb[66].mxu1 %vm773_vm3, %v5647_v59 }
0x14f1   :  { %10884 = vmatpush3.bf16.msra.mxu1 %v12247_v51  ;;  %10401 = vmatprep.mubr.msk.f32.mxu1 %vm11477_vm0, %v11478_v1 }
0x14f2   :  { %10888 = vmatprep.subr.bf16.mxu1 %v11476_v0 }
0x15bf   :  { %v5716_v24 = vpop.f32.mrb[64].mxu1  ;;  %v5786_v61 = vpop.f32.mrb[66].mxu0 }
0x15c0   :  { %v5717_v25 = vadd.f32 %v12257_v12, %v5716_v24  ;;  %v5787_v2 = vadd.f32 %v12265_v62, %v5786_v61  ;;  %v10375_v63 = vpop.f32.mrb[65].mxu1  ;;  %v10382_v3 = vpop.f32.mrb[67].mxu0 }
0x15c2   :  { %v5861_v4 = vrot.slane %v5717_v25, 2  ;;  %v5871_v5 = vrot.slane %v5787_v2, 2 }
0x15c3   :  { %v5856_v36 = vpop.f32.mrb[66].mxu1 }
0x15c4   :  { %v5863_v50 = vadd.f32 %v5861_v4, %v12259_v14  ;;  %v5873_v19 = vadd.f32 %v5871_v5, %v12261_v16  ;;  %v10389_v45 = vpop.f32.mrb[67].mxu1  ;;  %v5857_v15 = vadd.f32 %v12271_v32, %v5856_v36 }
0x15c6   :  { %v9443_v7 = vmul.f32 -1.442695, %v5863_v50  ;;  %v9444_v35 = vmul.f32 -1.442695, %v5873_v19  ;;  %v5881_v53 = vrot.slane %v5857_v15, 2 }
0x15c8   :  { %11198 = vpow2.f32 %v9443_v7 }
0x15c9   :  { %11200 = vpow2.f32 %v9444_v35 }
0x15d2   :  { %v11199_v8 = vpop.eup %11198 }
0x15d3   :  { %v11201_v9 = vpop.eup %11200  ;;  %v5867_v43 = vadd.f32 1.0, %v11199_v8 }
0x15d4   :  { %v5877_v13 = vadd.f32 1.0, %v11201_v9 }
0x15d5   :  { %11202 = vrcp.f32 %v5867_v43 }
0x15d6   :  { %11204 = vrcp.f32 %v5877_v13 }
0x15df   :  { %v11203_v37 = vpop.eup %11202 }
0x15e0   :  { %v11205_v21 = vpop.eup %11204  ;;  %v5883_v14 = vmul.f32 %v11203_v37, %v5881_v53 }
0x15e1   :  { %v5890_v60 = vmul.f32 %v11205_v21, %v5888_v20  ;;  %v5886_v22 = vsub.f32 1.0, %v11205_v21 }
0x15e2   :  { %v5884_v16 = vadd.f32 %v5883_v14, %v12273_v38 }
0x15e4   :  { %11206 = vtanh.f32 %v5884_v16 }
0x15ee   :  { %v11207_v23 = vpop.eup %11206 }
0x15ef   :  { %v5887_v26 = vmul.f32 %v11207_v23, %v5886_v22 }
0x15f1   :  { %v5891_v28 = vadd.f32 %v5890_v60, %v5887_v26 }
0x15f3   :  { %5892 = vst.msk [vmem:[#allocation2] sm:$0xc0] %vm1819_vm6, %v5891_v28  ;;  %v5894_v30 = vrot.slane %v5891_v28, 6 }
0x15f5   :  { %10395 = vmatmul.mubr.msk.f32.vlgmr.msra.gmra.mrb[68].mxu0 %vm773_vm3, %v5894_v30  ;;  %10402 = vmatmul.mubr.msk.f32.vlgmr.msra.gmra.mrb[68].mxu1 %vm773_vm3, %v5894_v30 }
0x15f6   :  { %10887 = vmatpush3.bf16.msra.mxu0 %v12283_v46  ;;  %10408 = vmatprep.mubr.msk.f32.mxu0 %vm11477_vm0, %v11478_v1 }
0x15f7   :  { %10890 = vmatpush3.bf16.msra.mxu1 %v12242_v6  ;;  %10891 = vmatprep.subr.bf16.mxu0 %v11476_v0 }
0x15f8   :  { %10415 = vmatprep.mubr.msk.f32.mxu1 %vm11477_vm0, %v11478_v1  ;;  %10894 = vmatprep.subr.bf16.mxu1 %v11476_v0 }
0x15f9   :  { %10409 = vmatmul.mubr.msk.f32.vlgmr.msra.gmra.mrb[70].mxu0 %vm773_vm3, %v5894_v30 }
0x15fa   :  { %10893 = vmatpush3.bf16.msra.mxu0 %v12247_v51  ;;  %10422 = vmatprep.mubr.msk.f32.mxu0 %vm11477_vm0, %v11478_v1 }
0x15fb   :  { %10897 = vmatprep.subr.bf16.mxu0 %v11476_v0 }
0x16c8   :  { %v5963_v38 = vpop.f32.mrb[68].mxu0  ;;  %v6033_v34 = vpop.f32.mrb[68].mxu1 }
0x16c9   :  { %v5964_v39 = vadd.f32 %v12257_v12, %v5963_v38  ;;  %v10396_v29 = vpop.f32.mrb[69].mxu0  ;;  %v10403_v10 = vpop.f32.mrb[69].mxu1  ;;  %v6034_v31 = vadd.f32 %v12265_v62, %v6033_v34 }
0x16cb   :  { %v6107_v40 = vadd.f32 %v5964_v39, %v12253_v42  ;;  %v6114_v54 = vadd.f32 %v6034_v31, %v12255_v11 }
0x16cc   :  { %v6103_v41 = vpop.f32.mrb[70].mxu0 }
0x16cd   :  { %v9448_v44 = vmul.f32 -1.442695, %v6107_v40  ;;  %v10410_v48 = vpop.f32.mrb[71].mxu0  ;;  %v9449_v52 = vmul.f32 -1.442695, %v6114_v54  ;;  %v6104_v27 = vadd.f32 %v12271_v32, %v6103_v41 }
0x16cf   :  { %11208 = vpow2.f32 %v9448_v44 }
0x16d0   :  { %11210 = vpow2.f32 %v9449_v52 }
0x16d9   :  { %v11209_v55 = vpop.eup %11208 }
0x16da   :  { %v6111_v47 = vadd.f32 1.0, %v11209_v55  ;;  %v11211_v56 = vpop.eup %11210 }
0x16db   :  { %v6118_v49 = vadd.f32 1.0, %v11211_v56 }
0x16dc   :  { %11212 = vrcp.f32 %v6111_v47 }
0x16dd   :  { %11214 = vrcp.f32 %v6118_v49 }
0x16e6   :  { %v11213_v33 = vpop.eup %11212 }
0x16e7   :  { %v6121_v57 = vmul.f32 %v11213_v33, %v6104_v27  ;;  %v11215_v58 = vpop.eup %11214 }
0x16e8   :  { %v6124_v59 = vsub.f32 1.0, %v11215_v58  ;;  %v6127_v25 = vmul.f32 %v11215_v58, %v5894_v30 }
0x16e9   :  { %v6122_v17 = vadd.f32 %v6121_v57, %v12267_v18 }
0x16eb   :  { %11216 = vtanh.f32 %v6122_v17 }
0x16f5   :  { %v11217_v24 = vpop.eup %11216 }
0x16f6   :  { %v6125_v61 = vmul.f32 %v11217_v24, %v6124_v59 }
0x16f8   :  { %v6128_v2 = vadd.f32 %v6127_v25, %v6125_v61 }
0x16fa   :  { %6129 = vst.msk [vmem:[#allocation2 + $0x8] sm:$0x3] %vm172_vm2, %v6128_v2  ;;  %10416 = vmatmul.mubr.msk.f32.vlgmr.msra.gmra.mrb[70].mxu1 %vm773_vm3, %v6128_v2  ;;  %10423 = vmatmul.mubr.msk.f32.vlgmr.msra.gmra.mrb[72].mxu0 %vm773_vm3, %v6128_v2  ;;  %v6371_v16 = vrot.slane %v6128_v2, 6 }
0x16fb   :  { %10896 = vmatpush3.bf16.msra.mxu1 %v12283_v46  ;;  %10429 = vmatprep.mubr.msk.f32.mxu1 %vm11477_vm0, %v11478_v1 }
0x16fc   :  { %10899 = vmatpush3.bf16.msra.mxu0 %v12242_v6  ;;  %10900 = vmatprep.subr.bf16.mxu1 %v11476_v0 }
0x16fd   :  { %10436 = vmatprep.mubr.msk.f32.mxu0 %vm11477_vm0, %v11478_v1  ;;  %10903 = vmatprep.subr.bf16.mxu0 %v11476_v0 }
0x16fe   :  { %10430 = vmatmul.mubr.msk.f32.vlgmr.msra.gmra.mrb[72].mxu1 %vm773_vm3, %v6128_v2 }
0x16ff   :  { %10902 = vmatpush3.bf16.msra.mxu1 %v12247_v51  ;;  %10443 = vmatprep.mubr.msk.f32.mxu1 %vm11477_vm0, %v11478_v1 }
0x1700   :  { %10906 = vmatprep.subr.bf16.mxu1 %v11476_v0 }
0x17cd   :  { %v6199_v63 = vpop.f32.mrb[70].mxu1  ;;  %v6269_v3 = vpop.f32.mrb[72].mxu0 }
0x17ce   :  { %v6200_v4 = vadd.f32 %v12257_v12, %v6199_v63  ;;  %v6270_v5 = vadd.f32 %v12265_v62, %v6269_v3  ;;  %v10417_v36 = vpop.f32.mrb[71].mxu1  ;;  %v10424_v50 = vpop.f32.mrb[73].mxu0 }
0x17d0   :  { %v6344_v19 = vrot.slane %v6200_v4, 6  ;;  %v6354_v45 = vrot.slane %v6270_v5, 6 }
0x17d1   :  { %v6339_v7 = vpop.f32.mrb[72].mxu1 }
0x17d2   :  { %v6346_v35 = vadd.f32 %v6344_v19, %v12253_v42  ;;  %v6356_v8 = vadd.f32 %v6354_v45, %v12255_v11  ;;  %v10431_v9 = vpop.f32.mrb[73].mxu1  ;;  %v6340_v21 = vadd.f32 %v12271_v32, %v6339_v7  ;;  %v6870_v45 = vld [vmem:[#allocation2] sm:$0xff]  ;;  %v9465_v7 = vld [vmem:[%s12863_s3 + $0x90] sm:$0xff] }
0x17d3   :  { %v9471_v9 = vld [vmem:[%s12863_s3 + $0xa8] sm:$0xff] }
0x17d4   :  { %v9453_v43 = vmul.f32 -1.442695, %v6346_v35  ;;  %v9454_v13 = vmul.f32 -1.442695, %v6356_v8  ;;  %v6364_v14 = vrot.slane %v6340_v21, 6  ;;  %v9466_v35 = vld [vmem:[%s12863_s3 + $0x98] sm:$0xff] }
0x17d5   :  { %v10915_v8 = vpack.c.bf16 %v9466_v35, %v9465_v7 }
0x17d6   :  { %11218 = vpow2.f32 %v9453_v43 }
0x17d7   :  { %11220 = vpow2.f32 %v9454_v13  ;;  %v9475_v13 = vld [vmem:[%s12863_s3 + $0xb0] sm:$0xff] }
0x17e0   :  { %v11219_v15 = vpop.eup %11218 }
0x17e1   :  { %v11221_v53 = vpop.eup %11220  ;;  %v6350_v37 = vadd.f32 1.0, %v11219_v15  ;;  %v9476_v15 = vld [vmem:[%s12863_s3 + $0xb8] sm:$0xff] }
0x17e2   :  { %v6360_v20 = vadd.f32 1.0, %v11221_v53  ;;  %v10923_v53 = vpack.c.bf16 %v9476_v15, %v9475_v13 }
0x17e3   :  { %11222 = vrcp.f32 %v6350_v37 }
0x17e4   :  { %11224 = vrcp.f32 %v6360_v20 }
0x17ed   :  { %v11223_v60 = vpop.eup %11222 }
0x17ee   :  { %v11225_v22 = vpop.eup %11224  ;;  %v6366_v23 = vmul.f32 %v11223_v60, %v6364_v14 }
0x17ef   :  { %v6373_v26 = vmul.f32 %v11225_v22, %v6371_v16  ;;  %v6369_v30 = vsub.f32 1.0, %v11225_v22 }
0x17f0   :  { %v6367_v28 = vadd.f32 %v6366_v23, %v12267_v18 }
0x17f2   :  { %11226 = vtanh.f32 %v6367_v28 }
0x17fc   :  { %v11227_v38 = vpop.eup %11226 }
0x17fd   :  { %v6370_v34 = vmul.f32 %v11227_v38, %v6369_v30 }
0x17ff   :  { %v6374_v39 = vadd.f32 %v6373_v26, %v6370_v34 }
0x1801   :  { %6375 = vst.msk [vmem:[#allocation2 + $0x8] sm:$0xc] %vm1323_vm4, %v6374_v39  ;;  %v6377_v29 = vrot.slane %v6374_v39, 2  ;;  %v6618_v61 = vrot.slane %v6374_v39, 6 }
0x1803   :  { %10437 = vmatmul.mubr.msk.f32.vlgmr.msra.gmra.mrb[74].mxu0 %vm773_vm3, %v6377_v29  ;;  %10444 = vmatmul.mubr.msk.f32.vlgmr.msra.gmra.mrb[74].mxu1 %vm773_vm3, %v6377_v29 }
0x1804   :  { %10905 = vmatpush3.bf16.msra.mxu0 %v12283_v46  ;;  %10450 = vmatprep.mubr.msk.f32.mxu0 %vm11477_vm0, %v11478_v1 }
0x1805   :  { %10908 = vmatpush3.bf16.msra.mxu1 %v12242_v6  ;;  %10909 = vmatprep.subr.bf16.mxu0 %v11476_v0 }
0x1806   :  { %10457 = vmatprep.mubr.msk.f32.mxu1 %vm11477_vm0, %v11478_v1  ;;  %10912 = vmatprep.subr.bf16.mxu1 %v11476_v0 }
0x1807   :  { %10451 = vmatmul.mubr.msk.f32.vlgmr.msra.gmra.mrb[76].mxu0 %vm773_vm3, %v6377_v29 }
0x1808   :  { %10911 = vmatpush3.bf16.msra.mxu0 %v12247_v51  ;;  %10464 = vmatprep.mubr.msk.f32.mxu0 %vm11477_vm0, %v11478_v1 }
0x1809   :  { %10916 = vmatprep.subr.bf16.mxu0 %v10915_v8 }
0x18d6   :  { %v6446_v10 = vpop.f32.mrb[74].mxu0  ;;  %v6516_v31 = vpop.f32.mrb[74].mxu1 }
0x18d7   :  { %v6447_v40 = vadd.f32 %v12257_v12, %v6446_v10  ;;  %v6517_v6 = vadd.f32 %v12265_v62, %v6516_v31  ;;  %v10438_v41 = vpop.f32.mrb[75].mxu0  ;;  %v10445_v44 = vpop.f32.mrb[75].mxu1 }
0x18d9   :  { %v6591_v48 = vrot.slane %v6447_v40, 4  ;;  %v6601_v54 = vrot.slane %v6517_v6, 4 }
0x18da   :  { %v6586_v52 = vpop.f32.mrb[76].mxu0 }
0x18db   :  { %v6593_v55 = vadd.f32 %v6591_v48, %v12253_v42  ;;  %v6603_v47 = vadd.f32 %v6601_v54, %v12255_v11  ;;  %v10452_v56 = vpop.f32.mrb[77].mxu0  ;;  %v6587_v58 = vadd.f32 %v12271_v32, %v6586_v52 }
0x18dd   :  { %v9458_v51 = vmul.f32 -1.442695, %v6593_v55  ;;  %v9459_v49 = vmul.f32 -1.442695, %v6603_v47  ;;  %v6611_v59 = vrot.slane %v6587_v58, 4 }
0x18df   :  { %11228 = vpow2.f32 %v9458_v51  ;;  %v9482_v51 = vld [vmem:[%s12864_s4 + $0xa0] sm:$0xff] }
0x18e0   :  { %11230 = vpow2.f32 %v9459_v49 }
0x18e9   :  { %v11229_v27 = vpop.eup %11228 }
0x18ea   :  { %v11231_v33 = vpop.eup %11230  ;;  %v6597_v57 = vadd.f32 1.0, %v11229_v27  ;;  %v9483_v27 = vld [vmem:[%s12864_s4 + $0xa8] sm:$0xff] }
0x18eb   :  { %v6607_v17 = vadd.f32 1.0, %v11231_v33  ;;  %v12474_v33 = vpack.c.bf16 %v9483_v27, %v9482_v51 }
0x18ec   :  { %11232 = vrcp.f32 %v6597_v57  ;;  %v9467_v57 = vld [vmem:[#allocation8 + $0x9] ss:$0 sm:$0xff] }
0x18ed   :  { %11234 = vrcp.f32 %v6607_v17  ;;  %v9472_v17 = vld [vmem:[#allocation8 + $0xa] ss:$0 sm:$0xff] }
0x18f6   :  { %v11233_v24 = vpop.eup %11232 }
0x18f7   :  { %v11235_v25 = vpop.eup %11234  ;;  %v6613_v2 = vmul.f32 %v11233_v24, %v6611_v59 }
0x18f8   :  { %v6620_v63 = vmul.f32 %v11235_v25, %v6618_v61  ;;  %v6616_v4 = vsub.f32 1.0, %v11235_v25 }
0x18f9   :  { %v6614_v3 = vadd.f32 %v6613_v2, %v12267_v18  ;;  %v12484_v2 = vld [vmem:[#allocation9 + $0x9] ss:$0 sm:$0xff] }
0x18fb   :  { %11236 = vtanh.f32 %v6614_v3 }
0x1905   :  { %v11237_v5 = vpop.eup %11236 }
0x1906   :  { %v6617_v36 = vmul.f32 %v11237_v5, %v6616_v4  ;;  %v9477_v4 = vld [vmem:[#allocation8 + $0xb] ss:$0 sm:$0xff] }
0x1908   :  { %v6621_v50 = vadd.f32 %v6620_v63, %v6617_v36 }
0x190a   :  { %6622 = vst.msk [vmem:[#allocation2 + $0x8] sm:$0x30] %vm1571_vm5, %v6621_v50  ;;  %v6624_v19 = vrot.slane %v6621_v50, 4  ;;  %v6865_v41 = vrot.slane %v6621_v50, 6  ;;  %v12492_v50 = vld [vmem:[#allocation9 + $0xa] ss:$0 sm:$0xff] }
0x190c   :  { %10458 = vmatmul.mubr.msk.f32.vlgmr.msra.gmra.mrb[76].mxu1 %vm773_vm3, %v6624_v19  ;;  %10465 = vmatmul.mubr.msk.f32.vlgmr.msra.gmra.mrb[78].mxu0 %vm773_vm3, %v6624_v19 }
0x190d   :  { %10914 = vmatpush3.bf16.msra.mxu1 %v12283_v46  ;;  %10478 = vmatprep.mubr.msk.f32.mxu0 %vm773_vm3, %v6870_v45  ;;  %v9470_v46 = vld [vmem:[%s12863_s3 + $0xa0] sm:$0xff] }
0x190e   :  { %10471 = vmatprep.mubr.msk.f32.mxu1 %vm11477_vm0, %v11478_v1  ;;  %v10919_v43 = vpack.c.bf16 %v9471_v9, %v9470_v46  ;;  %10918 = vmatpush3.bf16.msra.mxu0 %v10915_v8 }
0x190f   :  { %10924 = vmatprep.subr.bf16.mxu0 %v10923_v53 }
0x1910   :  { %10472 = vmatmul.mubr.msk.f32.vlgmr.msra.gmra.mrb[78].mxu1 %vm773_vm3, %v6624_v19  ;;  %10920 = vmatprep.subr.bf16.mxu1 %v10919_v43 }
0x1911   :  { %10485 = vmatprep.mubr.msk.f32.mxu1 %vm773_vm3, %v6870_v45  ;;  %10922 = vmatpush3.bf16.msra.mxu1 %v10919_v43 }
0x1912   :  { %10927 = vmatprep.subr.bf16.mxu1 %v11476_v0 }
0x19df   :  { %v6693_v37 = vpop.f32.mrb[76].mxu1  ;;  %v6763_v20 = vpop.f32.mrb[78].mxu0 }
0x19e0   :  { %v6694_v21 = vadd.f32 %v12257_v12, %v6693_v37  ;;  %v6764_v14 = vadd.f32 %v12265_v62, %v6763_v20  ;;  %v10459_v60 = vpop.f32.mrb[77].mxu1  ;;  %v10466_v16 = vpop.f32.mrb[79].mxu0 }
0x19e1   :  { %v9484_v16 = vld [vmem:[%s12864_s4 + $0xb0] sm:$0xff] }
0x19e2   :  { %v6838_v22 = vrot.slane %v6694_v21, 2  ;;  %v6848_v23 = vrot.slane %v6764_v14, 2 }
0x19e3   :  { %v6833_v26 = vpop.f32.mrb[78].mxu1 }
0x19e4   :  { %v6840_v28 = vadd.f32 %v6838_v22, %v12253_v42  ;;  %v6850_v30 = vadd.f32 %v6848_v23, %v12255_v11  ;;  %v10473_v38 = vpop.f32.mrb[79].mxu1  ;;  %v6834_v62 = vadd.f32 %v12271_v32, %v6833_v26  ;;  %v9481_v32 = vld [vmem:[%s12864_s4 + $0x98] sm:$0xff] }
0x19e5   :  { %v9485_v22 = vld [vmem:[%s12864_s4 + $0xb8] sm:$0xff] }
0x19e6   :  { %v9463_v34 = vmul.f32 -1.442695, %v6840_v28  ;;  %v9464_v39 = vmul.f32 -1.442695, %v6850_v30  ;;  %v6858_v40 = vrot.slane %v6834_v62, 2  ;;  %v12510_v28 = vpack.c.bf16 %v9485_v22, %v9484_v16 }
0x19e8   :  { %11238 = vpow2.f32 %v9463_v34 }
0x19e9   :  { %11240 = vpow2.f32 %v9464_v39 }
0x19f2   :  { %v11239_v29 = vpop.eup %11238 }
0x19f3   :  { %v11241_v10 = vpop.eup %11240  ;;  %v6844_v31 = vadd.f32 1.0, %v11239_v29 }
0x19f4   :  { %v6854_v12 = vadd.f32 1.0, %v11241_v10 }
0x19f5   :  { %11242 = vrcp.f32 %v6844_v31 }
0x19f6   :  { %11244 = vrcp.f32 %v6854_v12 }
0x19ff   :  { %v11243_v6 = vpop.eup %11242 }
0x1a00   :  { %v11245_v44 = vpop.eup %11244  ;;  %v6860_v42 = vmul.f32 %v11243_v6, %v6858_v40 }
0x1a01   :  { %v6867_v48 = vmul.f32 %v11245_v44, %v6865_v41  ;;  %v6863_v54 = vsub.f32 1.0, %v11245_v44 }
0x1a02   :  { %v6861_v11 = vadd.f32 %v6860_v42, %v12267_v18  ;;  %v9480_v18 = vld [vmem:[%s12864_s4 + $0x90] sm:$0xff]  ;;  %s11479_s4 = smov 32  }
0x1a03   :  { %v12469_v49 = vpack.c.bf16 %v9481_v32, %v9480_v18 }
0x1a04   :  { %11246 = vtanh.f32 %v6861_v11 }
0x1a0e   :  { %v11247_v52 = vpop.eup %11246 }
0x1a0f   :  { %v6864_v55 = vmul.f32 %v11247_v52, %v6863_v54 }
0x1a11   :  { %v6868_v47 = vadd.f32 %v6867_v48, %v6864_v55 }
0x1a13   :  { %6869 = vst.msk [vmem:[#allocation2 + $0x8] sm:$0xc0] %vm1819_vm6, %v6868_v47 }
0x1a1a   :  { %v6871_v56 = vld [vmem:[#allocation2 + $0x8] sm:$0xff] }
0x1a1b   :  { %10479 = vmatmul.mubr.msk.f32.vlgmr.msra.gmra.mrb[80].mxu0 %vm773_vm3, %v6871_v56  ;;  %10486 = vmatmul.mubr.msk.f32.vlgmr.msra.gmra.mrb[80].mxu1 %vm773_vm3, %v6871_v56 }
0x1a1c   :  { %10926 = vmatpush3.bf16.msra.mxu0 %v10923_v53  ;;  %10492 = vmatprep.mubr.msk.f32.mxu0 %vm773_vm3, %v6870_v45  ;;  %v12498_v53 = vld [vmem:[#allocation9 + $0xb] ss:$0 sm:$0xff] }
0x1a1d   :  { %10930 = vmatprep.subr.bf16.mxu0 %v11476_v0  ;;  %10499 = vmatprep.mubr.msk.f32.mxu1 %vm11477_vm0, %v11478_v1 }
0x1a1e   :  { %10929 = vmatpush3.bf16.msra.mxu1 %v12469_v49 }
0x1a1f   :  { %10493 = vmatmul.mubr.msk.f32.vlgmr.msra.gmra.mrb[82].mxu0 %vm773_vm3, %v6871_v56  ;;  %10933 = vmatprep.subr.bf16.mxu1 %v11476_v0 }
0x1a20   :  { %10506 = vmatprep.mubr.msk.f32.mxu0 %vm11477_vm0, %v11478_v1  ;;  %10932 = vmatpush3.bf16.msra.mxu0 %v12474_v33 }
0x1a21   :  { %10936 = vmatprep.subr.bf16.mxu0 %v11476_v0 }
0x1aee   :  { %v10480_v58 = vpop.f32.mrb[80].mxu0  ;;  %v10487_v59 = vpop.f32.mrb[80].mxu1 }
0x1aef   :  { %v12480_v24 = vadd.f32 %v10480_v58, %v9467_v57  ;;  %v12482_v61 = vadd.f32 %v10487_v59, %v9472_v17  ;;  %v6955_v25 = vpop.f32.mrb[81].mxu0  ;;  %v7041_v63 = vpop.f32.mrb[81].mxu1 }
0x1af0   :  { %v12486_v3 = vadd.f32 %v9467_v57, %v6955_v25  ;;  %v12488_v5 = vadd.f32 %v9472_v17, %v7041_v63 }
0x1af2   :  { %v7157_v36 = vadd.f32 %v12484_v2, %v12486_v3  ;;  %v10494_v19 = vpop.f32.mrb[82].mxu0  ;;  %v7170_v46 = vadd.f32 %v12492_v50, %v12488_v5 }
0x1af3   :  { %v12494_v45 = vadd.f32 %v10494_v19, %v9477_v4  ;;  %v7127_v7 = vpop.f32.mrb[83].mxu0 }
0x1af4   :  { %v9487_v35 = vmul.f32 -1.442695, %v7157_v36  ;;  %v9489_v8 = vmul.f32 -1.442695, %v7170_v46  ;;  %v12500_v20 = vadd.f32 %v9477_v4, %v7127_v7 }
0x1af6   :  { %11248 = vpow2.f32 %v9487_v35 }
0x1af7   :  { %11250 = vpow2.f32 %v9489_v8 }
0x1b00   :  { %v11249_v9 = vpop.eup %11248 }
0x1b01   :  { %v7161_v43 = vadd.f32 1.0, %v11249_v9  ;;  %v11251_v13 = vpop.eup %11250 }
0x1b02   :  { %v7174_v15 = vadd.f32 1.0, %v11251_v13 }
0x1b03   :  { %11252 = vrcp.f32 %v7161_v43 }
0x1b04   :  { %11254 = vrcp.f32 %v7174_v15 }
0x1b0d   :  { %v11253_v37 = vpop.eup %11252 }
0x1b0e   :  { %v7183_v21 = vmul.f32 %v11253_v37, %v12498_v53  ;;  %v11255_v60 = vpop.eup %11254 }
0x1b0f   :  { %v7186_v23 = vsub.f32 1.0, %v11255_v60 }
0x1b10   :  { %v7184_v14 = vadd.f32 %v7183_v21, %v12500_v20 }
0x1b12   :  { %11256 = vtanh.f32 %v7184_v14 }
0x1b1c   :  { %v11257_v26 = vpop.eup %11256 }
0x1b1d   :  { %v7187_v30 = vmul.f32 %v11257_v26, %v7186_v23 }
0x1b1f   :  { %10500 = vmatmul.mubr.msk.f32.vlgmr.msra.gmra.mrb[82].mxu1 %vm773_vm3, %v7187_v30  ;;  %7188 = vst.msk [vmem:[#allocation2] sm:$0x3] %vm172_vm2, %v7187_v30  ;;  %10507 = vmatmul.mubr.msk.f32.vlgmr.msra.gmra.mrb[84].mxu0 %vm773_vm3, %v7187_v30  ;;  %v7430_v32 = vrot.slane %v7187_v30, 6 }
0x1b20   :  { %10935 = vmatpush3.bf16.msra.mxu1 %v12510_v28  ;;  %10513 = vmatprep.mubr.msk.f32.mxu1 %vm11477_vm0, %v11478_v1 }
0x1b21   :  { %10938 = vmatpush3.bf16.msra.mxu0 %v12469_v49  ;;  %10939 = vmatprep.subr.bf16.mxu1 %v11476_v0 }
0x1b22   :  { %10520 = vmatprep.mubr.msk.f32.mxu0 %vm11477_vm0, %v11478_v1  ;;  %10942 = vmatprep.subr.bf16.mxu0 %v11476_v0 }
0x1b23   :  { %10514 = vmatmul.mubr.msk.f32.vlgmr.msra.gmra.mrb[84].mxu1 %vm773_vm3, %v7187_v30 }
0x1b24   :  { %10941 = vmatpush3.bf16.msra.mxu1 %v12474_v33  ;;  %10527 = vmatprep.mubr.msk.f32.mxu1 %vm11477_vm0, %v11478_v1 }
0x1b25   :  { %10945 = vmatprep.subr.bf16.mxu1 %v11476_v0 }
0x1bf2   :  { %v7258_v38 = vpop.f32.mrb[82].mxu1  ;;  %v7328_v34 = vpop.f32.mrb[84].mxu0 }
0x1bf3   :  { %v7259_v39 = vadd.f32 %v12484_v2, %v7258_v38  ;;  %v7329_v29 = vadd.f32 %v12492_v50, %v7328_v34  ;;  %v10501_v10 = vpop.f32.mrb[83].mxu1  ;;  %v10508_v31 = vpop.f32.mrb[85].mxu0 }
0x1bf5   :  { %v7403_v12 = vrot.slane %v7259_v39, 6  ;;  %v7413_v62 = vrot.slane %v7329_v29, 6 }
0x1bf6   :  { %v7398_v40 = vpop.f32.mrb[84].mxu1 }
0x1bf7   :  { %v7405_v6 = vadd.f32 %v7403_v12, %v12486_v3  ;;  %v7415_v41 = vadd.f32 %v7413_v62, %v12488_v5  ;;  %v10515_v44 = vpop.f32.mrb[85].mxu1  ;;  %v7399_v47 = vadd.f32 %v12498_v53, %v7398_v40 }
0x1bf9   :  { %v9494_v42 = vmul.f32 -1.442695, %v7405_v6  ;;  %v9495_v48 = vmul.f32 -1.442695, %v7415_v41  ;;  %v7423_v56 = vrot.slane %v7399_v47, 6 }
0x1bfb   :  { %11258 = vpow2.f32 %v9494_v42 }
0x1bfc   :  { %11260 = vpow2.f32 %v9495_v48 }
0x1c05   :  { %v11259_v11 = vpop.eup %11258 }
0x1c06   :  { %v11261_v54 = vpop.eup %11260  ;;  %v7409_v52 = vadd.f32 1.0, %v11259_v11 }
0x1c07   :  { %v7419_v55 = vadd.f32 1.0, %v11261_v54 }
0x1c08   :  { %11262 = vrcp.f32 %v7409_v52 }
0x1c09   :  { %11264 = vrcp.f32 %v7419_v55 }
0x1c12   :  { %v11263_v18 = vpop.eup %11262 }
0x1c13   :  { %v11265_v51 = vpop.eup %11264  ;;  %v7425_v27 = vmul.f32 %v11263_v18, %v7423_v56 }
0x1c14   :  { %v7432_v57 = vmul.f32 %v11265_v51, %v7430_v32  ;;  %v7428_v58 = vsub.f32 1.0, %v11265_v51 }
0x1c15   :  { %v7426_v17 = vadd.f32 %v7425_v27, %v12500_v20 }
0x1c17   :  { %11266 = vtanh.f32 %v7426_v17 }
0x1c21   :  { %v11267_v59 = vpop.eup %11266 }
0x1c22   :  { %v7429_v25 = vmul.f32 %v11267_v59, %v7428_v58 }
0x1c24   :  { %v7433_v63 = vadd.f32 %v7432_v57, %v7429_v25 }
0x1c26   :  { %v7436_v4 = vrot.slane %v7433_v63, 2  ;;  %7434 = vst.msk [vmem:[#allocation2] sm:$0xc] %vm1323_vm4, %v7433_v63  ;;  %v7677_v29 = vrot.slane %v7433_v63, 6 }
0x1c28   :  { %10521 = vmatmul.mubr.msk.f32.vlgmr.msra.gmra.mrb[86].mxu0 %vm773_vm3, %v7436_v4  ;;  %10528 = vmatmul.mubr.msk.f32.vlgmr.msra.gmra.mrb[86].mxu1 %vm773_vm3, %v7436_v4 }
0x1c29   :  { %10944 = vmatpush3.bf16.msra.mxu0 %v12510_v28  ;;  %10534 = vmatprep.mubr.msk.f32.mxu0 %vm11477_vm0, %v11478_v1 }
0x1c2a   :  { %10947 = vmatpush3.bf16.msra.mxu1 %v12469_v49  ;;  %10948 = vmatprep.subr.bf16.mxu0 %v11476_v0 }
0x1c2b   :  { %10541 = vmatprep.mubr.msk.f32.mxu1 %vm11477_vm0, %v11478_v1  ;;  %10951 = vmatprep.subr.bf16.mxu1 %v11476_v0 }
0x1c2c   :  { %10535 = vmatmul.mubr.msk.f32.vlgmr.msra.gmra.mrb[88].mxu0 %vm773_vm3, %v7436_v4 }
0x1c2d   :  { %v8907_v36 = vld [vmem:[#allocation2 + $0x2] sm:$0x3]  ;;  %10950 = vmatpush3.bf16.msra.mxu0 %v12474_v33  ;;  %10548 = vmatprep.mubr.msk.f32.mxu0 %vm11477_vm0, %v11478_v1 }
0x1c2e   :  { %8915 = vrot.lane.b32.xlu0 %v8907_v36, %s11471_s19  ;;  %10954 = vmatprep.subr.bf16.mxu0 %v11476_v0  ;;  %s11480_s19 = smov 48  }
0x1cfb   :  { %v7505_v19 = vpop.f32.mrb[86].mxu0  ;;  %v7575_v7 = vpop.f32.mrb[86].mxu1 }
0x1cfc   :  { %v7506_v35 = vadd.f32 %v12484_v2, %v7505_v19  ;;  %v7576_v46 = vadd.f32 %v12492_v50, %v7575_v7  ;;  %v10522_v8 = vpop.f32.mrb[87].mxu0  ;;  %v10529_v9 = vpop.f32.mrb[87].mxu1 }
0x1cfe   :  { %v7650_v43 = vrot.slane %v7506_v35, 4  ;;  %v7660_v13 = vrot.slane %v7576_v46, 4 }
0x1cff   :  { %v7645_v15 = vpop.f32.mrb[88].mxu0 }
0x1d00   :  { %v7652_v37 = vadd.f32 %v7650_v43, %v12486_v3  ;;  %v7662_v21 = vadd.f32 %v7660_v13, %v12488_v5  ;;  %v10536_v14 = vpop.f32.mrb[89].mxu0  ;;  %v7646_v38 = vadd.f32 %v12498_v53, %v7645_v15 }
0x1d02   :  { %v9499_v60 = vmul.f32 -1.442695, %v7652_v37  ;;  %v9500_v16 = vmul.f32 -1.442695, %v7662_v21  ;;  %v7670_v34 = vrot.slane %v7646_v38, 4 }
0x1d04   :  { %11268 = vpow2.f32 %v9499_v60 }
0x1d05   :  { %11270 = vpow2.f32 %v9500_v16 }
0x1d0e   :  { %v11269_v22 = vpop.eup %11268 }
0x1d0f   :  { %v11271_v23 = vpop.eup %11270  ;;  %v7656_v26 = vadd.f32 1.0, %v11269_v22 }
0x1d10   :  { %v7666_v30 = vadd.f32 1.0, %v11271_v23 }
0x1d11   :  { %11272 = vrcp.f32 %v7656_v26 }
0x1d12   :  { %11274 = vrcp.f32 %v7666_v30 }
0x1d1b   :  { %v11273_v39 = vpop.eup %11272 }
0x1d1c   :  { %v11275_v10 = vpop.eup %11274  ;;  %v7672_v31 = vmul.f32 %v11273_v39, %v7670_v34 }
0x1d1d   :  { %v7679_v12 = vmul.f32 %v11275_v10, %v7677_v29  ;;  %v7675_v40 = vsub.f32 1.0, %v11275_v10 }
0x1d1e   :  { %v7673_v62 = vadd.f32 %v7672_v31, %v12500_v20 }
0x1d20   :  { %11276 = vtanh.f32 %v7673_v62 }
0x1d2a   :  { %v11277_v6 = vpop.eup %11276 }
0x1d2b   :  { %v7676_v41 = vmul.f32 %v11277_v6, %v7675_v40 }
0x1d2d   :  { %v7680_v44 = vadd.f32 %v7679_v12, %v7676_v41 }
0x1d2f   :  { %v7683_v42 = vrot.slane %v7680_v44, 4  ;;  %7681 = vst.msk [vmem:[#allocation2] sm:$0x30] %vm1571_vm5, %v7680_v44  ;;  %v7924_v46 = vrot.slane %v7680_v44, 6 }
0x1d31   :  { %10542 = vmatmul.mubr.msk.f32.vlgmr.msra.gmra.mrb[88].mxu1 %vm773_vm3, %v7683_v42  ;;  %10549 = vmatmul.mubr.msk.f32.vlgmr.msra.gmra.mrb[90].mxu0 %vm773_vm3, %v7683_v42 }
0x1d32   :  { %10953 = vmatpush3.bf16.msra.mxu1 %v12510_v28  ;;  %10555 = vmatprep.mubr.msk.f32.mxu1 %vm11477_vm0, %v11478_v1 }
0x1d33   :  { %10956 = vmatpush3.bf16.msra.mxu0 %v12469_v49  ;;  %10957 = vmatprep.subr.bf16.mxu1 %v11476_v0 }
0x1d34   :  { %10562 = vmatprep.mubr.msk.f32.mxu0 %vm11477_vm0, %v11478_v1  ;;  %10960 = vmatprep.subr.bf16.mxu0 %v11476_v0 }
0x1d35   :  { %10556 = vmatmul.mubr.msk.f32.vlgmr.msra.gmra.mrb[90].mxu1 %vm773_vm3, %v7683_v42 }
0x1d36   :  { %v8908_v48 = vld [vmem:[#allocation2 + $0x4] sm:$0x3]  ;;  %10959 = vmatpush3.bf16.msra.mxu1 %v12474_v33  ;;  %10569 = vmatprep.mubr.msk.f32.mxu1 %vm11477_vm0, %v11478_v1 }
0x1d37   :  { %8919 = vrot.lane.b32.xlu0 %v8908_v48, %s11479_s4  ;;  %10963 = vmatprep.subr.bf16.mxu1 %v11476_v0 }
0x1e04   :  { %v7752_v11 = vpop.f32.mrb[88].mxu1  ;;  %v7822_v54 = vpop.f32.mrb[90].mxu0 }
0x1e05   :  { %v7753_v52 = vadd.f32 %v12484_v2, %v7752_v11  ;;  %v7823_v55 = vadd.f32 %v12492_v50, %v7822_v54  ;;  %v10543_v47 = vpop.f32.mrb[89].mxu1  ;;  %v10550_v56 = vpop.f32.mrb[91].mxu0 }
0x1e07   :  { %v7897_v18 = vrot.slane %v7753_v52, 2  ;;  %v7907_v32 = vrot.slane %v7823_v55, 2 }
0x1e08   :  { %v7892_v51 = vpop.f32.mrb[90].mxu1 }
0x1e09   :  { %v7899_v27 = vadd.f32 %v7897_v18, %v12486_v3  ;;  %v7909_v57 = vadd.f32 %v7907_v32, %v12488_v5  ;;  %v10557_v17 = vpop.f32.mrb[91].mxu1  ;;  %v7893_v19 = vadd.f32 %v12498_v53, %v7892_v51 }
0x1e0b   :  { %v9504_v58 = vmul.f32 -1.442695, %v7899_v27  ;;  %v9505_v59 = vmul.f32 -1.442695, %v7909_v57  ;;  %v7917_v7 = vrot.slane %v7893_v19, 2 }
0x1e0d   :  { %11278 = vpow2.f32 %v9504_v58 }
0x1e0e   :  { %11280 = vpow2.f32 %v9505_v59 }
0x1e17   :  { %v11279_v25 = vpop.eup %11278 }
0x1e18   :  { %v11281_v63 = vpop.eup %11280  ;;  %v7903_v4 = vadd.f32 1.0, %v11279_v25 }
0x1e19   :  { %v7913_v36 = vadd.f32 1.0, %v11281_v63 }
0x1e1a   :  { %11282 = vrcp.f32 %v7903_v4 }
0x1e1b   :  { %11284 = vrcp.f32 %v7913_v36 }
0x1e24   :  { %v11283_v35 = vpop.eup %11282 }
0x1e25   :  { %v11285_v8 = vpop.eup %11284  ;;  %v7919_v3 = vmul.f32 %v11283_v35, %v7917_v7 }
0x1e26   :  { %v7926_v9 = vmul.f32 %v11285_v8, %v7924_v46  ;;  %v7922_v43 = vsub.f32 1.0, %v11285_v8 }
0x1e27   :  { %v7920_v5 = vadd.f32 %v7919_v3, %v12500_v20 }
0x1e29   :  { %11286 = vtanh.f32 %v7920_v5 }
0x1e33   :  { %v11287_v13 = vpop.eup %11286 }
0x1e34   :  { %v7923_v15 = vmul.f32 %v11287_v13, %v7922_v43 }
0x1e36   :  { %v7927_v37 = vadd.f32 %v7926_v9, %v7923_v15 }
0x1e38   :  { %v7930_v21 = vrot.slane %v7927_v37, 6  ;;  %7928 = vst.msk [vmem:[#allocation2] sm:$0xc0] %vm1819_vm6, %v7927_v37 }
0x1e3a   :  { %10563 = vmatmul.mubr.msk.f32.vlgmr.msra.gmra.mrb[92].mxu0 %vm773_vm3, %v7930_v21  ;;  %10570 = vmatmul.mubr.msk.f32.vlgmr.msra.gmra.mrb[92].mxu1 %vm773_vm3, %v7930_v21 }
0x1e3b   :  { %10962 = vmatpush3.bf16.msra.mxu0 %v12510_v28  ;;  %10576 = vmatprep.mubr.msk.f32.mxu0 %vm11477_vm0, %v11478_v1 }
0x1e3c   :  { %10965 = vmatpush3.bf16.msra.mxu1 %v12469_v49  ;;  %10966 = vmatprep.subr.bf16.mxu0 %v11476_v0 }
0x1e3d   :  { %10583 = vmatprep.mubr.msk.f32.mxu1 %vm11477_vm0, %v11478_v1  ;;  %10969 = vmatprep.subr.bf16.mxu1 %v11476_v0 }
0x1e3e   :  { %10577 = vmatmul.mubr.msk.f32.vlgmr.msra.gmra.mrb[94].mxu0 %vm773_vm3, %v7930_v21 }
0x1e3f   :  { %v8909_v20 = vld [vmem:[#allocation2 + $0x6] sm:$0x3]  ;;  %10968 = vmatpush3.bf16.msra.mxu0 %v12474_v33  ;;  %10590 = vmatprep.mubr.msk.f32.mxu0 %vm11477_vm0, %v11478_v1 }
0x1e40   :  { %8923 = vrot.lane.b32.xlu1 %v8909_v20, %s11480_s19  ;;  %10972 = vmatprep.subr.bf16.mxu0 %v11476_v0 }
0x1f0d   :  { %v7999_v14 = vpop.f32.mrb[92].mxu0  ;;  %v8069_v60 = vpop.f32.mrb[92].mxu1 }
0x1f0e   :  { %v8000_v16 = vadd.f32 %v12484_v2, %v7999_v14  ;;  %v10564_v22 = vpop.f32.mrb[93].mxu0  ;;  %v10571_v23 = vpop.f32.mrb[93].mxu1  ;;  %v8070_v26 = vadd.f32 %v12492_v50, %v8069_v60 }
0x1f10   :  { %v8143_v30 = vadd.f32 %v8000_v16, %v12480_v24  ;;  %v8150_v29 = vadd.f32 %v8070_v26, %v12482_v61 }
0x1f11   :  { %v8139_v38 = vpop.f32.mrb[94].mxu0 }
0x1f12   :  { %v9509_v34 = vmul.f32 -1.442695, %v8143_v30  ;;  %v10578_v39 = vpop.f32.mrb[95].mxu0  ;;  %v9510_v10 = vmul.f32 -1.442695, %v8150_v29  ;;  %v8140_v6 = vadd.f32 %v12498_v53, %v8139_v38 }
0x1f14   :  { %11288 = vpow2.f32 %v9509_v34 }
0x1f15   :  { %11290 = vpow2.f32 %v9510_v10 }
0x1f1e   :  { %v11289_v31 = vpop.eup %11288 }
0x1f1f   :  { %v8147_v12 = vadd.f32 1.0, %v11289_v31  ;;  %v11291_v62 = vpop.eup %11290 }
0x1f20   :  { %v8154_v40 = vadd.f32 1.0, %v11291_v62 }
0x1f21   :  { %11292 = vrcp.f32 %v8147_v12 }
0x1f22   :  { %11294 = vrcp.f32 %v8154_v40 }
0x1f2b   :  { %v11293_v41 = vpop.eup %11292 }
0x1f2c   :  { %v8157_v44 = vmul.f32 %v11293_v41, %v8140_v6  ;;  %v11295_v48 = vpop.eup %11294 }
0x1f2d   :  { %v8160_v11 = vsub.f32 1.0, %v11295_v48  ;;  %v8163_v55 = vmul.f32 %v11295_v48, %v7930_v21 }
0x1f2e   :  { %v8158_v42 = vadd.f32 %v8157_v44, %v12494_v45 }
0x1f30   :  { %11296 = vtanh.f32 %v8158_v42 }
0x1f3a   :  { %v11297_v54 = vpop.eup %11296 }
0x1f3b   :  { %v8161_v52 = vmul.f32 %v11297_v54, %v8160_v11 }
0x1f3d   :  { %v8164_v47 = vadd.f32 %v8163_v55, %v8161_v52 }
0x1f3f   :  { %10584 = vmatmul.mubr.msk.f32.vlgmr.msra.gmra.mrb[94].mxu1 %vm773_vm3, %v8164_v47  ;;  %8165 = vst.msk [vmem:[#allocation2 + $0x8] sm:$0x3] %vm172_vm2, %v8164_v47  ;;  %10591 = vmatmul.mubr.msk.f32.vlgmr.msra.gmra.mrb[96].mxu0 %vm773_vm3, %v8164_v47  ;;  %v8407_v13 = vrot.slane %v8164_v47, 6 }
0x1f40   :  { %10971 = vmatpush3.bf16.msra.mxu1 %v12510_v28  ;;  %10597 = vmatprep.mubr.msk.f32.mxu1 %vm11477_vm0, %v11478_v1 }
0x1f41   :  { %10974 = vmatpush3.bf16.msra.mxu0 %v12469_v49  ;;  %10975 = vmatprep.subr.bf16.mxu1 %v11476_v0 }
0x1f42   :  { %10604 = vmatprep.mubr.msk.f32.mxu0 %vm11477_vm0, %v11478_v1  ;;  %10978 = vmatprep.subr.bf16.mxu0 %v11476_v0 }
0x1f43   :  { %10598 = vmatmul.mubr.msk.f32.vlgmr.msra.gmra.mrb[96].mxu1 %vm773_vm3, %v8164_v47 }
0x1f44   :  { %10977 = vmatpush3.bf16.msra.mxu1 %v12474_v33  ;;  %10611 = vmatprep.mubr.msk.f32.mxu1 %vm11477_vm0, %v11478_v1 }
0x1f45   :  { %10981 = vmatprep.subr.bf16.mxu1 %v11476_v0 }
0x1f46   :  { %v8910_v56 = vld [vmem:[#allocation2 + $0x8] sm:$0x3] }
0x1f47   :  { %8927 = vrot.lane.b32.xlu1 %v8910_v56, %s11481_s24 }
0x2012   :  { %v8235_v18 = vpop.f32.mrb[94].mxu1  ;;  %v8305_v32 = vpop.f32.mrb[96].mxu0 }
0x2013   :  { %v8236_v51 = vadd.f32 %v12484_v2, %v8235_v18  ;;  %v8306_v27 = vadd.f32 %v12492_v50, %v8305_v32  ;;  %v10585_v57 = vpop.f32.mrb[95].mxu1  ;;  %v10592_v17 = vpop.f32.mrb[97].mxu0 }
0x2015   :  { %v8380_v58 = vrot.slane %v8236_v51, 6  ;;  %v8390_v59 = vrot.slane %v8306_v27, 6 }
0x2016   :  { %v8375_v25 = vpop.f32.mrb[96].mxu1 }
0x2017   :  { %v8382_v63 = vadd.f32 %v8380_v58, %v12480_v24  ;;  %v8392_v4 = vadd.f32 %v8390_v59, %v12482_v61  ;;  %v10599_v36 = vpop.f32.mrb[97].mxu1  ;;  %v8376_v9 = vadd.f32 %v12498_v53, %v8375_v25 }
0x2019   :  { %v9514_v19 = vmul.f32 -1.442695, %v8382_v63  ;;  %v9515_v7 = vmul.f32 -1.442695, %v8392_v4  ;;  %v8400_v5 = vrot.slane %v8376_v9, 6 }
0x201b   :  { %11298 = vpow2.f32 %v9514_v19 }
0x201c   :  { %11300 = vpow2.f32 %v9515_v7 }
0x2025   :  { %v11299_v35 = vpop.eup %11298 }
0x2026   :  { %v11301_v46 = vpop.eup %11300  ;;  %v8386_v8 = vadd.f32 1.0, %v11299_v35 }
0x2027   :  { %v8396_v3 = vadd.f32 1.0, %v11301_v46 }
0x2028   :  { %11302 = vrcp.f32 %v8386_v8 }
0x2029   :  { %11304 = vrcp.f32 %v8396_v3 }
0x2032   :  { %v11303_v43 = vpop.eup %11302 }
0x2033   :  { %v11305_v15 = vpop.eup %11304  ;;  %v8402_v37 = vmul.f32 %v11303_v43, %v8400_v5 }
0x2034   :  { %v8409_v21 = vmul.f32 %v11305_v15, %v8407_v13  ;;  %v8405_v14 = vsub.f32 1.0, %v11305_v15 }
0x2035   :  { %v8403_v20 = vadd.f32 %v8402_v37, %v12494_v45 }
0x2037   :  { %11306 = vtanh.f32 %v8403_v20 }
0x2041   :  { %v11307_v60 = vpop.eup %11306 }
0x2042   :  { %v8406_v16 = vmul.f32 %v11307_v60, %v8405_v14 }
0x2044   :  { %v8410_v22 = vadd.f32 %v8409_v21, %v8406_v16 }
0x2046   :  { %v8413_v23 = vrot.slane %v8410_v22, 2  ;;  %8411 = vst.msk [vmem:[#allocation2 + $0x8] sm:$0xc] %vm1323_vm4, %v8410_v22  ;;  %v8654_v55 = vrot.slane %v8410_v22, 6 }
0x2048   :  { %10605 = vmatmul.mubr.msk.f32.vlgmr.msra.gmra.mrb[98].mxu0 %vm773_vm3, %v8413_v23  ;;  %10612 = vmatmul.mubr.msk.f32.vlgmr.msra.gmra.mrb[98].mxu1 %vm773_vm3, %v8413_v23 }
0x2049   :  { %10980 = vmatpush3.bf16.msra.mxu0 %v12510_v28  ;;  %10618 = vmatprep.mubr.msk.f32.mxu0 %vm11477_vm0, %v11478_v1 }
0x204a   :  { %10983 = vmatpush3.bf16.msra.mxu1 %v12469_v49  ;;  %10984 = vmatprep.subr.bf16.mxu0 %v11476_v0 }
0x204b   :  { %10625 = vmatprep.mubr.msk.f32.mxu1 %vm11477_vm0, %v11478_v1  ;;  %10987 = vmatprep.subr.bf16.mxu1 %v11476_v0 }
0x204c   :  { %10619 = vmatmul.mubr.msk.f32.vlgmr.msra.gmra.mrb[100].mxu0 %vm773_vm3, %v8413_v23 }
0x204d   :  { %v8911_v26 = vld [vmem:[#allocation2 + $0xa] sm:$0x3]  ;;  %10986 = vmatpush3.bf16.msra.mxu0 %v12474_v33  ;;  %10632 = vmatprep.mubr.msk.f32.mxu0 %vm11477_vm0, %v11478_v1 }
0x204e   :  { %8931 = vrot.lane.b32.xlu0 %v8911_v26, %s11482_s27 }
0x211b   :  { %v8482_v30 = vpop.f32.mrb[98].mxu0  ;;  %v8552_v38 = vpop.f32.mrb[98].mxu1 }
0x211c   :  { %v8483_v49 = vadd.f32 %v12484_v2, %v8482_v30  ;;  %v8553_v34 = vadd.f32 %v12492_v50, %v8552_v38  ;;  %v10606_v39 = vpop.f32.mrb[99].mxu0  ;;  %v10613_v29 = vpop.f32.mrb[99].mxu1 }
0x211d   :  { %v8916_v38 = vpop.permute.xlu0 %8915  ;;  %v8906_v39 = vld [vmem:[#allocation2] sm:$0x3] }
0x211e   :  { %v8627_v10 = vrot.slane %v8483_v49, 4  ;;  %v8637_v0 = vrot.slane %v8553_v34, 4  ;;  %v8942_v29 = vsel %vm773_vm3, %v8906_v39, %v8916_v38 }
0x211f   :  { %v8622_v31 = vpop.f32.mrb[100].mxu0 }
0x2120   :  { %v8629_v12 = vadd.f32 %v8627_v10, %v12480_v24  ;;  %v8639_v33 = vadd.f32 %v8637_v0, %v12482_v61  ;;  %v10620_v62 = vpop.f32.mrb[101].mxu0  ;;  %v8623_v11 = vadd.f32 %v12498_v53, %v8622_v31 }
0x2121   :  { %v8920_v49 = vpop.permute.xlu0 %8919  ;;  %v9527_v62 = vld [vmem:[%s12867_s7 + $0x1] ss:$0 sm:$0xff] }
0x2122   :  { %v9519_v40 = vmul.f32 -1.442695, %v8629_v12  ;;  %v9520_v6 = vmul.f32 -1.442695, %v8639_v33  ;;  %v8647_v54 = vrot.slane %v8623_v11, 4 }
0x2123   :  { %v9526_v33 = vld [vmem:[%s12867_s7] ss:$0 sm:$0xff]  ;;  %v9531_v11 = vld [vmem:[%s12867_s7 + $0x5] ss:$0 sm:$0xff] }
0x2124   :  { %11308 = vpow2.f32 %v9519_v40 }
0x2125   :  { %11310 = vpow2.f32 %v9520_v6  ;;  %v8932_v10 = vpop.permute.xlu0 %8931  ;;  %v9528_v6 = vld [vmem:[%s12867_s7 + $0x2] ss:$0 sm:$0xff] }
0x212e   :  { %v11309_v41 = vpop.eup %11308 }
0x212f   :  { %v11311_v44 = vpop.eup %11310  ;;  %v8633_v42 = vadd.f32 1.0, %v11309_v41  ;;  %v9529_v41 = vld [vmem:[%s12867_s7 + $0x3] ss:$0 sm:$0xff] }
0x2130   :  { %v8643_v48 = vadd.f32 1.0, %v11311_v44  ;;  %v9530_v44 = vld [vmem:[%s12867_s7 + $0x4] ss:$0 sm:$0xff] }
0x2131   :  { %11312 = vrcp.f32 %v8633_v42 }
0x2132   :  { %11314 = vrcp.f32 %v8643_v48 }
0x213b   :  { %v11313_v52 = vpop.eup %11312 }
0x213c   :  { %v11315_v47 = vpop.eup %11314  ;;  %v8649_v56 = vmul.f32 %v11313_v52, %v8647_v54  ;;  %v9532_v54 = vld [vmem:[%s12867_s7 + $0x6] ss:$0 sm:$0xff]  ;;  %v9533_v52 = vld [vmem:[%s12867_s7 + $0x7] ss:$0 sm:$0xff] }
0x213d   :  { %v8656_v18 = vmul.f32 %v11315_v47, %v8654_v55  ;;  %v8652_v51 = vsub.f32 1.0, %v11315_v47  ;;  %v9534_v47 = vld [vmem:[%s12867_s7 + $0x8] ss:$0 sm:$0xff] }
0x213e   :  { %v8650_v32 = vadd.f32 %v8649_v56, %v12494_v45  ;;  %v9535_v56 = vld [vmem:[%s12867_s7 + $0x9] ss:$0 sm:$0xff] }
0x2140   :  { %11316 = vtanh.f32 %v8650_v32  ;;  %v9537_v32 = vld [vmem:[%s12867_s7 + $0xb] ss:$0 sm:$0xff] }
0x214a   :  { %v11317_v27 = vpop.eup %11316 }
0x214b   :  { %v8653_v57 = vmul.f32 %v11317_v27, %v8652_v51  ;;  %v9538_v51 = vld [vmem:[%s12867_s7 + $0xc] ss:$0 sm:$0xff]  ;;  %v9539_v27 = vld [vmem:[%s12867_s7 + $0xd] ss:$0 sm:$0xff] }
0x214d   :  { %v8657_v17 = vadd.f32 %v8656_v18, %v8653_v57  ;;  %v9536_v18 = vld [vmem:[%s12867_s7 + $0xa] ss:$0 sm:$0xff] }
0x214f   :  { %v8660_v58 = vrot.slane %v8657_v17, 4  ;;  %8658 = vst.msk [vmem:[#allocation2 + $0x8] sm:$0x30] %vm1571_vm5, %v8657_v17  ;;  %v8901_v20 = vrot.slane %v8657_v17, 6 }
0x2151   :  { %10626 = vmatmul.mubr.msk.f32.vlgmr.msra.gmra.mrb[100].mxu1 %vm773_vm3, %v8660_v58  ;;  %10633 = vmatmul.mubr.msk.f32.vlgmr.msra.gmra.mrb[102].mxu0 %vm773_vm3, %v8660_v58 }
0x2152   :  { %10989 = vmatpush3.bf16.msra.mxu1 %v12510_v28  ;;  %10639 = vmatprep.mubr.msk.f32.mxu1 %vm11477_vm0, %v11478_v1 }
0x2155   :  { %10640 = vmatmul.mubr.msk.f32.vlgmr.msra.gmra.mrb[102].mxu1 %vm773_vm3, %v8660_v58 }
0x2156   :  { %v8912_v59 = vld [vmem:[#allocation2 + $0xc] sm:$0x3] }
0x2157   :  { %8935 = vrot.lane.b32.xlu1 %v8912_v59, %s11483_s28 }
0x2224   :  { %v8729_v25 = vpop.f32.mrb[100].mxu1  ;;  %v8799_v63 = vpop.f32.mrb[102].mxu0 }
0x2225   :  { %v8730_v4 = vadd.f32 %v12484_v2, %v8729_v25  ;;  %v8800_v36 = vadd.f32 %v12492_v50, %v8799_v63  ;;  %v10627_v19 = vpop.f32.mrb[101].mxu1  ;;  %v10634_v7 = vpop.f32.mrb[103].mxu0 }
0x2227   :  { %v8874_v35 = vrot.slane %v8730_v4, 2  ;;  %v8884_v46 = vrot.slane %v8800_v36, 2 }
0x2228   :  { %v8869_v8 = vpop.f32.mrb[102].mxu1 }
0x2229   :  { %v8876_v28 = vadd.f32 %v8874_v35, %v12480_v24  ;;  %v8886_v1 = vadd.f32 %v8884_v46, %v12482_v61  ;;  %v10641_v3 = vpop.f32.mrb[103].mxu1  ;;  %v8870_v50 = vadd.f32 %v12498_v53, %v8869_v8  ;;  %v8924_v53 = vpop.permute.xlu1 %8923 }
0x222b   :  { %v9524_v9 = vmul.f32 -1.442695, %v8876_v28  ;;  %v9525_v5 = vmul.f32 -1.442695, %v8886_v1  ;;  %v8894_v37 = vrot.slane %v8870_v50, 2 }
0x222d   :  { %11318 = vpow2.f32 %v9524_v9  ;;  %v8928_v34 = vpop.permute.xlu1 %8927 }
0x222e   :  { %11320 = vpow2.f32 %v9525_v5 }
0x2231   :  { %v8936_v31 = vpop.permute.xlu1 %8935 }
0x2237   :  { %v11319_v43 = vpop.eup %11318 }
0x2238   :  { %v11321_v13 = vpop.eup %11320  ;;  %v8880_v15 = vadd.f32 1.0, %v11319_v43 }
0x2239   :  { %v8890_v2 = vadd.f32 1.0, %v11321_v13 }
0x223a   :  { %11322 = vrcp.f32 %v8880_v15 }
0x223b   :  { %11324 = vrcp.f32 %v8890_v2 }
0x2244   :  { %v11323_v21 = vpop.eup %11322 }
0x2245   :  { %v11325_v14 = vpop.eup %11324  ;;  %v8896_v24 = vmul.f32 %v11323_v21, %v8894_v37 }
0x2246   :  { %v8903_v60 = vmul.f32 %v11325_v14, %v8901_v20  ;;  %v8899_v16 = vsub.f32 1.0, %v11325_v14 }
0x2247   :  { %v8897_v61 = vadd.f32 %v8896_v24, %v12494_v45  ;;  %v8943_v45 = vsel %vm98_vm1, %v8942_v29, %v8920_v49 }
0x2248   :  { %v8945_v0 = vsel %vm8944_vm7, %v8943_v45, %v8924_v53 }
0x2249   :  { %11326 = vtanh.f32 %v8897_v61  ;;  %v8947_v12 = vsel %vm8946_vm8, %v8945_v0, %v8928_v34 }
0x224a   :  { %v8949_v40 = vsel %vm8948_vm9, %v8947_v12, %v8932_v10 }
0x224b   :  { %v8951_v42 = vsel %vm8950_vm10, %v8949_v40, %v8936_v31 }
0x2253   :  { %v11327_v22 = vpop.eup %11326 }
0x2254   :  { %v8900_v23 = vmul.f32 %v11327_v22, %v8899_v16 }
0x2256   :  { %v8904_v26 = vadd.f32 %v8903_v60, %v8900_v23 }
0x2258   :  { %8905 = vst.msk [vmem:[#allocation2 + $0x8] sm:$0xc0] %vm1819_vm6, %v8904_v26 }
0x225f   :  { %v8913_v30 = vld [vmem:[#allocation2 + $0xe] sm:$0x3] }
0x2260   :  { %8939 = vrot.lane.b32.xlu0 %v8913_v30, %s11484_s29 }
0x22d2   :  { %v8940_v48 = vpop.permute.xlu0 %8939 }
0x22d3   :  { %v8953_v55 = vsel %vm8952_vm11, %v8951_v42, %v8940_v48 }
0x22d4   :  { %8954 = vst [vmem:[#allocation11] sm:$0x3] %v8953_v55  ;;  %v9067_v57 = vsub.f32 %v8953_v55, %v9526_v33  ;;  %v9068_v17 = vsub.f32 %v8953_v55, %v9527_v62  ;;  %v9069_v58 = vsub.f32 %v8953_v55, %v9528_v6 }
0x22d5   :  { %11427 = shalt.err (!%p11424_p8)
}
0x22d6   :  { %s11428_s10 = scalar_lea.hbm %s12868_s8, 32 }
0x22d7   :  { %p11429_p9 = scmp.ne.s32.totalorder %s12868_s8, %s11428_s10  ;;  %p11432_p10 = scmp.lt.u32.totalorder %s11428_s10, %s12868_s8 }
0x22d9   :  { %p11434_p11 = pnand %p11432_p10, %p11429_p9 }
0x22db   :  { %11437 = shalt.err (!%p11434_p11)
}
0x22dc   :  { %9220 = dma.vmem_to_hbm [thread:$0]  %s9218_s1, 32, %s12868_s8, [#allocation5]   ;;  %v9540_v59 = vld [vmem:[%s12867_s7 + $0xe] ss:$0 sm:$0xff]  ;;  %v9070_v25 = vsub.f32 %v8953_v55, %v9529_v41  ;;  %v9071_v63 = vsub.f32 %v8953_v55, %v9530_v44  ;;  %v9072_v4 = vsub.f32 %v8953_v55, %v9531_v11  ;;  %vm12870_vm12 = vcmask 1041408  }
0x22dd   :  { %v9541_v36 = vld [vmem:[%s12867_s7 + $0xf] ss:$0 sm:$0xff]  ;;  %v9073_v19 = vsub.f32 %v8953_v55, %v9532_v54  ;;  %v9074_v7 = vsub.f32 %v8953_v55, %v9533_v52  ;;  %v9075_v35 = vsub.f32 %v8953_v55, %v9534_v47  ;;  %v9076_v46 = vsub.f32 %v8953_v55, %v9535_v56  ;;  %s11487_s7 = smov [#allocation12]  }
0x22de   :  { %v9077_v8 = vsub.f32 %v8953_v55, %v9536_v18  ;;  %v9078_v28 = vsub.f32 %v8953_v55, %v9537_v32  ;;  %v9079_v1 = vsub.f32 %v8953_v55, %v9538_v51  ;;  %v9080_v3 = vsub.f32 %v8953_v55, %v9539_v27  ;;  %s9227_s8 = sshll.u32 %s11487_s7, 4  ;;  %s9228_s8 = int_to_ptr.vmem [resolvable:$true] %s9227_s8 }
0x22df   :  { %v9081_v9 = vsub.f32 %v8953_v55, %v9540_v59  ;;  %v12720_v5 = vand.u32 2147483647, %v9067_v57  ;;  %v12722_v43 = vand.u32 2147483647, %v9068_v17  ;;  %v12724_v13 = vand.u32 2147483647, %v9069_v58  ;;  %p11443_p13 = scmp.lt.s32.totalorder %s9228_s8, %s9228_s8 }
0x22e0   :  { %v9082_v15 = vsub.f32 %v8953_v55, %v9541_v36  ;;  %v12726_v2 = vand.u32 2147483647, %v9070_v25  ;;  %v12728_v50 = vand.u32 2147483647, %v9071_v63  ;;  %v12730_v37 = vand.u32 2147483647, %v9072_v4 }
0x22e1   :  { %v12732_v21 = vand.u32 2147483647, %v9073_v19  ;;  %v12734_v20 = vand.u32 2147483647, %v9074_v7  ;;  %v12736_v14 = vand.u32 2147483647, %v9075_v35 }
0x22e2   :  { %v12738_v24 = vand.u32 2147483647, %v9076_v46  ;;  %v12740_v60 = vand.u32 2147483647, %v9077_v8  ;;  %v12742_v61 = vand.u32 2147483647, %v9078_v28 }
0x22e3   :  { %v12744_v16 = vand.u32 2147483647, %v9079_v1  ;;  %v12746_v22 = vand.u32 2147483647, %v9080_v3  ;;  %v12748_v23 = vand.u32 2147483647, %v9081_v9 }
0x22e4   :  { %v12750_v26 = vand.u32 2147483647, %v9082_v15  ;;  %v9100_v30 = vsel %vm12870_vm12, %v12720_v5, inf  ;;  %v9101_v38 = vsel %vm12870_vm12, %v12722_v43, inf  ;;  %v9102_v53 = vsel %vm12870_vm12, %v12724_v13, inf  ;;  %s11438_s1 = scalar_lea.vmem %s9228_s8, 32 }
0x22e5   :  { %v9103_v49 = vsel %vm12870_vm12, %v12726_v2, inf  ;;  %v9104_v34 = vsel %vm12870_vm12, %v12728_v50, inf  ;;  %v9106_v39 = vsel %vm12870_vm12, %v12730_v37, inf  ;;  %v9108_v29 = vsel %vm12870_vm12, %v12732_v21, inf  ;;  %p11439_p12 = scmp.ne.s32.totalorder %s9228_s8, %s11438_s1  ;;  %p11444_p0 = scmp.lt.s32.totalorder %s11438_s1, %s11438_s1 }
0x22e6   :  { %v9105_v45 = vmin.f32 %v9100_v30, %v9104_v34  ;;  %v9107_v10 = vmin.f32 %v9101_v38, %v9106_v39  ;;  %v9109_v0 = vmin.f32 %v9102_v53, %v9108_v29  ;;  %v9110_v31 = vsel %vm12870_vm12, %v12734_v20, inf }
0x22e7   :  { %v9111_v12 = vmin.f32 %v9103_v49, %v9110_v31  ;;  %v9112_v33 = vsel %vm12870_vm12, %v12736_v14, inf  ;;  %v9114_v62 = vsel %vm12870_vm12, %v12738_v24, inf  ;;  %v9116_v40 = vsel %vm12870_vm12, %v12740_v60, inf  ;;  %p11445_p1 = por %p11444_p0, %p11443_p13 }
0x22e8   :  { %v9113_v6 = vmin.f32 %v9105_v45, %v9112_v33  ;;  %v9115_v41 = vmin.f32 %v9107_v10, %v9114_v62  ;;  %v9117_v44 = vmin.f32 %v9109_v0, %v9116_v40  ;;  %v9118_v42 = vsel %vm12870_vm12, %v12742_v61, inf }
0x22e9   :  { %v9119_v48 = vmin.f32 %v9111_v12, %v9118_v42  ;;  %v9120_v11 = vsel %vm12870_vm12, %v12744_v16, inf  ;;  %v9122_v54 = vsel %vm12870_vm12, %v12746_v22, inf  ;;  %v9124_v52 = vsel %vm12870_vm12, %v12748_v23, inf  ;;  %p11446_p2 = pnand %p11445_p1, %p11439_p12 }
0x22ea   :  { %v9121_v55 = vmin.f32 %v9113_v6, %v9120_v11  ;;  %v9123_v47 = vmin.f32 %v9115_v41, %v9122_v54  ;;  %v9125_v56 = vmin.f32 %v9117_v44, %v9124_v52  ;;  %v9126_v18 = vsel %vm12870_vm12, %v12750_v26, inf }
0x22eb   :  { %v9127_v32 = vmin.f32 %v9119_v48, %v9126_v18  ;;  %v11486_v17 = vmov 16.0  }
0x22ec   :  { %v9128_v51 = vmin.f32 %v9121_v55, %v9123_v47 }
0x22ed   :  { %v9129_v27 = vmin.f32 %v9125_v56, %v9127_v32 }
0x22ef   :  { %v9130_v57 = vmin.f32 %v9128_v51, %v9129_v27 }
0x22f1   :  { %vm9147_vm13 = vcmp.le.f32.partialorder %v12720_v5, %v9130_v57  ;;  %vm9148_vm14 = vcmp.le.f32.partialorder %v12722_v43, %v9130_v57  ;;  %vm9149_vm15 = vcmp.le.f32.partialorder %v12724_v13, %v9130_v57  ;;  %vm9150_vm0 = vcmp.le.f32.partialorder %v12726_v2, %v9130_v57 }
0x22f2   :  { %vm9151_vm1 = vcmp.le.f32.partialorder %v12728_v50, %v9130_v57  ;;  %vm9152_vm2 = vcmp.le.f32.partialorder %v12730_v37, %v9130_v57  ;;  %vm9153_vm3 = vcmp.le.f32.partialorder %v12732_v21, %v9130_v57  ;;  %vm9154_vm4 = vcmp.le.f32.partialorder %v12734_v20, %v9130_v57 }
0x22f3   :  { %vm9155_vm5 = vcmp.le.f32.partialorder %v12736_v14, %v9130_v57  ;;  %vm9156_vm6 = vcmp.le.f32.partialorder %v12738_v24, %v9130_v57  ;;  %vm9157_vm7 = vcmp.le.f32.partialorder %v12740_v60, %v9130_v57  ;;  %vm9158_vm8 = vcmp.le.f32.partialorder %v12742_v61, %v9130_v57 }
0x22f4   :  { %vm9159_vm9 = vcmp.le.f32.partialorder %v12744_v16, %v9130_v57  ;;  %vm9160_vm10 = vcmp.le.f32.partialorder %v12746_v22, %v9130_v57  ;;  %vm9161_vm11 = vcmp.le.f32.partialorder %v12748_v23, %v9130_v57  ;;  %vm9162_vm12 = vcmp.le.f32.partialorder %v12750_v26, %v9130_v57 }
0x22f5   :  { %v9163_v58 = vsel %vm9147_vm13, 0.0, %v11486_v17  ;;  %v9164_v59 = vsel %vm9148_vm14, 1.0, %v11486_v17  ;;  %v9165_v25 = vsel %vm9149_vm15, 2.0, %v11486_v17  ;;  %v9166_v63 = vsel %vm9150_vm0, 3.0, %v11486_v17 }
0x22f6   :  { %v9167_v4 = vsel %vm9151_vm1, 4.0, %v11486_v17  ;;  %v9168_v36 = vsel %vm9152_vm2, 5.0, %v11486_v17  ;;  %v9169_v19 = vsel %vm9153_vm3, 6.0, %v11486_v17  ;;  %v9170_v7 = vsel %vm9154_vm4, 7.0, %v11486_v17 }
0x22f7   :  { %v9171_v35 = vsel %vm9155_vm5, 8.0, %v11486_v17  ;;  %v9172_v46 = vsel %vm9156_vm6, 9.0, %v11486_v17  ;;  %v9173_v8 = vsel %vm9157_vm7, 10.0, %v11486_v17  ;;  %v9174_v28 = vsel %vm9158_vm8, 11.0, %v11486_v17 }
0x22f8   :  { %v9175_v1 = vsel %vm9159_vm9, 12.0, %v11486_v17  ;;  %v9176_v3 = vsel %vm9160_vm10, 13.0, %v11486_v17  ;;  %v9177_v9 = vsel %vm9161_vm11, 14.0, %v11486_v17  ;;  %v9178_v5 = vsel %vm9162_vm12, 15.0, %v11486_v17 }
0x22f9   :  { %vm12871_vm13 = vcmask 1041408  }
0x22fa   :  { %v9179_v43 = vsel %vm12871_vm13, %v9163_v58, inf  ;;  %vm12872_vm14 = vmmov %vm12871_vm13 }
0x22fb   :  { %v9180_v13 = vsel %vm12872_vm14, %v9164_v59, inf  ;;  %vm12873_vm15 = vmmov %vm12871_vm13 }
0x22fc   :  { %v9181_v15 = vsel %vm12873_vm15, %v9165_v25, inf  ;;  %vm12874_vm0 = vmmov %vm12871_vm13 }
0x22fd   :  { %v9182_v2 = vsel %vm12874_vm0, %v9166_v63, inf  ;;  %vm12875_vm1 = vmmov %vm12874_vm0 }
0x22fe   :  { %v9183_v50 = vsel %vm12875_vm1, %v9167_v4, inf  ;;  %vm12876_vm2 = vmmov %vm12874_vm0 }
0x22ff   :  { %v9185_v37 = vsel %vm12876_vm2, %v9168_v36, inf  ;;  %vm12877_vm3 = vmmov %vm12874_vm0  ;;  %v9184_v14 = vmin.f32 %v9179_v43, %v9183_v50 }
0x2300   :  { %v9187_v21 = vsel %vm12877_vm3, %v9169_v19, inf  ;;  %vm12878_vm4 = vmmov %vm12874_vm0  ;;  %v9186_v24 = vmin.f32 %v9180_v13, %v9185_v37 }
0x2301   :  { %v9189_v20 = vsel %vm12878_vm4, %v9170_v7, inf  ;;  %v9188_v60 = vmin.f32 %v9181_v15, %v9187_v21  ;;  %vm12879_vm12 = vmmov %vm12874_vm0 }
0x2302   :  { %v9190_v61 = vmin.f32 %v9182_v2, %v9189_v20  ;;  %v9191_v16 = vsel %vm12879_vm12, %v9171_v35, inf  ;;  %vm12880_vm5 = vmmov %vm12874_vm0 }
0x2303   :  { %v9193_v22 = vsel %vm12880_vm5, %v9172_v46, inf  ;;  %vm12881_vm6 = vmmov %vm12874_vm0  ;;  %v9192_v30 = vmin.f32 %v9184_v14, %v9191_v16 }
0x2304   :  { %v9195_v23 = vsel %vm12881_vm6, %v9173_v8, inf  ;;  %vm12882_vm7 = vmmov %vm12874_vm0  ;;  %v9194_v38 = vmin.f32 %v9186_v24, %v9193_v22 }
0x2305   :  { %v9197_v26 = vsel %vm12882_vm7, %v9174_v28, inf  ;;  %v9196_v53 = vmin.f32 %v9188_v60, %v9195_v23  ;;  %vm12883_vm8 = vmmov %vm12874_vm0 }
0x2306   :  { %v9198_v49 = vmin.f32 %v9190_v61, %v9197_v26  ;;  %v9199_v34 = vsel %vm12883_vm8, %v9175_v1, inf  ;;  %vm12884_vm9 = vmmov %vm12874_vm0 }
0x2307   :  { %v9201_v39 = vsel %vm12884_vm9, %v9176_v3, inf  ;;  %vm12885_vm10 = vmmov %vm12874_vm0  ;;  %v9200_v10 = vmin.f32 %v9192_v30, %v9199_v34 }
0x2308   :  { %v9203_v29 = vsel %vm12885_vm10, %v9177_v9, inf  ;;  %vm12886_vm11 = vmmov %vm12874_vm0  ;;  %v9202_v0 = vmin.f32 %v9194_v38, %v9201_v39 }
0x2309   :  { %v9205_v45 = vsel %vm12886_vm11, %v9178_v5, inf  ;;  %v9204_v31 = vmin.f32 %v9196_v53, %v9203_v29 }
0x230a   :  { %v9206_v12 = vmin.f32 %v9198_v49, %v9205_v45  ;;  %v9207_v33 = vmin.f32 %v9200_v10, %v9202_v0 }
0x230c   :  { %v9208_v62 = vmin.f32 %v9204_v31, %v9206_v12 }
0x230e   :  { %v9209_v40 = vmin.f32 %v9207_v33, %v9208_v62 }
0x2310   :  { %9210 = vst [vmem:[#allocation12] sm:$0x3] %v9209_v40 }
0x2311   :  { %11449 = shalt.err (!%p11446_p2)
}
0x2312   :  { %s11450_s23 = scalar_lea.hbm %s12869_s9, 32 }
0x2313   :  { %p11451_p3 = scmp.ne.s32.totalorder %s12869_s9, %s11450_s23  ;;  %p11454_p4 = scmp.lt.u32.totalorder %s11450_s23, %s12869_s9 }
0x2315   :  { %p11456_p5 = pnand %p11454_p4, %p11451_p3 }
0x2317   :  { %11459 = shalt.err (!%p11456_p5)
}
0x2318   :  { %9230 = dma.vmem_to_hbm [thread:$0]  %s9228_s8, 32, %s12869_s9, [#allocation13]  }
0x2319   :  { %11466 = dma.done.wait [#allocation5], 32  }
0x231a   :  { %11467 = vsyncadd [#allocation5], 4294967264 }
0x231b   :  { %11468 = dma.done.wait [#allocation13], 32  }
0x231c   :  { %11469 = vsyncadd [#allocation13], 4294967264 }
0x231d   :  { %9237 = vsyncpa [#allocation4], 1 }
0x231e   :  { %9238 = vsyncpa [#allocation7], 1 }
0x231f   :  { %9239 = vsyncpa [#allocation10], 1 }
0x2320   :  { %9240 = vsyncpa [#allocation5], 1 }
0x2321   :  { %9241 = vsyncpa [#allocation13], 1 }

</bundles_post_ra>
